<compile_context>
chip_gen: v6e
topology: v6e:2x2x1
jax: 0.10.0
libtpu: 0.0.40
codegen_flags: <defaults>
</compile_context>

<pallas_src>
import functools

import jax
import jax.numpy as jnp
from jax import lax
from jax.experimental import pallas as pl
from jax.experimental.pallas import tpu as pltpu

_LANE = 128
# 48 MiB is safe on all generations (v7x has 64 MiB physical VMEM per TC);
# raise to 64-96 MiB on v5e/v6e for large layers / bigger row tiles.
_VMEM_LIMIT = 48 * 1024 * 1024


def _round_up(x, m):
    return (x + m - 1) // m * m


def _pick_th(ho, wo, target):
    """Row-tile height: divides ho, prefers th*wo % 8 == 0 (sublane-dense)."""
    divs = [t for t in range(1, ho + 1) if ho % t == 0]
    good = [t for t in divs if (t * wo) % 8 == 0]
    cands = good if good else divs
    below = [t for t in cands if t <= max(1, target)]
    return max(below) if below else min(cands)


def _make_spec(shape, index_map, *, n_buffers=None):
    """BlockSpec; optionally request an explicit buffer count for resident
    (constant-index) operands.  Falls back if this JAX lacks pipeline_mode."""
    if n_buffers is not None:
        try:
            return pl.BlockSpec(shape, index_map,
                                pipeline_mode=pl.Buffered(n_buffers))
        except Exception:  # older JAX without pipeline_mode / Buffered
            pass
    return pl.BlockSpec(shape, index_map)


# ------------------------------ fused kernel --------------------------------

def _block_kernel(x_ref, w1_ref, s1_ref, b1_ref, w2_ref, s2_ref, b2_ref,
                  w3_ref, s3_ref, b3_ref, *rest,
                  stride, th, wo, h, w, has_shortcut):
    if has_shortcut:
        ws_ref, ss_ref, bs_ref, o_ref, h1_ref = rest
    else:
        o_ref, h1_ref = rest

    i = pl.program_id(1)
    wp_pad, cin_p = x_ref.shape[2], x_ref.shape[3]
    cgp = w1_ref.shape[1]
    th_in = (th - 1) * stride + 3            # input rows needed (incl. halo)
    r_ext = (th - 1) * stride + 1
    c_ext = (wo - 1) * stride + 1
    row0 = i * th * stride                   # top padded row of this window

    # ---- conv1 (1x1) + bn1 + relu on the (th_in, wp_pad) window -------------
    xw = x_ref[0, pl.ds(row0, th_in), :, :].reshape(th_in * wp_pad, cin_p)
    y1 = jnp.dot(xw, w1_ref[...], preferred_element_type=jnp.float32)
    y1 = jnp.maximum(y1 * s1_ref[...] + b1_ref[...], 0.0)
    y1 = y1.reshape(th_in, wp_pad, cgp)
    # Zero the halo ring (conv1 of zero-padding is relu(b1) != 0, but the 3x3
    # conv must see zeros there).  Iota compare in-kernel; no mask input.
    rr = lax.broadcasted_iota(jnp.int32, (th_in, wp_pad, 1), 0) + row0
    cc = lax.broadcasted_iota(jnp.int32, (th_in, wp_pad, 1), 1)
    interior = (rr >= 1) & (rr <= h) & (cc >= 1) & (cc <= w)
    h1_ref[...] = jnp.where(interior, y1, 0.0).astype(h1_ref.dtype)

    # ---- grouped 3x3 conv (block-diag dense, kx K-stacked) + bn2 + relu -----
    h1 = h1_ref[...]                                        # (th_in, wp_pad, C) bf16
    acc = None
    for ky in range(3):
        lhs = jnp.concatenate(
            [lax.slice(h1, (ky, kx, 0), (ky + r_ext, kx + c_ext, cgp),
                       (stride, stride, 1)).reshape(th * wo, cgp)
             for kx in range(3)], axis=-1)                  # (th*wo, 3*C) bf16
        d = jnp.dot(lhs, w2_ref[ky], preferred_element_type=jnp.float32)
        acc = d if acc is None else acc + d                 # register adds, no VMEM RMW
    h2 = jnp.maximum(acc * s2_ref[...] + b2_ref[...], 0.0).astype(jnp.bfloat16)

    # ---- conv3 (1x1) + bn3 + shortcut + relu (single bf16 store) ------------
    y3 = jnp.dot(h2, w3_ref[...], preferred_element_type=jnp.float32)
    y3 = y3 * s3_ref[...] + b3_ref[...]
    # Shortcut input: (strided) spatial subsample of the resident padded image
    # -- taken in-kernel, never materialized in HBM.
    xs = x_ref[0, pl.ds(row0 + 1, r_ext), pl.ds(1, c_ext), :]
    if stride != 1:
        xs = lax.slice(xs, (0, 0, 0), (r_ext, c_ext, cin_p),
                       (stride, stride, 1))
    xs = xs.reshape(th * wo, cin_p)
    if has_shortcut:
        sc = jnp.dot(xs, ws_ref[...], preferred_element_type=jnp.float32)
        sc = sc * ss_ref[...] + bs_ref[...]
    else:
        sc = xs.astype(jnp.float32)          # identity (stride==1, cin_p==out_p)
    out = jnp.maximum(y3 + sc, 0.0)
    o_ref[...] = out.reshape(o_ref.shape).astype(o_ref.dtype)


# --------------------------- parameters / prep -------------------------------

def init_block_params(key, in_planes, cardinality, bottleneck_width, stride):
    gw = cardinality * bottleneck_width
    out_planes = 2 * gw  # expansion = 2
    keys = jax.random.split(key, 8)

    def conv_w(k, cout, cin, kh, kw):
        fan_in = cin * kh * kw
        return jax.random.normal(k, (cout, cin, kh, kw), jnp.float32) / jnp.sqrt(fan_in)

    def bn(k, c):
        k1, k2, k3, k4 = jax.random.split(k, 4)
        gamma = 1.0 + 0.1 * jax.random.normal(k1, (c,), jnp.float32)
        beta = 0.1 * jax.random.normal(k2, (c,), jnp.float32)
        mean = 0.1 * jax.random.normal(k3, (c,), jnp.float32)
        var = 1.0 + 0.1 * jnp.abs(jax.random.normal(k4, (c,), jnp.float32))
        eps = 1e-5
        scale = gamma / jnp.sqrt(var + eps)
        bias = beta - mean * scale
        return scale, bias

    params = {
        "w1": conv_w(keys[0], gw, in_planes, 1, 1),
        "bn1": bn(keys[1], gw),
        "w2": conv_w(keys[2], gw, gw // cardinality, 3, 3),
        "bn2": bn(keys[3], gw),
        "w3": conv_w(keys[4], out_planes, gw, 1, 1),
        "bn3": bn(keys[5], out_planes),
        "has_shortcut": (stride != 1) or (in_planes != out_planes),
    }
    if params["has_shortcut"]:
        params["ws"] = conv_w(keys[6], out_planes, in_planes, 1, 1)
        params["bns"] = bn(keys[7], out_planes)
    return params


def prepare_block_weights(params, cardinality):
    """Channel-pad to multiples of 128 (lane-dense), cast MXU weights to bf16."""
    gw, cin = params["w1"].shape[:2]
    out_planes = params["w3"].shape[0]
    cin_p, gw_p, out_p = (_round_up(c, _LANE) for c in (cin, gw, out_planes))

    def pad_mat(w2d, rows, cols):
        out = jnp.zeros((rows, cols), jnp.float32)
        out = out.at[:w2d.shape[0], :w2d.shape[1]].set(w2d)
        return out.astype(jnp.bfloat16)

    def pad_bn(sb, c):
        s, b = sb
        sp = jnp.ones((c,), jnp.float32).at[:s.shape[0]].set(s)
        bp = jnp.zeros((c,), jnp.float32).at[:b.shape[0]].set(b)
        return sp.reshape(1, c), bp.reshape(1, c)

    prep = {
        "dims": {"cin_p": cin_p, "gw_p": gw_p, "out_p": out_p,
                 "out_planes": out_planes},
        "has_shortcut": params["has_shortcut"],
        "w1": pad_mat(params["w1"][:, :, 0, 0].T, cin_p, gw_p),
        "w3": pad_mat(params["w3"][:, :, 0, 0].T, gw_p, out_p),
    }
    prep["s1"], prep["b1"] = pad_bn(params["bn1"], gw_p)
    prep["s2"], prep["b2"] = pad_bn(params["bn2"], gw_p)
    prep["s3"], prep["b3"] = pad_bn(params["bn3"], out_p)

    # Grouped 3x3 conv as block-diagonal dense taps, K-stacked over kx so the
    # kernel does one (th*wo, 3*gw_p) x (3*gw_p, gw_p) matmul per ky (fills the
    # MXU K dimension; cross-ky accumulation stays in registers, not VMEM).
    # NOTE: the dense block-diagonal form trades extra MXU FLOPs (~cardinality
    # factor) for lane-dense matmuls; revisit on v5e for very wide group_width.
    cg = gw // cardinality
    w2 = params["w2"]                                  # (gw, cg, 3, 3) OIHW
    wd = jnp.zeros((3, 3, gw_p, gw_p), jnp.float32)
    for g in range(cardinality):
        blk = jnp.transpose(w2[g * cg:(g + 1) * cg], (2, 3, 1, 0))  # (3,3,in,out)
        wd = wd.at[:, :, g * cg:(g + 1) * cg, g * cg:(g + 1) * cg].set(blk)
    prep["w2"] = wd.reshape(3, 3 * gw_p, gw_p).astype(jnp.bfloat16)

    if params["has_shortcut"]:
        prep["ws"] = pad_mat(params["ws"][:, :, 0, 0].T, cin_p, out_p)
        prep["ss"], prep["bs"] = pad_bn(params["bns"], out_p)
    return prep


# -------------------------------- forward ------------------------------------

def block_forward(x_nhwc, prep, *, stride, th_target=8, vmem_limit=_VMEM_LIMIT):
    n, h, w, cin = x_nhwc.shape
    d = prep["dims"]
    cin_p, gw_p, out_p = d["cin_p"], d["gw_p"], d["out_p"]
    has_shortcut = prep["has_shortcut"]
    if not has_shortcut:
        assert stride == 1 and cin_p == out_p and cin == d["out_planes"], \
            "identity shortcut requires stride==1 and in_planes==out_planes"

    ho = (h - 1) // stride + 1
    wo = (w - 1) // stride + 1
    hp = h + 2
    wp_pad = _round_up(w + 2, 8)             # sublane-aligned padded width

    # One small wrapper-side pad of the raw input: +1 spatial halo, channel
    # pad to 128, bf16.  (TODO(synk): fold into kernel DMA via index_map.)
    x_p = jnp.zeros((n, hp, wp_pad, cin_p), jnp.bfloat16)
    x_p = x_p.at[:, 1:1 + h, 1:1 + w, :cin].set(x_nhwc.astype(jnp.bfloat16))

    th = _pick_th(ho, wo, th_target)
    bpi = ho // th
    th_in = (th - 1) * stride + 3

    kernel = functools.partial(_block_kernel, stride=stride, th=th, wo=wo,
                               h=h, w=w, has_shortcut=has_shortcut)

    args = [x_p, prep["w1"], prep["s1"], prep["b1"], prep["w2"], prep["s2"],
            prep["b2"], prep["w3"], prep["s3"], prep["b3"]]
    if has_shortcut:
        args += [prep["ws"], prep["ss"], prep["bs"]]

    def build_in_specs(single_buffer):
        nb_ = 1 if single_buffer else None

        def res(shape):
            return _make_spec(shape, lambda nb, i, _z=(0,) * len(shape): _z,
                              n_buffers=nb_)

        specs = [
            # whole padded image, resident across the row-block axis
            pl.BlockSpec((1, hp, wp_pad, cin_p), lambda nb, i: (nb, 0, 0, 0)),
            res((cin_p, gw_p)), res((1, gw_p)), res((1, gw_p)),       # conv1/bn1
            res((3, 3 * gw_p, gw_p)), res((1, gw_p)), res((1, gw_p)),  # conv2/bn2
            res((gw_p, out_p)), res((1, out_p)), res((1, out_p)),      # conv3/bn3
        ]
        if has_shortcut:
            specs += [res((cin_p, out_p)), res((1, out_p)), res((1, out_p))]
        return specs

    def call(single_buffer):
        return pl.pallas_call(
            kernel,
            out_shape=jax.ShapeDtypeStruct((n, ho, wo, out_p), jnp.bfloat16),
            grid=(n, bpi),
            in_specs=build_in_specs(single_buffer),
            out_specs=pl.BlockSpec((1, th, wo, out_p),
                                   lambda nb, i: (nb, i, 0, 0)),
            scratch_shapes=[pltpu.VMEM((th_in, wp_pad, gw_p), jnp.bfloat16)],
            compiler_params=pltpu.CompilerParams(
                dimension_semantics=("parallel", "parallel"),
                vmem_limit_bytes=vmem_limit),
        )(*args)

    try:
        out = call(True)      # single-buffered resident weights (VMEM saver)
    except Exception:
        out = call(False)     # fall back to default double-buffering
    return out[..., :d["out_planes"]]


# ------------------------ pure-JAX reference (check) ------------------------

def reference_forward(x_nhwc, params, *, cardinality, stride):
    x = jnp.transpose(x_nhwc, (0, 3, 1, 2))  # NCHW

    def conv(x, w, stride=1, groups=1, padding=0):
        return lax.conv_general_dilated(
            x.astype(jnp.bfloat16), w.astype(jnp.bfloat16),
            (stride, stride), [(padding, padding)] * 2,
            feature_group_count=groups,
            dimension_numbers=("NCHW", "OIHW", "NCHW"),
            preferred_element_type=jnp.float32)

    def bn(x, sb):
        s, b = sb
        return x * s[None, :, None, None] + b[None, :, None, None]

    out = jax.nn.relu(bn(conv(x, params["w1"]), params["bn1"]))
    out = jax.nn.relu(bn(conv(out, params["w2"], stride=stride,
                              groups=cardinality, padding=1), params["bn2"]))
    out = bn(conv(out, params["w3"]), params["bn3"])
    sc = bn(conv(x, params["ws"], stride=stride), params["bns"]) \
        if params["has_shortcut"] else x
    out = jax.nn.relu(out + sc)
    return jnp.transpose(out, (0, 2, 3, 1))


# --------------------------------- main --------------------------------------

if __name__ == "__main__":
    configs = [
        # stride-1 block with 1x1-conv shortcut (in != out planes)
        dict(in_planes=8, cardinality=4, bottleneck_width=4, stride=1,
             N=2, H=8, W=8, th_target=4),
        # stride-2 block with 1x1-conv shortcut (downsampling path)
        dict(in_planes=16, cardinality=4, bottleneck_width=4, stride=2,
             N=2, H=8, W=8, th_target=2),
        # stride-1 block with identity shortcut (in == out planes)
        dict(in_planes=32, cardinality=4, bottleneck_width=4, stride=1,
             N=2, H=8, W=8, th_target=4),
    ]

    key = jax.random.PRNGKey(0)
    for cfg in configs:
        key, kp, kx = jax.random.split(key, 3)
        params = init_block_params(kp, cfg["in_planes"], cfg["cardinality"],
                                   cfg["bottleneck_width"], cfg["stride"])
        x = jax.random.normal(
            kx, (cfg["N"], cfg["H"], cfg["W"], cfg["in_planes"]), jnp.float32)

        prep = prepare_block_weights(params, cfg["cardinality"])
        out = block_forward(x, prep, stride=cfg["stride"],
                            th_target=cfg["th_target"])
        out = jax.block_until_ready(out).astype(jnp.float32)

        ref = reference_forward(x, params, cardinality=cfg["cardinality"],
                                stride=cfg["stride"])
        assert out.shape == ref.shape, (out.shape, ref.shape)
        err = float(jnp.max(jnp.abs(out - ref)))
        assert jnp.allclose(out, ref, atol=3e-2, rtol=3e-2), (cfg, err)

    print("KERNEL_OK")
</pallas_src>

<mosaic_0001>
module attributes {stable_mosaic.version = 11 : i64} {
  func.func @_block_kernel(%arg0: i32, %arg1: i32, %arg2: memref<1x10x16x128xbf16, #tpu.memory_space<vmem>>, %arg3: memref<128x128xbf16, #tpu.memory_space<vmem>>, %arg4: memref<1x128xf32, #tpu.memory_space<vmem>>, %arg5: memref<1x128xf32, #tpu.memory_space<vmem>>, %arg6: memref<3x384x128xbf16, #tpu.memory_space<vmem>>, %arg7: memref<1x128xf32, #tpu.memory_space<vmem>>, %arg8: memref<1x128xf32, #tpu.memory_space<vmem>>, %arg9: memref<128x128xbf16, #tpu.memory_space<vmem>>, %arg10: memref<1x128xf32, #tpu.memory_space<vmem>>, %arg11: memref<1x128xf32, #tpu.memory_space<vmem>>, %arg12: memref<128x128xbf16, #tpu.memory_space<vmem>>, %arg13: memref<1x128xf32, #tpu.memory_space<vmem>>, %arg14: memref<1x128xf32, #tpu.memory_space<vmem>>, %arg15: memref<1x4x8x128xbf16, #tpu.memory_space<vmem>>, %arg16: memref<6x16x128xbf16, #tpu.memory_space<vmem>>) attributes {dimension_semantics = [#tpu.dimension_semantics<parallel>, #tpu.dimension_semantics<parallel>], iteration_bounds = array<i64: 2, 2>, scalar_prefetch = 0 : i64, scratch_operands = 1 : i64, tpu.core_type = #tpu.core_type<tc>, window_params = [{transform_indices = @transform_0, window_bounds = array<i64: 1, 10, 16, 128>}, {pipeline_mode = #tpu.pipeline_mode<synchronous>, transform_indices = @transform_1, window_bounds = array<i64: 128, 128>}, {pipeline_mode = #tpu.pipeline_mode<synchronous>, transform_indices = @transform_2, window_bounds = array<i64: 1, 128>}, {pipeline_mode = #tpu.pipeline_mode<synchronous>, transform_indices = @transform_3, window_bounds = array<i64: 1, 128>}, {pipeline_mode = #tpu.pipeline_mode<synchronous>, transform_indices = @transform_4, window_bounds = array<i64: 3, 384, 128>}, {pipeline_mode = #tpu.pipeline_mode<synchronous>, transform_indices = @transform_5, window_bounds = array<i64: 1, 128>}, {pipeline_mode = #tpu.pipeline_mode<synchronous>, transform_indices = @transform_6, window_bounds = array<i64: 1, 128>}, {pipeline_mode = #tpu.pipeline_mode<synchronous>, transform_indices = @transform_7, window_bounds = array<i64: 128, 128>}, {pipeline_mode = #tpu.pipeline_mode<synchronous>, transform_indices = @transform_8, window_bounds = array<i64: 1, 128>}, {pipeline_mode = #tpu.pipeline_mode<synchronous>, transform_indices = @transform_9, window_bounds = array<i64: 1, 128>}, {pipeline_mode = #tpu.pipeline_mode<synchronous>, transform_indices = @transform_10, window_bounds = array<i64: 128, 128>}, {pipeline_mode = #tpu.pipeline_mode<synchronous>, transform_indices = @transform_11, window_bounds = array<i64: 1, 128>}, {pipeline_mode = #tpu.pipeline_mode<synchronous>, transform_indices = @transform_12, window_bounds = array<i64: 1, 128>}, {transform_indices = @transform_13, window_bounds = array<i64: 1, 4, 8, 128>}]} {
    %c4_i32 = arith.constant 4 : i32
    %0 = arith.muli %arg1, %c4_i32 : i32
    %c1_i32 = arith.constant 1 : i32
    %1 = arith.muli %0, %c1_i32 : i32
    %c0 = arith.constant 0 : index
    %2 = arith.index_cast %1 : i32 to index
    %c0_0 = arith.constant 0 : index
    %c0_1 = arith.constant 0 : index
    %3 = vector.load %arg2[%c0, %2, %c0_0, %c0_1] : memref<1x10x16x128xbf16, #tpu.memory_space<vmem>>, vector<1x6x16x128xbf16>
    %4 = vector.shape_cast %3 : vector<1x6x16x128xbf16> to vector<6x16x128xbf16>
    %5 = vector.shape_cast %4 : vector<6x16x128xbf16> to vector<96x128xbf16>
    %c0_2 = arith.constant 0 : index
    %c0_3 = arith.constant 0 : index
    %6 = vector.load %arg3[%c0_2, %c0_3] : memref<128x128xbf16, #tpu.memory_space<vmem>>, vector<128x128xbf16>
    %cst = arith.constant dense<0.000000e+00> : vector<96x128xf32>
    %7 = tpu.matmul %5, %6, %cst {dimension_numbers = #tpu.dot_dimension_numbers<[1], [0], [0], [1], [0, 0, 1, 1], [], []>} : vector<96x128xbf16>, vector<128x128xbf16>, vector<96x128xf32> -> vector<96x128xf32>
    %c0_4 = arith.constant 0 : index
    %c0_5 = arith.constant 0 : index
    %8 = vector.load %arg4[%c0_4, %c0_5] : memref<1x128xf32, #tpu.memory_space<vmem>>, vector<1x128xf32>
    %9 = vector.broadcast %8 : vector<1x128xf32> to vector<96x128xf32>
    %10 = arith.mulf %7, %9 : vector<96x128xf32>
    %c0_6 = arith.constant 0 : index
    %c0_7 = arith.constant 0 : index
    %11 = vector.load %arg5[%c0_6, %c0_7] : memref<1x128xf32, #tpu.memory_space<vmem>>, vector<1x128xf32>
    %12 = vector.broadcast %11 : vector<1x128xf32> to vector<96x128xf32>
    %13 = arith.addf %10, %12 : vector<96x128xf32>
    %cst_8 = arith.constant 0.000000e+00 : f32
    %14 = vector.broadcast %cst_8 : f32 to vector<96x128xf32>
    %15 = arith.maximumf %13, %14 : vector<96x128xf32>
    %16 = vector.shape_cast %15 : vector<96x128xf32> to vector<6x16x128xf32>
    %17 = tpu.iota {dimensions = array<i32: 0>} : vector<6x16x1xi32>
    %18 = vector.broadcast %1 : i32 to vector<6x16x1xi32>
    %19 = arith.addi %17, %18 : vector<6x16x1xi32>
    %20 = tpu.iota {dimensions = array<i32: 1>} : vector<6x16x1xi32>
    %c1_i32_9 = arith.constant 1 : i32
    %21 = vector.broadcast %c1_i32_9 : i32 to vector<6x16x1xi32>
    %22 = arith.cmpi sge, %19, %21 : vector<6x16x1xi32>
    %c8_i32 = arith.constant 8 : i32
    %23 = vector.broadcast %c8_i32 : i32 to vector<6x16x1xi32>
    %24 = arith.cmpi sle, %19, %23 : vector<6x16x1xi32>
    %25 = arith.andi %22, %24 : vector<6x16x1xi1>
    %c1_i32_10 = arith.constant 1 : i32
    %26 = vector.broadcast %c1_i32_10 : i32 to vector<6x16x1xi32>
    %27 = arith.cmpi sge, %20, %26 : vector<6x16x1xi32>
    %28 = arith.andi %25, %27 : vector<6x16x1xi1>
    %c8_i32_11 = arith.constant 8 : i32
    %29 = vector.broadcast %c8_i32_11 : i32 to vector<6x16x1xi32>
    %30 = arith.cmpi sle, %20, %29 : vector<6x16x1xi32>
    %31 = arith.andi %28, %30 : vector<6x16x1xi1>
    %cst_12 = arith.constant 0.000000e+00 : f32
    %32 = vector.shape_cast %31 : vector<6x16x1xi1> to vector<6x16x1xi1>
    %33 = vector.broadcast %32 : vector<6x16x1xi1> to vector<6x16x128xi1>
    %34 = vector.broadcast %cst_12 : f32 to vector<6x16x128xf32>
    %35 = arith.select %33, %16, %34 : vector<6x16x128xi1>, vector<6x16x128xf32>
    %36 = arith.truncf %35 : vector<6x16x128xf32> to vector<6x16x128xbf16>
    %c0_13 = arith.constant 0 : index
    %c0_14 = arith.constant 0 : index
    %c0_15 = arith.constant 0 : index
    %37 = vector.load %arg16[%c0_13, %c0_14, %c0_15] : memref<6x16x128xbf16, #tpu.memory_space<vmem>>, vector<6x16x128xbf16>
    tpu.vector_store %arg16[%c0_13, %c0_14, %c0_15], %36 {strides = array<i32>} : memref<6x16x128xbf16, #tpu.memory_space<vmem>>, vector<6x16x128xbf16>,
    %c0_16 = arith.constant 0 : index
    %c0_17 = arith.constant 0 : index
    %c0_18 = arith.constant 0 : index
    %38 = vector.load %arg16[%c0_16, %c0_17, %c0_18] : memref<6x16x128xbf16, #tpu.memory_space<vmem>>, vector<6x16x128xbf16>
    %39 = vector.extract_strided_slice %38 {offsets = [0, 0, 0], sizes = [4, 8, 128], strides = [1, 1, 1]} : vector<6x16x128xbf16> to vector<4x8x128xbf16>
    %40 = vector.shape_cast %39 : vector<4x8x128xbf16> to vector<32x128xbf16>
    %41 = vector.extract_strided_slice %38 {offsets = [0, 1, 0], sizes = [4, 8, 128], strides = [1, 1, 1]} : vector<6x16x128xbf16> to vector<4x8x128xbf16>
    %42 = vector.shape_cast %41 : vector<4x8x128xbf16> to vector<32x128xbf16>
    %43 = vector.extract_strided_slice %38 {offsets = [0, 2, 0], sizes = [4, 8, 128], strides = [1, 1, 1]} : vector<6x16x128xbf16> to vector<4x8x128xbf16>
    %44 = vector.shape_cast %43 : vector<4x8x128xbf16> to vector<32x128xbf16>
    %45 = tpu.concatenate %40, %42, %44 in 1 : vector<32x128xbf16>, vector<32x128xbf16>, vector<32x128xbf16> -> vector<32x384xbf16>
    %c0_19 = arith.constant 0 : index
    %c0_20 = arith.constant 0 : index
    %c0_21 = arith.constant 0 : index
    %46 = vector.load %arg6[%c0_19, %c0_20, %c0_21] : memref<3x384x128xbf16, #tpu.memory_space<vmem>>, vector<1x384x128xbf16>
    %47 = vector.shape_cast %46 : vector<1x384x128xbf16> to vector<384x128xbf16>
    %cst_22 = arith.constant dense<0.000000e+00> : vector<32x128xf32>
    %48 = tpu.matmul %45, %47, %cst_22 {dimension_numbers = #tpu.dot_dimension_numbers<[1], [0], [0], [1], [0, 0, 1, 1], [], []>} : vector<32x384xbf16>, vector<384x128xbf16>, vector<32x128xf32> -> vector<32x128xf32>
    %49 = vector.extract_strided_slice %38 {offsets = [1, 0, 0], sizes = [4, 8, 128], strides = [1, 1, 1]} : vector<6x16x128xbf16> to vector<4x8x128xbf16>
    %50 = vector.shape_cast %49 : vector<4x8x128xbf16> to vector<32x128xbf16>
    %51 = vector.extract_strided_slice %38 {offsets = [1, 1, 0], sizes = [4, 8, 128], strides = [1, 1, 1]} : vector<6x16x128xbf16> to vector<4x8x128xbf16>
    %52 = vector.shape_cast %51 : vector<4x8x128xbf16> to vector<32x128xbf16>
    %53 = vector.extract_strided_slice %38 {offsets = [1, 2, 0], sizes = [4, 8, 128], strides = [1, 1, 1]} : vector<6x16x128xbf16> to vector<4x8x128xbf16>
    %54 = vector.shape_cast %53 : vector<4x8x128xbf16> to vector<32x128xbf16>
    %55 = tpu.concatenate %50, %52, %54 in 1 : vector<32x128xbf16>, vector<32x128xbf16>, vector<32x128xbf16> -> vector<32x384xbf16>
    %c1 = arith.constant 1 : index
    %c0_23 = arith.constant 0 : index
    %c0_24 = arith.constant 0 : index
    %56 = vector.load %arg6[%c1, %c0_23, %c0_24] : memref<3x384x128xbf16, #tpu.memory_space<vmem>>, vector<1x384x128xbf16>
    %57 = vector.shape_cast %56 : vector<1x384x128xbf16> to vector<384x128xbf16>
    %cst_25 = arith.constant dense<0.000000e+00> : vector<32x128xf32>
    %58 = tpu.matmul %55, %57, %cst_25 {dimension_numbers = #tpu.dot_dimension_numbers<[1], [0], [0], [1], [0, 0, 1, 1], [], []>} : vector<32x384xbf16>, vector<384x128xbf16>, vector<32x128xf32> -> vector<32x128xf32>
    %59 = arith.addf %48, %58 : vector<32x128xf32>
    %60 = vector.extract_strided_slice %38 {offsets = [2, 0, 0], sizes = [4, 8, 128], strides = [1, 1, 1]} : vector<6x16x128xbf16> to vector<4x8x128xbf16>
    %61 = vector.shape_cast %60 : vector<4x8x128xbf16> to vector<32x128xbf16>
    %62 = vector.extract_strided_slice %38 {offsets = [2, 1, 0], sizes = [4, 8, 128], strides = [1, 1, 1]} : vector<6x16x128xbf16> to vector<4x8x128xbf16>
    %63 = vector.shape_cast %62 : vector<4x8x128xbf16> to vector<32x128xbf16>
    %64 = vector.extract_strided_slice %38 {offsets = [2, 2, 0], sizes = [4, 8, 128], strides = [1, 1, 1]} : vector<6x16x128xbf16> to vector<4x8x128xbf16>
    %65 = vector.shape_cast %64 : vector<4x8x128xbf16> to vector<32x128xbf16>
    %66 = tpu.concatenate %61, %63, %65 in 1 : vector<32x128xbf16>, vector<32x128xbf16>, vector<32x128xbf16> -> vector<32x384xbf16>
    %c2 = arith.constant 2 : index
    %c0_26 = arith.constant 0 : index
    %c0_27 = arith.constant 0 : index
    %67 = vector.load %arg6[%c2, %c0_26, %c0_27] : memref<3x384x128xbf16, #tpu.memory_space<vmem>>, vector<1x384x128xbf16>
    %68 = vector.shape_cast %67 : vector<1x384x128xbf16> to vector<384x128xbf16>
    %cst_28 = arith.constant dense<0.000000e+00> : vector<32x128xf32>
    %69 = tpu.matmul %66, %68, %cst_28 {dimension_numbers = #tpu.dot_dimension_numbers<[1], [0], [0], [1], [0, 0, 1, 1], [], []>} : vector<32x384xbf16>, vector<384x128xbf16>, vector<32x128xf32> -> vector<32x128xf32>
    %70 = arith.addf %59, %69 : vector<32x128xf32>
    %c0_29 = arith.constant 0 : index
    %c0_30 = arith.constant 0 : index
    %71 = vector.load %arg7[%c0_29, %c0_30] : memref<1x128xf32, #tpu.memory_space<vmem>>, vector<1x128xf32>
    %72 = vector.broadcast %71 : vector<1x128xf32> to vector<32x128xf32>
    %73 = arith.mulf %70, %72 : vector<32x128xf32>
    %c0_31 = arith.constant 0 : index
    %c0_32 = arith.constant 0 : index
    %74 = vector.load %arg8[%c0_31, %c0_32] : memref<1x128xf32, #tpu.memory_space<vmem>>, vector<1x128xf32>
    %75 = vector.broadcast %74 : vector<1x128xf32> to vector<32x128xf32>
    %76 = arith.addf %73, %75 : vector<32x128xf32>
    %cst_33 = arith.constant 0.000000e+00 : f32
    %77 = vector.broadcast %cst_33 : f32 to vector<32x128xf32>
    %78 = arith.maximumf %76, %77 : vector<32x128xf32>
    %79 = arith.truncf %78 : vector<32x128xf32> to vector<32x128xbf16>
    %c0_34 = arith.constant 0 : index
    %c0_35 = arith.constant 0 : index
    %80 = vector.load %arg9[%c0_34, %c0_35] : memref<128x128xbf16, #tpu.memory_space<vmem>>, vector<128x128xbf16>
    %cst_36 = arith.constant dense<0.000000e+00> : vector<32x128xf32>
    %81 = tpu.matmul %79, %80, %cst_36 {dimension_numbers = #tpu.dot_dimension_numbers<[1], [0], [0], [1], [0, 0, 1, 1], [], []>} : vector<32x128xbf16>, vector<128x128xbf16>, vector<32x128xf32> -> vector<32x128xf32>
    %c0_37 = arith.constant 0 : index
    %c0_38 = arith.constant 0 : index
    %82 = vector.load %arg10[%c0_37, %c0_38] : memref<1x128xf32, #tpu.memory_space<vmem>>, vector<1x128xf32>
    %83 = vector.broadcast %82 : vector<1x128xf32> to vector<32x128xf32>
    %84 = arith.mulf %81, %83 : vector<32x128xf32>
    %c0_39 = arith.constant 0 : index
    %c0_40 = arith.constant 0 : index
    %85 = vector.load %arg11[%c0_39, %c0_40] : memref<1x128xf32, #tpu.memory_space<vmem>>, vector<1x128xf32>
    %86 = vector.broadcast %85 : vector<1x128xf32> to vector<32x128xf32>
    %87 = arith.addf %84, %86 : vector<32x128xf32>
    %c1_i32_41 = arith.constant 1 : i32
    %88 = arith.addi %1, %c1_i32_41 : i32
    %c0_42 = arith.constant 0 : index
    %89 = arith.index_cast %88 : i32 to index
    %c1_43 = arith.constant 1 : index
    %c0_44 = arith.constant 0 : index
    %90 = vector.load %arg2[%c0_42, %89, %c1_43, %c0_44] : memref<1x10x16x128xbf16, #tpu.memory_space<vmem>>, vector<1x4x8x128xbf16>
    %91 = vector.shape_cast %90 : vector<1x4x8x128xbf16> to vector<4x8x128xbf16>
    %92 = vector.shape_cast %91 : vector<4x8x128xbf16> to vector<32x128xbf16>
    %c0_45 = arith.constant 0 : index
    %c0_46 = arith.constant 0 : index
    %93 = vector.load %arg12[%c0_45, %c0_46] : memref<128x128xbf16, #tpu.memory_space<vmem>>, vector<128x128xbf16>
    %cst_47 = arith.constant dense<0.000000e+00> : vector<32x128xf32>
    %94 = tpu.matmul %92, %93, %cst_47 {dimension_numbers = #tpu.dot_dimension_numbers<[1], [0], [0], [1], [0, 0, 1, 1], [], []>} : vector<32x128xbf16>, vector<128x128xbf16>, vector<32x128xf32> -> vector<32x128xf32>
    %c0_48 = arith.constant 0 : index
    %c0_49 = arith.constant 0 : index
    %95 = vector.load %arg13[%c0_48, %c0_49] : memref<1x128xf32, #tpu.memory_space<vmem>>, vector<1x128xf32>
    %96 = vector.broadcast %95 : vector<1x128xf32> to vector<32x128xf32>
    %97 = arith.mulf %94, %96 : vector<32x128xf32>
    %c0_50 = arith.constant 0 : index
    %c0_51 = arith.constant 0 : index
    %98 = vector.load %arg14[%c0_50, %c0_51] : memref<1x128xf32, #tpu.memory_space<vmem>>, vector<1x128xf32>
    %99 = vector.broadcast %98 : vector<1x128xf32> to vector<32x128xf32>
    %100 = arith.addf %97, %99 : vector<32x128xf32>
    %101 = arith.addf %87, %100 : vector<32x128xf32>
    %cst_52 = arith.constant 0.000000e+00 : f32
    %102 = vector.broadcast %cst_52 : f32 to vector<32x128xf32>
    %103 = arith.maximumf %101, %102 : vector<32x128xf32>
    %104 = vector.shape_cast %103 : vector<32x128xf32> to vector<1x4x8x128xf32>
    %105 = arith.truncf %104 : vector<1x4x8x128xf32> to vector<1x4x8x128xbf16>
    %c0_53 = arith.constant 0 : index
    %c0_54 = arith.constant 0 : index
    %c0_55 = arith.constant 0 : index
    %c0_56 = arith.constant 0 : index
    %106 = vector.load %arg15[%c0_53, %c0_54, %c0_55, %c0_56] : memref<1x4x8x128xbf16, #tpu.memory_space<vmem>>, vector<1x4x8x128xbf16>
    tpu.vector_store %arg15[%c0_53, %c0_54, %c0_55, %c0_56], %105 {strides = array<i32>} : memref<1x4x8x128xbf16, #tpu.memory_space<vmem>>, vector<1x4x8x128xbf16>,
    return
  }
  func.func @transform_0(%arg0: i32, %arg1: i32) -> (i32, i32, i32, i32) {
    %c0_i32 = arith.constant 0 : i32
    %c0_i32_0 = arith.constant 0 : i32
    %c0_i32_1 = arith.constant 0 : i32
    %c0_i32_2 = arith.constant 0 : i32
    return %arg0, %c0_i32, %c0_i32_0, %c0_i32_1 : i32, i32, i32, i32
  }
  func.func @transform_1(%arg0: i32, %arg1: i32) -> (i32, i32) {
    %c0_i32 = arith.constant 0 : i32
    %c0_i32_0 = arith.constant 0 : i32
    %c0_i32_1 = arith.constant 0 : i32
    return %c0_i32, %c0_i32_0 : i32, i32
  }
  func.func @transform_2(%arg0: i32, %arg1: i32) -> (i32, i32) {
    %c0_i32 = arith.constant 0 : i32
    %c0_i32_0 = arith.constant 0 : i32
    %c0_i32_1 = arith.constant 0 : i32
    return %c0_i32, %c0_i32_0 : i32, i32
  }
  func.func @transform_3(%arg0: i32, %arg1: i32) -> (i32, i32) {
    %c0_i32 = arith.constant 0 : i32
    %c0_i32_0 = arith.constant 0 : i32
    %c0_i32_1 = arith.constant 0 : i32
    return %c0_i32, %c0_i32_0 : i32, i32
  }
  func.func @transform_4(%arg0: i32, %arg1: i32) -> (i32, i32, i32) {
    %c0_i32 = arith.constant 0 : i32
    %c0_i32_0 = arith.constant 0 : i32
    %c0_i32_1 = arith.constant 0 : i32
    %c0_i32_2 = arith.constant 0 : i32
    return %c0_i32, %c0_i32_0, %c0_i32_1 : i32, i32, i32
  }
  func.func @transform_5(%arg0: i32, %arg1: i32) -> (i32, i32) {
    %c0_i32 = arith.constant 0 : i32
    %c0_i32_0 = arith.constant 0 : i32
    %c0_i32_1 = arith.constant 0 : i32
    return %c0_i32, %c0_i32_0 : i32, i32
  }
  func.func @transform_6(%arg0: i32, %arg1: i32) -> (i32, i32) {
    %c0_i32 = arith.constant 0 : i32
    %c0_i32_0 = arith.constant 0 : i32
    %c0_i32_1 = arith.constant 0 : i32
    return %c0_i32, %c0_i32_0 : i32, i32
  }
  func.func @transform_7(%arg0: i32, %arg1: i32) -> (i32, i32) {
    %c0_i32 = arith.constant 0 : i32
    %c0_i32_0 = arith.constant 0 : i32
    %c0_i32_1 = arith.constant 0 : i32
    return %c0_i32, %c0_i32_0 : i32, i32
  }
  func.func @transform_8(%arg0: i32, %arg1: i32) -> (i32, i32) {
    %c0_i32 = arith.constant 0 : i32
    %c0_i32_0 = arith.constant 0 : i32
    %c0_i32_1 = arith.constant 0 : i32
    return %c0_i32, %c0_i32_0 : i32, i32
  }
  func.func @transform_9(%arg0: i32, %arg1: i32) -> (i32, i32) {
    %c0_i32 = arith.constant 0 : i32
    %c0_i32_0 = arith.constant 0 : i32
    %c0_i32_1 = arith.constant 0 : i32
    return %c0_i32, %c0_i32_0 : i32, i32
  }
  func.func @transform_10(%arg0: i32, %arg1: i32) -> (i32, i32) {
    %c0_i32 = arith.constant 0 : i32
    %c0_i32_0 = arith.constant 0 : i32
    %c0_i32_1 = arith.constant 0 : i32
    return %c0_i32, %c0_i32_0 : i32, i32
  }
  func.func @transform_11(%arg0: i32, %arg1: i32) -> (i32, i32) {
    %c0_i32 = arith.constant 0 : i32
    %c0_i32_0 = arith.constant 0 : i32
    %c0_i32_1 = arith.constant 0 : i32
    return %c0_i32, %c0_i32_0 : i32, i32
  }
  func.func @transform_12(%arg0: i32, %arg1: i32) -> (i32, i32) {
    %c0_i32 = arith.constant 0 : i32
    %c0_i32_0 = arith.constant 0 : i32
    %c0_i32_1 = arith.constant 0 : i32
    return %c0_i32, %c0_i32_0 : i32, i32
  }
  func.func @transform_13(%arg0: i32, %arg1: i32) -> (i32, i32, i32, i32) {
    %c0_i32 = arith.constant 0 : i32
    %c0_i32_0 = arith.constant 0 : i32
    %c0_i32_1 = arith.constant 0 : i32
    return %arg0, %arg1, %c0_i32, %c0_i32_0 : i32, i32, i32, i32
  }
}

module attributes {stable_mosaic.version = 11 : i64} {
  func.func @_block_kernel(%arg0: i32, %arg1: i32, %arg2: memref<1x10x16x128xbf16, #tpu.memory_space<vmem>>, %arg3: memref<128x128xbf16, #tpu.memory_space<vmem>>, %arg4: memref<1x128xf32, #tpu.memory_space<vmem>>, %arg5: memref<1x128xf32, #tpu.memory_space<vmem>>, %arg6: memref<3x384x128xbf16, #tpu.memory_space<vmem>>, %arg7: memref<1x128xf32, #tpu.memory_space<vmem>>, %arg8: memref<1x128xf32, #tpu.memory_space<vmem>>, %arg9: memref<128x128xbf16, #tpu.memory_space<vmem>>, %arg10: memref<1x128xf32, #tpu.memory_space<vmem>>, %arg11: memref<1x128xf32, #tpu.memory_space<vmem>>, %arg12: memref<128x128xbf16, #tpu.memory_space<vmem>>, %arg13: memref<1x128xf32, #tpu.memory_space<vmem>>, %arg14: memref<1x128xf32, #tpu.memory_space<vmem>>, %arg15: memref<1x4x8x128xbf16, #tpu.memory_space<vmem>>, %arg16: memref<6x16x128xbf16, #tpu.memory_space<vmem>>) attributes {dimension_semantics = [#tpu.dimension_semantics<parallel>, #tpu.dimension_semantics<parallel>], iteration_bounds = array<i64: 2, 2>, scalar_prefetch = 0 : i64, scratch_operands = 1 : i64, tpu.core_type = #tpu.core_type<tc>, window_params = [{transform_indices = @transform_0, window_bounds = array<i64: 1, 10, 16, 128>}, {pipeline_mode = #tpu.pipeline_mode<synchronous>, transform_indices = @transform_1, window_bounds = array<i64: 128, 128>}, {pipeline_mode = #tpu.pipeline_mode<synchronous>, transform_indices = @transform_2, window_bounds = array<i64: 1, 128>}, {pipeline_mode = #tpu.pipeline_mode<synchronous>, transform_indices = @transform_3, window_bounds = array<i64: 1, 128>}, {pipeline_mode = #tpu.pipeline_mode<synchronous>, transform_indices = @transform_4, window_bounds = array<i64: 3, 384, 128>}, {pipeline_mode = #tpu.pipeline_mode<synchronous>, transform_indices = @transform_5, window_bounds = array<i64: 1, 128>}, {pipeline_mode = #tpu.pipeline_mode<synchronous>, transform_indices = @transform_6, window_bounds = array<i64: 1, 128>}, {pipeline_mode = #tpu.pipeline_mode<synchronous>, transform_indices = @transform_7, window_bounds = array<i64: 128, 128>}, {pipeline_mode = #tpu.pipeline_mode<synchronous>, transform_indices = @transform_8, window_bounds = array<i64: 1, 128>}, {pipeline_mode = #tpu.pipeline_mode<synchronous>, transform_indices = @transform_9, window_bounds = array<i64: 1, 128>}, {pipeline_mode = #tpu.pipeline_mode<synchronous>, transform_indices = @transform_10, window_bounds = array<i64: 128, 128>}, {pipeline_mode = #tpu.pipeline_mode<synchronous>, transform_indices = @transform_11, window_bounds = array<i64: 1, 128>}, {pipeline_mode = #tpu.pipeline_mode<synchronous>, transform_indices = @transform_12, window_bounds = array<i64: 1, 128>}, {transform_indices = @transform_13, window_bounds = array<i64: 1, 4, 8, 128>}]} {
    %c4_i32 = arith.constant 4 : i32
    %0 = arith.muli %arg1, %c4_i32 : i32
    %c1_i32 = arith.constant 1 : i32
    %1 = arith.muli %0, %c1_i32 : i32
    %c0 = arith.constant 0 : index
    %2 = arith.index_cast %1 : i32 to index
    %c0_0 = arith.constant 0 : index
    %c0_1 = arith.constant 0 : index
    %3 = vector.load %arg2[%c0, %2, %c0_0, %c0_1] : memref<1x10x16x128xbf16, #tpu.memory_space<vmem>>, vector<1x6x16x128xbf16>
    %4 = vector.shape_cast %3 : vector<1x6x16x128xbf16> to vector<6x16x128xbf16>
    %5 = vector.shape_cast %4 : vector<6x16x128xbf16> to vector<96x128xbf16>
    %c0_2 = arith.constant 0 : index
    %c0_3 = arith.constant 0 : index
    %6 = vector.load %arg3[%c0_2, %c0_3] : memref<128x128xbf16, #tpu.memory_space<vmem>>, vector<128x128xbf16>
    %cst = arith.constant dense<0.000000e+00> : vector<96x128xf32>
    %7 = tpu.matmul %5, %6, %cst {dimension_numbers = #tpu.dot_dimension_numbers<[1], [0], [0], [1], [0, 0, 1, 1], [], []>} : vector<96x128xbf16>, vector<128x128xbf16>, vector<96x128xf32> -> vector<96x128xf32>
    %c0_4 = arith.constant 0 : index
    %c0_5 = arith.constant 0 : index
    %8 = vector.load %arg4[%c0_4, %c0_5] : memref<1x128xf32, #tpu.memory_space<vmem>>, vector<1x128xf32>
    %9 = vector.broadcast %8 : vector<1x128xf32> to vector<96x128xf32>
    %10 = arith.mulf %7, %9 : vector<96x128xf32>
    %c0_6 = arith.constant 0 : index
    %c0_7 = arith.constant 0 : index
    %11 = vector.load %arg5[%c0_6, %c0_7] : memref<1x128xf32, #tpu.memory_space<vmem>>, vector<1x128xf32>
    %12 = vector.broadcast %11 : vector<1x128xf32> to vector<96x128xf32>
    %13 = arith.addf %10, %12 : vector<96x128xf32>
    %cst_8 = arith.constant 0.000000e+00 : f32
    %14 = vector.broadcast %cst_8 : f32 to vector<96x128xf32>
    %15 = arith.maximumf %13, %14 : vector<96x128xf32>
    %16 = vector.shape_cast %15 : vector<96x128xf32> to vector<6x16x128xf32>
    %17 = tpu.iota {dimensions = array<i32: 0>} : vector<6x16x1xi32>
    %18 = vector.broadcast %1 : i32 to vector<6x16x1xi32>
    %19 = arith.addi %17, %18 : vector<6x16x1xi32>
    %20 = tpu.iota {dimensions = array<i32: 1>} : vector<6x16x1xi32>
    %c1_i32_9 = arith.constant 1 : i32
    %21 = vector.broadcast %c1_i32_9 : i32 to vector<6x16x1xi32>
    %22 = arith.cmpi sge, %19, %21 : vector<6x16x1xi32>
    %c8_i32 = arith.constant 8 : i32
    %23 = vector.broadcast %c8_i32 : i32 to vector<6x16x1xi32>
    %24 = arith.cmpi sle, %19, %23 : vector<6x16x1xi32>
    %25 = arith.andi %22, %24 : vector<6x16x1xi1>
    %c1_i32_10 = arith.constant 1 : i32
    %26 = vector.broadcast %c1_i32_10 : i32 to vector<6x16x1xi32>
    %27 = arith.cmpi sge, %20, %26 : vector<6x16x1xi32>
    %28 = arith.andi %25, %27 : vector<6x16x1xi1>
    %c8_i32_11 = arith.constant 8 : i32
    %29 = vector.broadcast %c8_i32_11 : i32 to vector<6x16x1xi32>
    %30 = arith.cmpi sle, %20, %29 : vector<6x16x1xi32>
    %31 = arith.andi %28, %30 : vector<6x16x1xi1>
    %cst_12 = arith.constant 0.000000e+00 : f32
    %32 = vector.shape_cast %31 : vector<6x16x1xi1> to vector<6x16x1xi1>
    %33 = vector.broadcast %32 : vector<6x16x1xi1> to vector<6x16x128xi1>
    %34 = vector.broadcast %cst_12 : f32 to vector<6x16x128xf32>
    %35 = arith.select %33, %16, %34 : vector<6x16x128xi1>, vector<6x16x128xf32>
    %36 = arith.truncf %35 : vector<6x16x128xf32> to vector<6x16x128xbf16>
    %c0_13 = arith.constant 0 : index
    %c0_14 = arith.constant 0 : index
    %c0_15 = arith.constant 0 : index
    %37 = vector.load %arg16[%c0_13, %c0_14, %c0_15] : memref<6x16x128xbf16, #tpu.memory_space<vmem>>, vector<6x16x128xbf16>
    tpu.vector_store %arg16[%c0_13, %c0_14, %c0_15], %36 {strides = array<i32>} : memref<6x16x128xbf16, #tpu.memory_space<vmem>>, vector<6x16x128xbf16>,
    %c0_16 = arith.constant 0 : index
    %c0_17 = arith.constant 0 : index
    %c0_18 = arith.constant 0 : index
    %38 = vector.load %arg16[%c0_16, %c0_17, %c0_18] : memref<6x16x128xbf16, #tpu.memory_space<vmem>>, vector<6x16x128xbf16>
    %39 = vector.extract_strided_slice %38 {offsets = [0, 0, 0], sizes = [4, 8, 128], strides = [1, 1, 1]} : vector<6x16x128xbf16> to vector<4x8x128xbf16>
    %40 = vector.shape_cast %39 : vector<4x8x128xbf16> to vector<32x128xbf16>
    %41 = vector.extract_strided_slice %38 {offsets = [0, 1, 0], sizes = [4, 8, 128], strides = [1, 1, 1]} : vector<6x16x128xbf16> to vector<4x8x128xbf16>
    %42 = vector.shape_cast %41 : vector<4x8x128xbf16> to vector<32x128xbf16>
    %43 = vector.extract_strided_slice %38 {offsets = [0, 2, 0], sizes = [4, 8, 128], strides = [1, 1, 1]} : vector<6x16x128xbf16> to vector<4x8x128xbf16>
    %44 = vector.shape_cast %43 : vector<4x8x128xbf16> to vector<32x128xbf16>
    %45 = tpu.concatenate %40, %42, %44 in 1 : vector<32x128xbf16>, vector<32x128xbf16>, vector<32x128xbf16> -> vector<32x384xbf16>
    %c0_19 = arith.constant 0 : index
    %c0_20 = arith.constant 0 : index
    %c0_21 = arith.constant 0 : index
    %46 = vector.load %arg6[%c0_19, %c0_20, %c0_21] : memref<3x384x128xbf16, #tpu.memory_space<vmem>>, vector<1x384x128xbf16>
    %47 = vector.shape_cast %46 : vector<1x384x128xbf16> to vector<384x128xbf16>
    %cst_22 = arith.constant dense<0.000000e+00> : vector<32x128xf32>
    %48 = tpu.matmul %45, %47, %cst_22 {dimension_numbers = #tpu.dot_dimension_numbers<[1], [0], [0], [1], [0, 0, 1, 1], [], []>} : vector<32x384xbf16>, vector<384x128xbf16>, vector<32x128xf32> -> vector<32x128xf32>
    %49 = vector.extract_strided_slice %38 {offsets = [1, 0, 0], sizes = [4, 8, 128], strides = [1, 1, 1]} : vector<6x16x128xbf16> to vector<4x8x128xbf16>
    %50 = vector.shape_cast %49 : vector<4x8x128xbf16> to vector<32x128xbf16>
    %51 = vector.extract_strided_slice %38 {offsets = [1, 1, 0], sizes = [4, 8, 128], strides = [1, 1, 1]} : vector<6x16x128xbf16> to vector<4x8x128xbf16>
    %52 = vector.shape_cast %51 : vector<4x8x128xbf16> to vector<32x128xbf16>
    %53 = vector.extract_strided_slice %38 {offsets = [1, 2, 0], sizes = [4, 8, 128], strides = [1, 1, 1]} : vector<6x16x128xbf16> to vector<4x8x128xbf16>
    %54 = vector.shape_cast %53 : vector<4x8x128xbf16> to vector<32x128xbf16>
    %55 = tpu.concatenate %50, %52, %54 in 1 : vector<32x128xbf16>, vector<32x128xbf16>, vector<32x128xbf16> -> vector<32x384xbf16>
    %c1 = arith.constant 1 : index
    %c0_23 = arith.constant 0 : index
    %c0_24 = arith.constant 0 : index
    %56 = vector.load %arg6[%c1, %c0_23, %c0_24] : memref<3x384x128xbf16, #tpu.memory_space<vmem>>, vector<1x384x128xbf16>
    %57 = vector.shape_cast %56 : vector<1x384x128xbf16> to vector<384x128xbf16>
    %cst_25 = arith.constant dense<0.000000e+00> : vector<32x128xf32>
    %58 = tpu.matmul %55, %57, %cst_25 {dimension_numbers = #tpu.dot_dimension_numbers<[1], [0], [0], [1], [0, 0, 1, 1], [], []>} : vector<32x384xbf16>, vector<384x128xbf16>, vector<32x128xf32> -> vector<32x128xf32>
    %59 = arith.addf %48, %58 : vector<32x128xf32>
    %60 = vector.extract_strided_slice %38 {offsets = [2, 0, 0], sizes = [4, 8, 128], strides = [1, 1, 1]} : vector<6x16x128xbf16> to vector<4x8x128xbf16>
    %61 = vector.shape_cast %60 : vector<4x8x128xbf16> to vector<32x128xbf16>
    %62 = vector.extract_strided_slice %38 {offsets = [2, 1, 0], sizes = [4, 8, 128], strides = [1, 1, 1]} : vector<6x16x128xbf16> to vector<4x8x128xbf16>
    %63 = vector.shape_cast %62 : vector<4x8x128xbf16> to vector<32x128xbf16>
    %64 = vector.extract_strided_slice %38 {offsets = [2, 2, 0], sizes = [4, 8, 128], strides = [1, 1, 1]} : vector<6x16x128xbf16> to vector<4x8x128xbf16>
    %65 = vector.shape_cast %64 : vector<4x8x128xbf16> to vector<32x128xbf16>
    %66 = tpu.concatenate %61, %63, %65 in 1 : vector<32x128xbf16>, vector<32x128xbf16>, vector<32x128xbf16> -> vector<32x384xbf16>
    %c2 = arith.constant 2 : index
    %c0_26 = arith.constant 0 : index
    %c0_27 = arith.constant 0 : index
    %67 = vector.load %arg6[%c2, %c0_26, %c0_27] : memref<3x384x128xbf16, #tpu.memory_space<vmem>>, vector<1x384x128xbf16>
    %68 = vector.shape_cast %67 : vector<1x384x128xbf16> to vector<384x128xbf16>
    %cst_28 = arith.constant dense<0.000000e+00> : vector<32x128xf32>
    %69 = tpu.matmul %66, %68, %cst_28 {dimension_numbers = #tpu.dot_dimension_numbers<[1], [0], [0], [1], [0, 0, 1, 1], [], []>} : vector<32x384xbf16>, vector<384x128xbf16>, vector<32x128xf32> -> vector<32x128xf32>
    %70 = arith.addf %59, %69 : vector<32x128xf32>
    %c0_29 = arith.constant 0 : index
    %c0_30 = arith.constant 0 : index
    %71 = vector.load %arg7[%c0_29, %c0_30] : memref<1x128xf32, #tpu.memory_space<vmem>>, vector<1x128xf32>
    %72 = vector.broadcast %71 : vector<1x128xf32> to vector<32x128xf32>
    %73 = arith.mulf %70, %72 : vector<32x128xf32>
    %c0_31 = arith.constant 0 : index
    %c0_32 = arith.constant 0 : index
    %74 = vector.load %arg8[%c0_31, %c0_32] : memref<1x128xf32, #tpu.memory_space<vmem>>, vector<1x128xf32>
    %75 = vector.broadcast %74 : vector<1x128xf32> to vector<32x128xf32>
    %76 = arith.addf %73, %75 : vector<32x128xf32>
    %cst_33 = arith.constant 0.000000e+00 : f32
    %77 = vector.broadcast %cst_33 : f32 to vector<32x128xf32>
    %78 = arith.maximumf %76, %77 : vector<32x128xf32>
    %79 = arith.truncf %78 : vector<32x128xf32> to vector<32x128xbf16>
    %c0_34 = arith.constant 0 : index
    %c0_35 = arith.constant 0 : index
    %80 = vector.load %arg9[%c0_34, %c0_35] : memref<128x128xbf16, #tpu.memory_space<vmem>>, vector<128x128xbf16>
    %cst_36 = arith.constant dense<0.000000e+00> : vector<32x128xf32>
    %81 = tpu.matmul %79, %80, %cst_36 {dimension_numbers = #tpu.dot_dimension_numbers<[1], [0], [0], [1], [0, 0, 1, 1], [], []>} : vector<32x128xbf16>, vector<128x128xbf16>, vector<32x128xf32> -> vector<32x128xf32>
    %c0_37 = arith.constant 0 : index
    %c0_38 = arith.constant 0 : index
    %82 = vector.load %arg10[%c0_37, %c0_38] : memref<1x128xf32, #tpu.memory_space<vmem>>, vector<1x128xf32>
    %83 = vector.broadcast %82 : vector<1x128xf32> to vector<32x128xf32>
    %84 = arith.mulf %81, %83 : vector<32x128xf32>
    %c0_39 = arith.constant 0 : index
    %c0_40 = arith.constant 0 : index
    %85 = vector.load %arg11[%c0_39, %c0_40] : memref<1x128xf32, #tpu.memory_space<vmem>>, vector<1x128xf32>
    %86 = vector.broadcast %85 : vector<1x128xf32> to vector<32x128xf32>
    %87 = arith.addf %84, %86 : vector<32x128xf32>
    %c1_i32_41 = arith.constant 1 : i32
    %88 = arith.addi %1, %c1_i32_41 : i32
    %c0_42 = arith.constant 0 : index
    %89 = arith.index_cast %88 : i32 to index
    %c1_43 = arith.constant 1 : index
    %c0_44 = arith.constant 0 : index
    %90 = vector.load %arg2[%c0_42, %89, %c1_43, %c0_44] : memref<1x10x16x128xbf16, #tpu.memory_space<vmem>>, vector<1x4x8x128xbf16>
    %91 = vector.shape_cast %90 : vector<1x4x8x128xbf16> to vector<4x8x128xbf16>
    %92 = vector.shape_cast %91 : vector<4x8x128xbf16> to vector<32x128xbf16>
    %c0_45 = arith.constant 0 : index
    %c0_46 = arith.constant 0 : index
    %93 = vector.load %arg12[%c0_45, %c0_46] : memref<128x128xbf16, #tpu.memory_space<vmem>>, vector<128x128xbf16>
    %cst_47 = arith.constant dense<0.000000e+00> : vector<32x128xf32>
    %94 = tpu.matmul %92, %93, %cst_47 {dimension_numbers = #tpu.dot_dimension_numbers<[1], [0], [0], [1], [0, 0, 1, 1], [], []>} : vector<32x128xbf16>, vector<128x128xbf16>, vector<32x128xf32> -> vector<32x128xf32>
    %c0_48 = arith.constant 0 : index
    %c0_49 = arith.constant 0 : index
    %95 = vector.load %arg13[%c0_48, %c0_49] : memref<1x128xf32, #tpu.memory_space<vmem>>, vector<1x128xf32>
    %96 = vector.broadcast %95 : vector<1x128xf32> to vector<32x128xf32>
    %97 = arith.mulf %94, %96 : vector<32x128xf32>
    %c0_50 = arith.constant 0 : index
    %c0_51 = arith.constant 0 : index
    %98 = vector.load %arg14[%c0_50, %c0_51] : memref<1x128xf32, #tpu.memory_space<vmem>>, vector<1x128xf32>
    %99 = vector.broadcast %98 : vector<1x128xf32> to vector<32x128xf32>
    %100 = arith.addf %97, %99 : vector<32x128xf32>
    %101 = arith.addf %87, %100 : vector<32x128xf32>
    %cst_52 = arith.constant 0.000000e+00 : f32
    %102 = vector.broadcast %cst_52 : f32 to vector<32x128xf32>
    %103 = arith.maximumf %101, %102 : vector<32x128xf32>
    %104 = vector.shape_cast %103 : vector<32x128xf32> to vector<1x4x8x128xf32>
    %105 = arith.truncf %104 : vector<1x4x8x128xf32> to vector<1x4x8x128xbf16>
    %c0_53 = arith.constant 0 : index
    %c0_54 = arith.constant 0 : index
    %c0_55 = arith.constant 0 : index
    %c0_56 = arith.constant 0 : index
    %106 = vector.load %arg15[%c0_53, %c0_54, %c0_55, %c0_56] : memref<1x4x8x128xbf16, #tpu.memory_space<vmem>>, vector<1x4x8x128xbf16>
    tpu.vector_store %arg15[%c0_53, %c0_54, %c0_55, %c0_56], %105 {strides = array<i32>} : memref<1x4x8x128xbf16, #tpu.memory_space<vmem>>, vector<1x4x8x128xbf16>,
    return
  }
  func.func @transform_0(%arg0: i32, %arg1: i32) -> (i32, i32, i32, i32) {
    %c0_i32 = arith.constant 0 : i32
    %c0_i32_0 = arith.constant 0 : i32
    %c0_i32_1 = arith.constant 0 : i32
    %c0_i32_2 = arith.constant 0 : i32
    return %arg0, %c0_i32, %c0_i32_0, %c0_i32_1 : i32, i32, i32, i32
  }
  func.func @transform_1(%arg0: i32, %arg1: i32) -> (i32, i32) {
    %c0_i32 = arith.constant 0 : i32
    %c0_i32_0 = arith.constant 0 : i32
    %c0_i32_1 = arith.constant 0 : i32
    return %c0_i32, %c0_i32_0 : i32, i32
  }
  func.func @transform_2(%arg0: i32, %arg1: i32) -> (i32, i32) {
    %c0_i32 = arith.constant 0 : i32
    %c0_i32_0 = arith.constant 0 : i32
    %c0_i32_1 = arith.constant 0 : i32
    return %c0_i32, %c0_i32_0 : i32, i32
  }
  func.func @transform_3(%arg0: i32, %arg1: i32) -> (i32, i32) {
    %c0_i32 = arith.constant 0 : i32
    %c0_i32_0 = arith.constant 0 : i32
    %c0_i32_1 = arith.constant 0 : i32
    return %c0_i32, %c0_i32_0 : i32, i32
  }
  func.func @transform_4(%arg0: i32, %arg1: i32) -> (i32, i32, i32) {
    %c0_i32 = arith.constant 0 : i32
    %c0_i32_0 = arith.constant 0 : i32
    %c0_i32_1 = arith.constant 0 : i32
    %c0_i32_2 = arith.constant 0 : i32
    return %c0_i32, %c0_i32_0, %c0_i32_1 : i32, i32, i32
  }
  func.func @transform_5(%arg0: i32, %arg1: i32) -> (i32, i32) {
    %c0_i32 = arith.constant 0 : i32
    %c0_i32_0 = arith.constant 0 : i32
    %c0_i32_1 = arith.constant 0 : i32
    return %c0_i32, %c0_i32_0 : i32, i32
  }
  func.func @transform_6(%arg0: i32, %arg1: i32) -> (i32, i32) {
    %c0_i32 = arith.constant 0 : i32
    %c0_i32_0 = arith.constant 0 : i32
    %c0_i32_1 = arith.constant 0 : i32
    return %c0_i32, %c0_i32_0 : i32, i32
  }
  func.func @transform_7(%arg0: i32, %arg1: i32) -> (i32, i32) {
    %c0_i32 = arith.constant 0 : i32
    %c0_i32_0 = arith.constant 0 : i32
    %c0_i32_1 = arith.constant 0 : i32
    return %c0_i32, %c0_i32_0 : i32, i32
  }
  func.func @transform_8(%arg0: i32, %arg1: i32) -> (i32, i32) {
    %c0_i32 = arith.constant 0 : i32
    %c0_i32_0 = arith.constant 0 : i32
    %c0_i32_1 = arith.constant 0 : i32
    return %c0_i32, %c0_i32_0 : i32, i32
  }
  func.func @transform_9(%arg0: i32, %arg1: i32) -> (i32, i32) {
    %c0_i32 = arith.constant 0 : i32
    %c0_i32_0 = arith.constant 0 : i32
    %c0_i32_1 = arith.constant 0 : i32
    return %c0_i32, %c0_i32_0 : i32, i32
  }
  func.func @transform_10(%arg0: i32, %arg1: i32) -> (i32, i32) {
    %c0_i32 = arith.constant 0 : i32
    %c0_i32_0 = arith.constant 0 : i32
    %c0_i32_1 = arith.constant 0 : i32
    return %c0_i32, %c0_i32_0 : i32, i32
  }
  func.func @transform_11(%arg0: i32, %arg1: i32) -> (i32, i32) {
    %c0_i32 = arith.constant 0 : i32
    %c0_i32_0 = arith.constant 0 : i32
    %c0_i32_1 = arith.constant 0 : i32
    return %c0_i32, %c0_i32_0 : i32, i32
  }
  func.func @transform_12(%arg0: i32, %arg1: i32) -> (i32, i32) {
    %c0_i32 = arith.constant 0 : i32
    %c0_i32_0 = arith.constant 0 : i32
    %c0_i32_1 = arith.constant 0 : i32
    return %c0_i32, %c0_i32_0 : i32, i32
  }
  func.func @transform_13(%arg0: i32, %arg1: i32) -> (i32, i32, i32, i32) {
    %c0_i32 = arith.constant 0 : i32
    %c0_i32_0 = arith.constant 0 : i32
    %c0_i32_1 = arith.constant 0 : i32
    return %arg0, %arg1, %c0_i32, %c0_i32_0 : i32, i32, i32, i32
  }
}

</mosaic_0001>

<bundles_post_ra>
// kernel: tpu_custom_call.1
= control target key start
LH: loop header
LB: loop body
LE: loop exit
PB: predicated region body
PF: predicated region fallthrough
CT: control target
= control target key end

     0   :  { %s4198_s0 = inlined_call_operand.hbm [shape: bf16[2,10,16,128], index: 0, kind: input, shape index: {}]   ;;  %s4199_s1 = inlined_call_operand.hbm [shape: bf16[128,128], index: 1, kind: input, shape index: {}]   ;;  %s4200_s2 = inlined_call_operand.vmem [shape: f32[1,128], index: 2, kind: input, shape index: {}]   ;;  %s4201_s3 = inlined_call_operand.vmem [shape: f32[1,128], index: 3, kind: input, shape index: {}]   ;;  %s4202_s4 = inlined_call_operand.hbm [shape: bf16[3,384,128], index: 4, kind: input, shape index: {}]   ;;  %s4203_s5 = inlined_call_operand.vmem [shape: f32[1,128], index: 5, kind: input, shape index: {}]   ;;  %s4204_s6 = inlined_call_operand.vmem [shape: f32[1,128], index: 6, kind: input, shape index: {}]   ;;  %s4205_s7 = inlined_call_operand.hbm [shape: bf16[128,128], index: 7, kind: input, shape index: {}]   ;;  %s4206_s8 = inlined_call_operand.vmem [shape: f32[1,128], index: 8, kind: input, shape index: {}]   ;;  %s4207_s9 = inlined_call_operand.vmem [shape: f32[1,128], index: 9, kind: input, shape index: {}]   ;;  %s4208_s10 = inlined_call_operand.hbm [shape: bf16[128,128], index: 10, kind: input, shape index: {}]   ;;  %s4209_s11 = inlined_call_operand.vmem [shape: f32[1,128], index: 11, kind: input, shape index: {}]   ;;  %s4210_s12 = inlined_call_operand.vmem [shape: f32[1,128], index: 12, kind: input, shape index: {}]   ;;  %s4211_s13 = inlined_call_operand.hbm [shape: bf16[2,8,8,128], index: 13, kind: output, shape index: {}]  }
   0x1   :  { %4223 = sst [smem:[#allocation24_spill]] %s4199_s1 }
   0x2   :  { %4224 = sst [smem:[#allocation25_spill]] %s4202_s4 }
   0x3   :  { %4225 = sst [smem:[#allocation26_spill]] %s4204_s6 }
   0x4   :  { %4226 = sst [smem:[#allocation27_spill]] %s4205_s7 }
   0x5   :  { %4227 = sst [smem:[#allocation28_spill]] %s4206_s8 }
   0x6   :  { %4228 = sst [smem:[#allocation29_spill]] %s4207_s9 }
   0x7   :  { %4229 = sst [smem:[#allocation30_spill]] %s4208_s10 }
   0x8   :  { %4230 = sst [smem:[#allocation31_spill]] %s4209_s11 }
   0x9   :  { %4231 = sst [smem:[#allocation32_spill]] %s4210_s12 }
   0xa   :  { %4232 = sst [smem:[#allocation33_spill]] %s4211_s13 }
   0xb   :  { %18 = vsyncpa [#allocation4], 0 }
   0xc   :  { %20 = vsyncpa [#allocation4 + $0x1], 0 }
   0xd   :  { %21 = vsyncpa [#allocation7], 0 }
   0xe   :  { %22 = vsyncpa [#allocation10], 0 }
   0xf   :  { %23 = vsyncpa [#allocation5], 0 }
  0x10   :  { %25 = vsyncpa [#allocation5 + $0x1], 0  ;;  %s3645_s25 = smov 0   ;;  %s3647_s26 = smov 0  }
  0x11   :  { %s3649_s27 = smov 0   ;;  %s3651_s28 = smov 0  }
  0x12   :  { %s3653_s29 = smov 0   ;;  %s3655_s30 = smov 0  }
  0x13   :  { %s3657_s14 = smov 0   ;;  %s3659_s15 = smov 0  }
  0x14   :  { %s3661_s16 = smov 0   ;;  %s3663_s17 = smov 0  }
  0x15   :  { %s3665_s18 = smov 0  }
  0x16 LB: > { %4233 = sst [smem:[#allocation17_spill]] %s3523_s25  ;;  %s2530_s19 = sadd.s32 4294967295, %s3563_s18   ;;  %s3563_s18 = sphi %s3665_s18, %s31_s18   ;;  %s3559_s17 = sphi %s3663_s17, %s4291_s17   ;;  %s3555_s16 = sphi %s3661_s16, %s4284_s16   ;;  %s3551_s15 = sphi %s3659_s15, %s4290_s15   ;;  %s3547_s14 = sphi %s3657_s14, %s4283_s14   ;;  %s3543_s30 = sphi %s3655_s30, %s4289_s30   ;;  %s3539_s29 = sphi %s3653_s29, %s4288_s29   ;;  %s3535_s28 = sphi %s3651_s28, %s4287_s28   ;;  %s3531_s27 = sphi %s3649_s27, %s4286_s27   ;;  %s3527_s26 = sphi %s3647_s26, %s4285_s26   ;;  %s3523_s25 = sphi %s3645_s25, %s4282_s25  }
  0x17   : > { %4234 = sst [smem:[#allocation18_spill]] %s3527_s26  ;;  %s2531_s20 = sadd.s32 4294967294, %s3563_s18  }
  0x18   : > { %4235 = sst [smem:[#allocation19_spill]] %s3551_s15  ;;  %p63_p0 = scmp.ne.s32.totalorder %s3539_s29, %s3535_s28 }
  0x19   : > { %4236 = sst [smem:[#allocation20_spill]] %s3555_s16  ;;  %p3701_p1 = scmp.eq.s32.totalorder %s2530_s19, 0 }
  0x1a   : > { %p340_p2 = scmp.ne.s32.totalorder %s3531_s27, %s3527_s26  ;;  %p341_p3 = scmp.eq.s32.totalorder %s2530_s19, 3 }
  0x1b   : > { %p3709_p4 = por %p3701_p1, %p63_p0  ;;  %p346_p5 = scmp.ne.s32.totalorder %s3527_s26, %s3523_s25 }
  0x1c   : > { %p3715_p6 = por %p341_p3, %p340_p2  ;;  %p347_p7 = scmp.eq.s32.totalorder %s2531_s20, 3 }
  0x1d   : > { %p2532_p8 = scmp.ge.s32.totalorder %s3563_s18, 1  ;;  %p354_p9 = scmp.lt.s32.totalorder %s3563_s18, 5 }
  0x1e   : > { %s4239_s23 = scalar_select %p3715_p6, 1, 0 }
  0x1f   : > { %p3721_p10 = por %p347_p7, %p346_p5  ;;  %p3725_p11 = pnand %p2532_p8, %p354_p9 }
  0x20   : > { %4240 = sst [smem:[#allocation21_spill]] %s4239_s23  ;;  %s3565_s19 = smov [#allocation6]  }
  0x21   : > { %s4241_s24 = scalar_select %p3721_p10, 1, 0 }
  0x22   : > { %s366_s13 = sshll.u32 %s3565_s19, 4  ;;  %p3069_p12 = pneg %p3725_p11  ;;  %s367_s13 = int_to_ptr.vmem [resolvable:$true] %s366_s13 }
  0x23   : > { %4242 = sst [smem:[#allocation22_spill]] %s4241_s24  ;;  %s3566_s20 = smov [#allocation9]  }
  0x24   : > { %p3733_p13 = pnand %p3069_p12, %p3701_p1  ;;  %s404_s23 = sshll.u32 %s3566_s20, 4  ;;  %s405_s23 = int_to_ptr.vmem [resolvable:$true] %s404_s23 }
  0x25   : > { %s3314_s24 = scalar_lea.vmem %s367_s13, 1024  ;;  %p3322_p7 = scmp.lt.s32.totalorder %s367_s13, %s367_s13 }
  0x26   : > { %p3305_p0 = pneg %p3733_p13  ;;  %p3315_p2 = scmp.ne.s32.totalorder %s367_s13, %s3314_s24 }
  0x27   : > { %p3323_p8 = scmp.lt.s32.totalorder %s3314_s24, %s3314_s24 }
  0x28   : > { %p3317_p3 = pnand %p3315_p2, %p3305_p0 }
  0x29   : > { %p3324_p9 = por %p3323_p8, %p3322_p7 }
  0x2a   : > { %p3318_p5 = pneg %p3317_p3 }
  0x2c   : > { %p3325_p12 = pnand %p3324_p9, %p3318_p5 }
  0x2e   : > { %3328 = shalt.err (!%p3325_p12)
}
  0x2f   : > { %s4217_s19 = smov 64   ;;  %s4218_s15 = smov 4  }
  0x30   : > { %s4245_s1 = sld [smem:[#allocation24_spill]]  ;;  %s3340_s12 = scalar_lea.vmem %s405_s23, 1024 }
  0x31   : > { %p3341_p2 = scmp.ne.s32.totalorder %s405_s23, %s3340_s12  ;;  %p3348_p5 = scmp.lt.s32.totalorder %s405_s23, %s405_s23 }
  0x32   : > { %p3349_p8 = scmp.lt.s32.totalorder %s3340_s12, %s3340_s12 }
  0x33   : > { %p3343_p3 = pnand %p3341_p2, %p3305_p0 }
  0x34   : > { %p3350_p9 = por %p3349_p8, %p3348_p5 }
  0x35   : > { %p3344_p7 = pneg %p3343_p3 }
  0x36   : > { %3072 = dma.hbm_to_vmem [thread:$0]  (!%p3733_p13), %s4245_s1, 1024, %s367_s13, [#allocation7], %s4217_s19, %s4217_s19, %s4218_s15  }
  0x37   : > { %p3351_p12 = pnand %p3350_p9, %p3344_p7 }
  0x39   : > { %3354 = shalt.err (!%p3351_p12)
}
  0x3a   : > { %s4246_s7 = sld [smem:[#allocation27_spill]]  ;;  %s3569_s9 = smov [#allocation8]  }
  0x3b   : > { %s385_s13 = sshll.u32 %s3569_s9, 4  ;;  %s3570_s20 = smov [#allocation11]   ;;  %s386_s13 = int_to_ptr.vmem [resolvable:$true] %s385_s13 }
  0x3c   : > { %s423_s1 = sshll.u32 %s3570_s20, 4  ;;  %s3366_s11 = scalar_lea.vmem %s386_s13, 9216  ;;  %s424_s1 = int_to_ptr.vmem [resolvable:$true] %s423_s1 }
  0x3d   : > { %p3367_p2 = scmp.ne.s32.totalorder %s386_s13, %s3366_s11  ;;  %p3374_p5 = scmp.lt.s32.totalorder %s386_s13, %s386_s13 }
  0x3e   : > { %p3375_p8 = scmp.lt.s32.totalorder %s3366_s11, %s3366_s11 }
  0x3f   : > { %p3369_p3 = pnand %p3367_p2, %p3305_p0 }
  0x40   : > { %3078 = dma.hbm_to_vmem [thread:$0]  (!%p3733_p13), %s4246_s7, 1024, %s405_s23, [#allocation10], %s4217_s19, %s4217_s19, %s4218_s15  }
  0x41   : > { %p3370_p7 = pneg %p3369_p3  ;;  %p3376_p9 = por %p3375_p8, %p3374_p5 }
  0x43   : > { %p3377_p12 = pnand %p3376_p9, %p3370_p7 }
  0x45   : > { %3380 = shalt.err (!%p3377_p12)
}
  0x46   : > { %s4247_s4 = sld [smem:[#allocation25_spill]]  ;;  %s3392_s23 = scalar_lea.vmem %s424_s1, 1024 }
  0x47   : > { %p3393_p10 = scmp.ne.s32.totalorder %s424_s1, %s3392_s23  ;;  %p3400_p5 = scmp.lt.s32.totalorder %s424_s1, %s424_s1 }
  0x48   : > { %p3401_p7 = scmp.lt.s32.totalorder %s3392_s23, %s3392_s23 }
  0x49   : > { %p3395_p2 = pnand %p3393_p10, %p3305_p0 }
  0x4a   : > { %p3402_p8 = por %p3401_p7, %p3400_p5 }
  0x4b   : > { %p3396_p3 = pneg %p3395_p2 }
  0x4c   : > { %3075 = dma.hbm_to_vmem [thread:$0]  (!%p3733_p13), %s4247_s4, 9216, %s386_s13, [#allocation7], %s4217_s19, %s4217_s19, %s4218_s15  }
  0x4d   : > { %p3403_p9 = pnand %p3402_p8, %p3396_p3 }
  0x4f   : > { %3406 = shalt.err (!%p3403_p9)
}
  0x50   : > { %s4248_s10 = sld [smem:[#allocation30_spill]]  ;;  %s40_s25 = sadd.s32 1, %s3555_s16 }
  0x51   : > { %p41_p10 = scmp.ge.s32.totalorder %s40_s25, 2  ;;  %s43_s9 = sadd.s32 1, %s3559_s17 }
  0x52   : > { %s50_s13 = sadd.s32 1, %s3543_s30  ;;  %p57_p0 = scmp.ne.s32.totalorder %s3543_s30, %s3539_s29 }
  0x53   : > { %s4293_s25 = smov (%p41_p10, %s40_s25), 0  ;;  %s4295_s9 = smov (!%p41_p10, %s43_s9), %s3559_s17 }
  0x54   : > { %4249 = sst [smem:[#allocation23_spill]] %s4293_s25  ;;  %p58_p12 = scmp.eq.s32.totalorder %s3563_s18, 0 }
  0x55   : > { %s326_s20 = ssub.s32 %s3555_s16, %s4293_s25  ;;  %p45_p2 = scmp.ge.s32.totalorder %s4295_s9, 2 }
  0x56   : > { %3081 = dma.hbm_to_vmem [thread:$0]  (!%p3733_p13), %s4248_s10, 1024, %s424_s1, [#allocation10], %s4217_s19, %s4217_s19, %s4218_s15  }
  0x57   : > { %s330_s8 = sadd.s32 1, %s3531_s27  ;;  %p3795_p3 = por %p58_p12, %p57_p0 }
  0x58   : > { %p3094_p13 = scmp.lt.s32.totalorder %s3563_s18, 4  ;;  %s4297_s9 = smov (%p45_p2, %s4295_s9), 0 }
  0x59   : > { %s443_s12 = sand.u32 1, %s3543_s30   ;;  %s3047_s23 = smul.u32 1280, %s3559_s17 }
  0x5a   : > { %s47_s11 = ssub.s32 %s3559_s17, %s4297_s9  ;;  %s3046_s19 = smul.u32 80, %s443_s12 }
  0x5b   : > { %p48_p5 = scmp.eq.s32.totalorder %s47_s11, 0  ;;  %s327_s24 = sor.u32 %s326_s20, %s47_s11 }
  0x5c   : > { %p328_p7 = scmp.eq.s32.totalorder %s327_s24, 0  ;;  %s453_s25 = scalar_lea.hbm %s4198_s0, %s3047_s23 }
  0x5d   : > { %s3807_s15 = scalar_select %p48_p5, %s3543_s30, %s50_s13  }
  0x5e   : > { %s3810_s4 = scalar_select %p328_p7, %s3531_s27, %s330_s8  }
  0x5f   : > { %s447_s16 = scalar_lea.vmem [#allocation3], %s3046_s19  ;;  %p3819_p8 = pnand %p3094_p13, %p3795_p3 }
  0x60   : > { %s454_s26 = sshll.u32 %s447_s16, 4  ;;  %s444_s20 = scalar_lea.sflag [#allocation4], %s443_s12  ;;  %s455_s26 = int_to_ptr.vmem [resolvable:$true] %s454_s26 }
  0x61   : > { %p3409_p9 = pneg %p3819_p8  ;;  %s3420_s13 = scalar_lea.vmem %s455_s26, 1280 }
  0x62   : > { %p3421_p10 = scmp.ne.s32.totalorder %s455_s26, %s3420_s13  ;;  %s3571_s8 = smov [#allocation3]  }
  0x63   : > { %s3425_s7 = sshll.u32 %s3571_s8, 4  ;;  %s3426_s7 = int_to_ptr.vmem [resolvable:$false] %s3425_s7 }
  0x64   : > { %p3423_p0 = pnand %p3421_p10, %p3409_p9  ;;  %s3427_s10 = scalar_lea.vmem %s3426_s7, 2560 }
  0x65   : > { %p3428_p2 = scmp.lt.s32.totalorder %s455_s26, %s3426_s7  ;;  %p3429_p5 = scmp.lt.s32.totalorder %s3427_s10, %s3420_s13 }
  0x66   : > { %p3424_p12 = pneg %p3423_p0 }
  0x67   : > { %p3430_p7 = por %p3429_p5, %p3428_p2 }
  0x69   : > { %p3431_p3 = pnand %p3430_p7, %p3424_p12 }
  0x6b   : > { %3434 = shalt.err (!%p3431_p3)
}
  0x6c   : > { %s4252_s16 = smov 4   ;;  %s4253_s19 = smov 64  }
  0x6d   : > { %3085 = dma.hbm_to_vmem [thread:$0]  (!%p3819_p8), %s453_s25, 1280, %s455_s26, %s444_s20, %s4253_s19, %s4253_s19, %s4252_s16  }
  0x6e   : > { %466 = sbr.rel (%p3725_p11) target bundleno = 899 (0x383), region = 72  ;;  %s468_s1 = sand.u32 (!%p3725_p11), 1, %s3539_s29  }
  0x6f   : > { %s3048_s12 = smul.u32 (!%p3725_p11), 80, %s468_s1  ;;  %s469_s23 = scalar_lea.sflag (!%p3725_p11), [#allocation4], %s468_s1 }
  0x71   : > { %s472_s11 = scalar_lea.vmem (!%p3725_p11), [#allocation3], %s3048_s12 }
  0x73   : > { %3506 = dma.done.wait (%p3709_p4), %s469_s23, 1280  }
  0x74   : > { %3508 = vsyncadd (%p3709_p4), %s469_s23, 4294966016 }
  0x75   : > { %3510 = dma.done.wait (%p3701_p1), [#allocation7], 10240  }
  0x76   : > { %3512 = vsyncadd (%p3701_p1), [#allocation7], 4294957056 }
  0x77   : > { %3514 = dma.done.wait (%p3701_p1), [#allocation10], 2048  }
  0x78   : > { %3516 = vsyncadd (%p3701_p1), [#allocation10], 4294965248  ;;  %v3196_v0 = vld [vmem:[#allocation6 + $0x38] sm:$0xff]   ;;  %v3197_v1 = vld [vmem:[#allocation6 + $0x30] sm:$0xff]   ;;  %s2710_s6 = sshll.u32 %s3547_s14, 5  ;;  %s2545_s21 = sshll.u32 %s3547_s14, 2  ;;  %v786_v41 = vlaneseq }
  0x79   : > { %2918 = vmatprep.subr.bf16.mxu0 %v3196_v0  ;;  %v3198_v2 = vld [vmem:[#allocation6 + $0x28] sm:$0xff]   ;;  %s3846_s26 = scalar_lea.vmem %s472_s11, %s2710_s6 [#allocation3]  ;;  %v3199_v3 = vld [vmem:[#allocation6 + $0x20] sm:$0xff]   ;;  %v3200_v5 = vld [vmem:[#allocation6 + $0x18] sm:$0xff]   ;;  %v780_v40 = vstv %s2545_s21  ;;  %s4270_s10 = sld [smem:[#allocation26_spill]] }
  0x7a   : > { %2919 = vmatpush3.bf16.msra.mxu0 %v3196_v0  ;;  %v3204_v4 = vld [vmem:[%s3846_s26] sm:$0xff]   ;;  %v3202_v7 = vld [vmem:[#allocation6 + $0x8] sm:$0xff]   ;;  %v3203_v8 = vld [vmem:[#allocation6] sm:$0xff]   ;;  %v781_v42 = vadd.s32 1, %v780_v40  ;;  %v3865_v44 = vshrl.u32 %v786_v41, 7  ;;  %vm789_vm2 = vcmp.ge.s32.totalorder %v780_v40, 1 }
  0x7b   : > { %2920 = vmatprep.subr.bf16.mxu0 %v3197_v1  ;;  %2934 = vmatprep.mubr.bf16.mxu0 %v3204_v4  ;;  %v3201_v6 = vld [vmem:[#allocation6 + $0x10] sm:$0xff]   ;;  %v3205_v9 = vld [vmem:[%s3846_s26 + $0x8] sm:$0xff]   ;;  %v3206_v10 = vld [vmem:[%s3846_s26 + $0x10] sm:$0xff]   ;;  %vm795_vm3 = vcmp.le.s32.totalorder %v780_v40, 8  ;;  %v783_v53 = vadd.s32 3, %v780_v40  ;;  %v782_v59 = vadd.s32 2, %v780_v40 }
  0x7c   : > { %v3207_v11 = vld [vmem:[%s3846_s26 + $0x18] sm:$0xff]   ;;  %v3208_v12 = vld [vmem:[%s3846_s26 + $0x20] sm:$0xff]   ;;  %v3209_v13 = vld [vmem:[%s3846_s26 + $0x28] sm:$0xff]   ;;  %vm790_vm0 = vcmp.ge.s32.totalorder %v781_v42, 1  ;;  %vm796_vm1 = vcmp.le.s32.totalorder %v781_v42, 8  ;;  %v3874_v48 = vadd.s32 8, %v3865_v44 }
  0x7d   : > { %v3210_v14 = vld [vmem:[#allocation8 + $0x138] sm:$0xff]   ;;  %v3213_v17 = vld [vmem:[#allocation8 + $0x130] sm:$0xff]   ;;  %v3216_v20 = vld [vmem:[#allocation8 + $0x128] sm:$0xff]   ;;  %vm807_vm5 = vcmp.ge.s32.totalorder %v3865_v44, 1  ;;  %vm792_vm10 = vcmp.ge.s32.totalorder %v783_v53, 1  ;;  %vm798_vm11 = vcmp.le.s32.totalorder %v783_v53, 8 }
  0x7e   : > { %2921 = vmatpush3.bf16.msra.mxu0 %v3197_v1  ;;  %v3211_v15 = vld [vmem:[#allocation8 + $0xf8] sm:$0xff]   ;;  %2784 = vmatprep.subr.bf16.mxu1 %v3210_v14  ;;  %v3214_v18 = vld [vmem:[#allocation8 + $0xf0] sm:$0xff]   ;;  %v3217_v21 = vld [vmem:[#allocation8 + $0xe8] sm:$0xff]   ;;  %vm822_vm6 = vcmp.le.s32.totalorder %v3874_v48, 8  ;;  %vm791_vm14 = vcmp.ge.s32.totalorder %v782_v59, 1  ;;  %vm797_vm15 = vcmp.le.s32.totalorder %v782_v59, 8 }
  0x7f   : > { %2922 = vmatprep.subr.bf16.mxu0 %v3198_v2  ;;  %v3212_v16 = vld [vmem:[#allocation8 + $0x178] sm:$0xff]   ;;  %2785 = vmatpush3.bf16.msra.mxu1 %v3211_v15  ;;  %v3215_v19 = vld [vmem:[#allocation8 + $0x170] sm:$0xff]   ;;  %v3218_v22 = vld [vmem:[#allocation8 + $0x168] sm:$0xff]   ;;  %v784_v14 = vadd.s32 4, %v780_v40  ;;  %s4271_s16 = sld [smem:[#allocation18_spill]]  ;;  %s3572_s25 = smov [#allocation12]  }
  0x80   : > { %2786 = vmatprep.subr.bf16.mxu1 %v3213_v17  ;;  %v3219_v23 = vld [vmem:[#allocation8 + $0x120] sm:$0xff]   ;;  %v3222_v26 = vld [vmem:[#allocation8 + $0x118] sm:$0xff]   ;;  %v3225_v29 = vld [vmem:[#allocation8 + $0x110] sm:$0xff]   ;;  %s4272_s12 = sld [smem:[#allocation31_spill]]  ;;  %s3439_s24 = sshll.u32 %s3572_s25, 4  ;;  %s3440_s24 = int_to_ptr.vmem [resolvable:$false] %s3439_s24 }
  0x81   : > { %v3220_v24 = vld [vmem:[#allocation8 + $0xe0] sm:$0xff]   ;;  %v3223_v27 = vld [vmem:[#allocation8 + $0xd8] sm:$0xff]   ;;  %v3226_v30 = vld [vmem:[#allocation8 + $0xd0] sm:$0xff]   ;;  %s4273_s6 = sld [smem:[#allocation28_spill]] }
  0x82   : > { %2923 = vmatpush3.bf16.msra.mxu0 %v3198_v2  ;;  %v3221_v25 = vld [vmem:[#allocation8 + $0x160] sm:$0xff]   ;;  %v3224_v28 = vld [vmem:[#allocation8 + $0x158] sm:$0xff]   ;;  %v3227_v31 = vld [vmem:[#allocation8 + $0x150] sm:$0xff]   ;;  %s4274_s28 = sld [smem:[#allocation32_spill]] }
  0x83   : > { %2924 = vmatprep.subr.bf16.mxu0 %v3199_v3  ;;  %2787 = vmatpush3.bf16.msra.mxu1 %v3214_v18  ;;  %v3228_v32 = vld [vmem:[#allocation8 + $0x108] sm:$0xff]   ;;  %v3231_v35 = vld [vmem:[#allocation8 + $0x100] sm:$0xff]   ;;  %v3234_v38 = vld [vmem:[#allocation8 + $0x78] sm:$0xff]   ;;  %s4275_s20 = sld [smem:[#allocation29_spill]] }
  0x84   : > { %2788 = vmatprep.subr.bf16.mxu1 %v3216_v20  ;;  %v3229_v33 = vld [vmem:[#allocation8 + $0xc8] sm:$0xff]   ;;  %v3232_v36 = vld [vmem:[#allocation8 + $0xc0] sm:$0xff]   ;;  %v3854_v39 = vld [vmem:[#allocation8 + $0xb8] sm:$0xff]   ;;  %s4276_s13 = sld [smem:[#allocation19_spill]] }
  0x85   : > { %v3230_v34 = vld [vmem:[#allocation8 + $0x148] sm:$0xff]   ;;  %v3233_v37 = vld [vmem:[#allocation8 + $0x140] sm:$0xff]   ;;  %v3863_v43 = vld [vmem:[%s4200_s2] ss:$0 sm:$0xff]  ;;  %s528_s8 = sand.u32 1, %s4271_s16   ;;  %s4278_s22 = sld [smem:[#allocation33_spill]] }
  0x86   : > { %2925 = vmatpush3.bf16.msra.mxu0 %v3199_v3  ;;  %v3870_v46 = vld [vmem:[%s4201_s3] ss:$0 sm:$0xff]  ;;  %vm802_vm4 = vmand %vm790_vm0, %vm796_vm1  ;;  %s2544_s7 = sshll.u32 %s528_s8, 4 }
  0x87   : > { %2926 = vmatprep.subr.bf16.mxu0 %v3200_v5  ;;  %2789 = vmatpush3.bf16.msra.mxu1 %v3217_v21  ;;  %vm3882_vm7 = vmand %vm789_vm2, %vm795_vm3  ;;  %s530_s23 = scalar_lea.vmem [#allocation12], %s2544_s7 }
  0x88   : > { %2790 = vmatprep.subr.bf16.mxu1 %v3219_v23  ;;  %vm811_vm8 = vmand %vm802_vm4, %vm807_vm5  ;;  %s2399_s11 = sshll.u32 %s530_s23, 4  ;;  %s4134_s11 = int_to_ptr.vmem [resolvable:$true] %s2399_s11 }
  0x89   : > { %vm826_vm9 = vmand %vm802_vm4, %vm822_vm6  ;;  %p3442_p13 = scmp.lt.s32.totalorder %s4134_s11, %s3440_s24 }
  0x8a   : > { %2927 = vmatpush3.bf16.msra.mxu0 %v3200_v5  ;;  %vm3896_vm12 = vmand %vm3882_vm7, %vm807_vm5 }
  0x8b   : > { %2928 = vmatprep.subr.bf16.mxu0 %v3201_v6  ;;  %2791 = vmatpush3.bf16.msra.mxu1 %v3220_v24  ;;  %vm824_vm13 = vmand %vm3882_vm7, %vm822_vm6 }
  0x8c   : > { %2792 = vmatprep.subr.bf16.mxu1 %v3222_v26  ;;  %vm3910_vm0 = vmand %vm792_vm10, %vm798_vm11  ;;  %vm799_vm10 = vcmp.le.s32.totalorder %v784_v14, 8 }
  0x8d   : > { %vm3920_vm1 = vmand %vm791_vm14, %vm797_vm15 }
  0x8e   : > { %2929 = vmatpush3.bf16.msra.mxu0 %v3201_v6  ;;  %vm815_vm2 = vmand %vm3910_vm0, %vm807_vm5 }
  0x8f   : > { %2930 = vmatprep.subr.bf16.mxu0 %v3202_v7  ;;  %2793 = vmatpush3.bf16.msra.mxu1 %v3223_v27  ;;  %vm830_vm3 = vmand %vm3910_vm0, %vm822_vm6 }
  0x90   : > { %2794 = vmatprep.subr.bf16.mxu1 %v3225_v29  ;;  %vm828_vm11 = vmand %vm3920_vm1, %vm822_vm6 }
  0x92   : > { %2931 = vmatpush3.bf16.msra.mxu0 %v3202_v7 }
  0x93   : > { %2932 = vmatprep.subr.bf16.mxu0 %v3203_v8  ;;  %2795 = vmatpush3.bf16.msra.mxu1 %v3226_v30 }
  0x94   : > { %2796 = vmatprep.subr.bf16.mxu1 %v3228_v32 }
  0x96   : > { %2933 = vmatpush3.bf16.msra.mxu0 %v3203_v8 }
  0x97   : > { %2946 = vmatprep.subr.bf16.mxu0 %v3212_v16  ;;  %2797 = vmatpush3.bf16.msra.mxu1 %v3229_v33 }
  0x98   : > { %2798 = vmatprep.subr.bf16.mxu1 %v3231_v35 }
  0x99   : > { %2935 = vmatmul.mubr.bf16.vlgmr.msra.gmra.mxu0 %v3205_v9 }
  0x9a   : > { %2938 = vmatprep.mubr.bf16.mxu0 %v3206_v10  ;;  %2947 = vmatpush3.bf16.msra.mxu0 %v3212_v16 }
  0x9b   : > { %2948 = vmatprep.subr.bf16.mxu0 %v3215_v19  ;;  %2799 = vmatpush3.bf16.msra.mxu1 %v3232_v36 }
  0x9c   : > { %2822 = vmatprep.subr.bf16.mxu1 %v3234_v38 }
  0x9e   : > { %2949 = vmatpush3.bf16.msra.mxu0 %v3215_v19 }
  0x9f   : > { %2950 = vmatprep.subr.bf16.mxu0 %v3218_v22 }
  0xa1   : > { %2939 = vmatmul.mubr.bf16.gmra.mxu0 %v3207_v11 }
  0xa2   : > { %2942 = vmatprep.mubr.bf16.mxu0 %v3208_v12  ;;  %2951 = vmatpush3.bf16.msra.mxu0 %v3218_v22 }
  0xa3   : > { %2952 = vmatprep.subr.bf16.mxu0 %v3221_v25 }
  0xa6   : > { %2953 = vmatpush3.bf16.msra.mxu0 %v3221_v25 }
  0xa7   : > { %2954 = vmatprep.subr.bf16.mxu0 %v3224_v28 }
  0xa9   : > { %2943 = vmatmul.mubr.bf16.gmra.mxu0 %v3209_v13  ;;  %v785_v13 = vadd.s32 5, %v780_v40 }
  0xaa   : > { %2955 = vmatpush3.bf16.msra.mxu0 %v3224_v28 }
  0xab   : > { %2956 = vmatprep.subr.bf16.mxu0 %v3227_v31  ;;  %vm794_vm4 = vcmp.ge.s32.totalorder %v785_v13, 1  ;;  %vm800_vm7 = vcmp.le.s32.totalorder %v785_v13, 8 }
  0xae   : > { %2957 = vmatpush3.bf16.msra.mxu0 %v3227_v31 }
  0xaf   : > { %2958 = vmatprep.subr.bf16.mxu0 %v3230_v34 }
  0xb2   : > { %2959 = vmatpush3.bf16.msra.mxu0 %v3230_v34 }
  0xb3   : > { %2960 = vmatprep.subr.bf16.mxu0 %v3233_v37 }
  0xb6   : > { %2961 = vmatpush3.bf16.msra.mxu0 %v3233_v37 }
  0xb7   : > { %2966 = vmatprep.subr.bf16.mxu0 %v3854_v39 }
 0x159   : > { %v2936_v45 = vpop.f32.mrf.mxu0 }
 0x15a   : > { %v739_v47 = vmul.f32 %v2936_v45, %v3863_v43 }
 0x15b   : > { %v683_v49 = vpop.f32.mrf.mxu0 }
 0x15c   : > { %v758_v50 = vadd.f32 %v3870_v46, %v739_v47  ;;  %v737_v51 = vmul.f32 %v3863_v43, %v683_v49 }
 0x15d   : > { %v2937_v52 = vpop.f32.mrf.mxu0 }
 0x15e   : > { %v756_v54 = vadd.f32 %v3870_v46, %v737_v51  ;;  %v740_v55 = vmul.f32 %v2937_v52, %v3863_v43  ;;  %v770_v56 = vmax.f32 %v758_v50, 0.0 }
 0x15f   : > { %v686_v58 = vpop.f32.mrf.mxu0 }
 0x160   : > { %v759_v60 = vadd.f32 %v3870_v46, %v740_v55  ;;  %v738_v61 = vmul.f32 %v3863_v43, %v686_v58  ;;  %v768_v63 = vmax.f32 %v756_v54, 0.0  ;;  %v861_v4 = vsel %vm811_vm8, %v770_v56, 0.0 }
 0x161   : > { %v2940_v62 = vpop.f32.mrf.mxu0  ;;  %vm793_vm8 = vcmp.ge.s32.totalorder %v784_v14, 1 }
 0x162   : > { %v771_v1 = vmax.f32 %v759_v60, 0.0  ;;  %v757_v2 = vadd.f32 %v3870_v46, %v738_v61  ;;  %v743_v3 = vmul.f32 %v2940_v62, %v3863_v43  ;;  %v859_v15 = vsel %vm3896_vm12, %v768_v63, 0.0  ;;  %vm3945_vm12 = vmand %vm794_vm4, %vm800_vm7 }
 0x163   : > { %v699_v5 = vpop.f32.mrf.mxu0  ;;  %vm819_vm14 = vmand %vm3945_vm12, %vm807_vm5  ;;  %vm944_vm4 = vsmask.f32 7440 }
 0x164   : > { %v862_v6 = vsel %vm826_vm9, %v771_v1, 0.0  ;;  %v769_v7 = vmax.f32 %v757_v2, 0.0  ;;  %v762_v8 = vadd.f32 %v3870_v46, %v743_v3  ;;  %v741_v9 = vmul.f32 %v3863_v43, %v699_v5  ;;  %vm813_vm9 = vmand %vm3920_vm1, %vm807_vm5 }
 0x165   : > { %v2732_v10 = vpack.c.bf16 %v862_v6, %v861_v4  ;;  %v2941_v12 = vpop.f32.mrf.mxu0  ;;  %vm834_vm0 = vmand %vm3945_vm12, %vm822_vm6  ;;  %vm1010_vm1 = vcmask 1042432  }
 0x166   : > { %v860_v16 = vsel %vm824_vm13, %v769_v7, 0.0  ;;  %v760_v17 = vadd.f32 %v3870_v46, %v741_v9  ;;  %v744_v18 = vmul.f32 %v2941_v12, %v3863_v43  ;;  %v774_v20 = vmax.f32 %v762_v8, 0.0  ;;  %vm3951_vm13 = vmand %vm793_vm8, %vm799_vm10 }
 0x167   : > { %2764 = vst [vmem:[#allocation2 + $0x8] sm:$0xff] %v2732_v10   ;;  %v2727_v19 = vpack.c.bf16 %v860_v16, %v859_v15  ;;  %v702_v22 = vpop.f32.mrf.mxu0  ;;  %vm817_vm15 = vmand %vm3951_vm13, %vm807_vm5 }
 0x168   : > { %v763_v23 = vadd.f32 %v3870_v46, %v744_v18  ;;  %v742_v24 = vmul.f32 %v3863_v43, %v702_v22  ;;  %v772_v25 = vmax.f32 %v760_v17, 0.0  ;;  %v865_v30 = vsel %vm815_vm2, %v774_v20, 0.0  ;;  %vm832_vm5 = vmand %vm3951_vm13, %vm822_vm6 }
 0x169   : > { %2728 = vst [vmem:[#allocation2] sm:$0xff] %v2727_v19   ;;  %v2944_v26 = vpop.f32.mrf.mxu0  ;;  %vm1011_vm2 = vcmask 1046532  }
 0x16a   : > { %v775_v27 = vmax.f32 %v763_v23, 0.0  ;;  %v761_v28 = vadd.f32 %v3870_v46, %v742_v24  ;;  %v747_v29 = vmul.f32 %v2944_v26, %v3863_v43  ;;  %v863_v37 = vsel %vm813_vm9, %v772_v25, 0.0  ;;  %vm3985_vm6 = vmor %vm1010_vm1, %vm1011_vm2 }
 0x16b   : > { %v715_v31 = vpop.f32.mrf.mxu0 }
 0x16c   : > { %v866_v32 = vsel %vm830_vm3, %v775_v27, 0.0  ;;  %v773_v33 = vmax.f32 %v761_v28, 0.0  ;;  %v766_v34 = vadd.f32 %v3870_v46, %v747_v29  ;;  %v745_v36 = vmul.f32 %v3863_v43, %v715_v31 }
 0x16d   : > { %v2742_v38 = vpack.c.bf16 %v866_v32, %v865_v30  ;;  %v2945_v41 = vpop.f32.mrf.mxu0  ;;  %vm943_vm3 = vsmask.f32 3328 }
 0x16e   : > { %v864_v42 = vsel %vm828_vm11, %v773_v33, 0.0  ;;  %v778_v45 = vmax.f32 %v766_v34, 0.0  ;;  %v764_v47 = vadd.f32 %v3870_v46, %v745_v36  ;;  %v748_v49 = vmul.f32 %v2945_v41, %v3863_v43  ;;  %v3967_v55 = vld [vmem:[#allocation2 + $0x8] sm:$0xf]  ;;  %v934_v44 = vld [vmem:[#allocation2 + $0xc] sm:$0xf]  ;;  %vm4017_vm7 = vmor %vm943_vm3, %vm944_vm4 }
 0x16f   : > { %2766 = vst [vmem:[#allocation2 + $0x18] sm:$0xff] %v2742_v38   ;;  %v2737_v50 = vpack.c.bf16 %v864_v42, %v863_v37  ;;  %v718_v51 = vpop.f32.mrf.mxu0  ;;  %v961_v59 = vshrl.u32 %v3967_v55, 16  ;;  %v964_v60 = vshll.u32 %v3967_v55, 16  ;;  %v1019_v2 = vrot.slane %v934_v44, 5 }
 0x170   : > { %v776_v52 = vmax.f32 %v764_v47, 0.0  ;;  %v767_v53 = vadd.f32 %v3870_v46, %v748_v49  ;;  %v746_v54 = vmul.f32 %v3863_v43, %v718_v51  ;;  %v869_v56 = vsel %vm819_vm14, %v778_v45, 0.0  ;;  %v3978_v43 = vld [vmem:[#allocation2] sm:$0xf]  ;;  %v932_v19 = vld [vmem:[#allocation2 + $0x4] sm:$0xf] }
 0x171   : > { %2765 = vst [vmem:[#allocation2 + $0x10] sm:$0xff] %v2737_v50   ;;  %v947_v48 = vshrl.u32 %v3978_v43, 16  ;;  %v950_v5 = vshll.u32 %v3978_v43, 16  ;;  %v963_v6 = vrot.slane %v961_v59, 4  ;;  %v966_v7 = vrot.slane %v964_v60, 5 }
 0x172   : > { %v779_v57 = vmax.f32 %v767_v53, 0.0  ;;  %v765_v58 = vadd.f32 %v3870_v46, %v746_v54  ;;  %v867_v61 = vsel %vm817_vm15, %v776_v52, 0.0  ;;  %v2577_v46 = vrot.slane %v3967_v55, 9 }
 0x173   : > { %v949_v14 = vrot.slane %v947_v48, 4  ;;  %v967_v20 = vor.u32 %v966_v7, %v963_v6  ;;  %v952_v24 = vrot.slane %v950_v5, 5  ;;  %v970_v25 = vshll.u32 %v934_v44, 16 }
 0x174   : > { %v870_v62 = vsel %vm834_vm0, %v779_v57, 0.0  ;;  %v777_v63 = vmax.f32 %v765_v58, 0.0  ;;  %v3997_v13 = vsel %vm3985_vm6, %v2577_v46, %v1019_v2  ;;  %v2576_v31 = vrot.slane %v3978_v43, 9 }
 0x175   : > { %v2752_v0 = vpack.c.bf16 %v870_v62, %v869_v56  ;;  %v1015_v32 = vrot.slane %v932_v19, 5  ;;  %v968_v33 = vrot.slane %v967_v20, 4  ;;  %v953_v41 = vor.u32 %v952_v24, %v949_v14 }
 0x176   : > { %v868_v1 = vsel %vm832_vm5, %v777_v63, 0.0  ;;  %v3992_v10 = vld [vmem:[#allocation2 + $0x18] sm:$0xf]  ;;  %v4001_v17 = vld [vmem:[#allocation2 + $0x1c] sm:$0xf]  ;;  %v956_v42 = vshll.u32 %v932_v19, 16 }
 0x177   : > { %2768 = vst [vmem:[#allocation2 + $0x28] sm:$0xff] %v2752_v0   ;;  %v2747_v3 = vpack.c.bf16 %v868_v1, %v867_v61  ;;  %v989_v21 = vshrl.u32 %v3992_v10, 16  ;;  %v992_v22 = vshll.u32 %v3992_v10, 16  ;;  %v2579_v29 = vrot.slane %v3992_v10, 9  ;;  %v3236_v63 = vld [vmem:[#allocation8 + $0x38] sm:$0xff]   ;;  %v3238_v0 = vld [vmem:[#allocation8 + $0x70] sm:$0xff]  }
 0x178   : > { %v3990_v8 = vld [vmem:[#allocation2 + $0x10] sm:$0xf]  ;;  %v936_v9 = vld [vmem:[#allocation2 + $0x14] sm:$0xf]  ;;  %v1027_v30 = vrot.slane %v4001_v17, 5  ;;  %v972_v45 = vrot.slane %v970_v25, 5  ;;  %v1016_v54 = vsel %vm3985_vm6, %v2576_v31, %v1015_v32 }
 0x179   : > { %2767 = vst [vmem:[#allocation2 + $0x20] sm:$0xff] %v2747_v3   ;;  %v2578_v11 = vrot.slane %v3990_v8, 9  ;;  %v1023_v12 = vrot.slane %v936_v9, 5  ;;  %v975_v15 = vshrl.u32 %v3990_v8, 16  ;;  %v978_v16 = vshll.u32 %v3990_v8, 16  ;;  %v3240_v3 = vld [vmem:[#allocation8 + $0xb0] sm:$0xff]  }
 0x17a   : > { %v984_v28 = vshll.u32 %v936_v9, 16  ;;  %v991_v35 = vrot.slane %v989_v21, 4  ;;  %v994_v36 = vrot.slane %v992_v22, 5  ;;  %v4026_v53 = vsel %vm3985_vm6, %v2579_v29, %v1027_v30  ;;  %v3244_v19 = vld [vmem:[#allocation8 + $0xa8] sm:$0xff]   ;;  %v3245_v29 = vld [vmem:[#allocation8 + $0x60] sm:$0xff]  }
 0x17b   : > { %v4005_v18 = vsel %vm3985_vm6, %v2578_v11, %v1023_v12  ;;  %v977_v26 = vrot.slane %v975_v15, 4  ;;  %v980_v27 = vrot.slane %v978_v16, 5  ;;  %v973_v44 = vsel %vm4017_vm7, %v968_v33, %v972_v45  ;;  %v3247_v30 = vld [vmem:[#allocation8 + $0xa0] sm:$0xff]   ;;  %v3250_v33 = vld [vmem:[#allocation8 + $0x98] sm:$0xff]   ;;  %v3254_v45 = vld [vmem:[#allocation8 + $0x48] sm:$0xff]  }
 0x17c   : > { %v2591_v23 = vcombine.low %v3997_v13, %v4005_v18  ;;  %v986_v51 = vrot.slane %v984_v28, 5  ;;  %v995_v60 = vor.u32 %v994_v36, %v991_v35  ;;  %v998_v2 = vshll.u32 %v4001_v17, 16  ;;  %v3239_v17 = vld [vmem:[#allocation8 + $0x30] sm:$0xff]   ;;  %v3246_v32 = vld [vmem:[#allocation8 + $0x20] sm:$0xff]   ;;  %v3249_v35 = vld [vmem:[#allocation8 + $0x18] sm:$0xff]  }
 0x17d   : > { %v981_v34 = vor.u32 %v980_v27, %v977_v26  ;;  %v2587_v48 = vcombine.low %v3967_v55, %v3990_v8  ;;  %v2584_v9 = vcombine.low %v1016_v54, %v3997_v13  ;;  %v954_v12 = vrot.slane %v953_v41, 4  ;;  %v3243_v27 = vld [vmem:[#allocation8 + $0x28] sm:$0xff]   ;;  %v3253_v36 = vld [vmem:[#allocation8 + $0x90] sm:$0xff]   ;;  %v3263_v54 = vld [vmem:[#allocation8 + $0x238] sm:$0xff]  }
 0x17e   : > { %2962 = vmatprep.mubr.bf16.mxu0 %v2591_v23  ;;  %v4022_v52 = vld [vmem:[#allocation2 + $0x2c] sm:$0xf]  ;;  %v4049_v7 = vld [vmem:[#allocation2 + $0x28] sm:$0xf]  ;;  %v996_v14 = vrot.slane %v995_v60, 4  ;;  %v958_v16 = vrot.slane %v956_v42, 5  ;;  %v2580_v60 = vcombine.low %v3978_v43, %v3967_v55  ;;  %v2581_v55 = vcombine.low %v3990_v8, %v3992_v10 }
 0x17f   : > { %v982_v50 = vrot.slane %v981_v34, 4  ;;  %v1687_v46 = vrot.slane %v4022_v52, 5  ;;  %v2641_v11 = vrot.slane %v4049_v7, 9  ;;  %v1000_v21 = vrot.slane %v998_v2, 5  ;;  %v3241_v23 = vld [vmem:[#allocation8 + $0x68] sm:$0xff]   ;;  %v3248_v34 = vld [vmem:[#allocation8 + $0x58] sm:$0xff]  }
 0x180   : > { %v4014_v37 = vld [vmem:[#allocation2 + $0x20] sm:$0xf]  ;;  %v940_v38 = vld [vmem:[#allocation2 + $0x24] sm:$0xf]  ;;  %v3256_v42 = vld [vmem:[#allocation8 + $0x88] sm:$0xff]   ;;  %v1670_v8 = vshrl.u32 %v4049_v7, 16 }
 0x181   : > { %v2586_v47 = vrot.slane %v4014_v37, 9  ;;  %v1119_v49 = vrot.slane %v940_v38, 5  ;;  %v1102_v56 = vshrl.u32 %v4014_v37, 16  ;;  %v1105_v57 = vshll.u32 %v4014_v37, 16  ;;  %v3252_v41 = vld [vmem:[#allocation8 + $0x10] sm:$0xff]   ;;  %v3271_v43 = vld [vmem:[#allocation8 + $0x1e0] sm:$0xff]  }
 0x182   : > { %v4040_v59 = vsel %vm4017_vm7, %v982_v50, %v986_v51  ;;  %v1111_v6 = vshll.u32 %v940_v38, 16  ;;  %v4056_v20 = vsel %vm3985_vm6, %v2641_v11, %v1687_v46  ;;  %v1001_v25 = vsel %vm4017_vm7, %v996_v14, %v1000_v21  ;;  %v3251_v38 = vld [vmem:[#allocation8 + $0x50] sm:$0xff]   ;;  %v3257_v50 = vld [vmem:[#allocation8 + $0x40] sm:$0xff]   ;;  %v3276_v2 = vld [vmem:[#allocation8 + $0x218] sm:$0xff]  }
 0x183   : > { %v4034_v58 = vsel %vm3985_vm6, %v2586_v47, %v1119_v49  ;;  %v2589_v62 = vcombine.low %v973_v44, %v4040_v59  ;;  %v1104_v1 = vrot.slane %v1102_v56, 4  ;;  %v1107_v5 = vrot.slane %v1105_v57, 5  ;;  %v3255_v47 = vld [vmem:[#allocation8 + $0x8] sm:$0xff]   ;;  %v3259_v49 = vld [vmem:[#allocation8 + $0x80] sm:$0xff]   ;;  %v3261_v56 = vld [vmem:[#allocation8 + $0x1f8] sm:$0xff]  }
 0x184   : > { %v2592_v61 = vcombine.low %v4026_v53, %v4034_v58  ;;  %v1113_v22 = vrot.slane %v1111_v6, 5  ;;  %v2644_v24 = vcombine.low %v4034_v58, %v4056_v20  ;;  %v2588_v28 = vcombine.low %v3992_v10, %v4014_v37  ;;  %v3258_v51 = vld [vmem:[#allocation8] sm:$0xff]   ;;  %v3277_v6 = vld [vmem:[#allocation8 + $0x1d0] sm:$0xff]   ;;  %v3282_v11 = vld [vmem:[#allocation8 + $0x208] sm:$0xff]  }
 0x185   : > { %1361 = vmatprep.mubr.bf16.mxu1 %v2589_v62  ;;  %v1108_v15 = vor.u32 %v1107_v5, %v1104_v1  ;;  %v2585_v57 = vcombine.low %v4005_v18, %v4026_v53  ;;  %v2583_v62 = vcombine.low %v4040_v59, %v1001_v25  ;;  %v3270_v1 = vld [vmem:[#allocation8 + $0x228] sm:$0xff]   ;;  %v3273_v59 = vld [vmem:[#allocation8 + $0x220] sm:$0xff]   ;;  %v3279_v5 = vld [vmem:[#allocation8 + $0x210] sm:$0xff]   ;;  %v1673_v10 = vshll.u32 %v4049_v7, 16 }
 0x186   : > { %2963 = vmatmul.mubr.bf16.vlgmr.msra.gmra.mxu0 %v2592_v61  ;;  %1362 = vmatmul.mubr.bf16.vlgmr.msra.gmra.mxu1 %v2587_v48  ;;  %v3264_v61 = vld [vmem:[#allocation8 + $0x1f0] sm:$0xff]   ;;  %v3268_v18 = vld [vmem:[#allocation8 + $0x1e8] sm:$0xff]   ;;  %v3272_v46 = vld [vmem:[#allocation8 + $0x1a0] sm:$0xff]   ;;  %v1672_v14 = vrot.slane %v1670_v8, 4 }
 0x187   : > { %2967 = vmatpush3.bf16.msra.mxu0 %v3854_v39  ;;  %2823 = vmatpush3.bf16.msra.mxu1 %v3236_v63  ;;  %v1109_v13 = vrot.slane %v1108_v15, 4  ;;  %v959_v39 = vsel %vm4017_vm7, %v954_v12, %v958_v16  ;;  %v3266_v63 = vld [vmem:[#allocation8 + $0x230] sm:$0xff]   ;;  %v3269_v53 = vld [vmem:[#allocation8 + $0x1a8] sm:$0xff]   ;;  %v3274_v48 = vld [vmem:[#allocation8 + $0x1d8] sm:$0xff]   ;;  %v1675_v15 = vrot.slane %v1673_v10, 5 }
 0x188   : > { %2982 = vmatprep.mubr.bf16.mxu0 %v2584_v9  ;;  %2824 = vmatprep.subr.bf16.mxu1 %v3238_v0  ;;  %v2582_v31 = vcombine.low %v959_v39, %v973_v44  ;;  %v3262_v44 = vld [vmem:[#allocation8 + $0x1b8] sm:$0xff]   ;;  %v3265_v0 = vld [vmem:[#allocation8 + $0x1b0] sm:$0xff]   ;;  %v3280_v12 = vld [vmem:[#allocation8 + $0x1c8] sm:$0xff]  }
 0x189   : > { %2968 = vmatprep.subr.bf16.mxu0 %v3240_v3  ;;  %v4066_v4 = vsel %vm4017_vm7, %v1109_v13, %v1113_v22  ;;  %v3278_v9 = vld [vmem:[#allocation8 + $0x190] sm:$0xff]   ;;  %v3281_v16 = vld [vmem:[#allocation8 + $0x188] sm:$0xff]   ;;  %v1676_v21 = vor.u32 %v1675_v15, %v1672_v14  ;;  %v1679_v13 = vshll.u32 %v4022_v52, 16  ;;  %v3284_v22 = vld [vmem:[#allocation8 + $0x180] sm:$0xff]   ;;  %v2642_v52 = vcombine.low %v4014_v37, %v4049_v7 }
 0x18a   : > { %v2590_v26 = vcombine.low %v1001_v25, %v4066_v4  ;;  %v3291_v58 = vld [vmem:[#allocation9 + $0x30] sm:$0xff]   ;;  %v3292_v20 = vld [vmem:[#allocation11 + $0x20] sm:$0xff]   ;;  %v3293_v37 = vld [vmem:[#allocation9 + $0x28] sm:$0xff]  }
 0x18b   : > { %2969 = vmatpush3.bf16.msra.mxu0 %v3240_v3  ;;  %2825 = vmatpush3.bf16.msra.mxu1 %v3239_v17  ;;  %v3275_v3 = vld [vmem:[#allocation8 + $0x198] sm:$0xff]   ;;  %v3285_v17 = vld [vmem:[#allocation8 + $0x200] sm:$0xff]   ;;  %v1681_v39 = vrot.slane %v1679_v13, 5 }
 0x18c   : > { %2970 = vmatprep.subr.bf16.mxu0 %v3244_v19  ;;  %2826 = vmatprep.subr.bf16.mxu1 %v3241_v23  ;;  %v1677_v23 = vrot.slane %v1676_v21, 4  ;;  %v3294_v7 = vld [vmem:[#allocation11 + $0x18] sm:$0xff]   ;;  %v3302_v21 = vld [vmem:[#allocation9] sm:$0xff]  }
 0x18d   : > { %1369 = vmatprep.mubr.bf16.mxu1 %v2590_v26 }
 0x18e   : > { %1370 = vmatmul.mubr.bf16.gmra.mxu1 %v2588_v28  ;;  %v1682_v25 = vsel %vm4017_vm7, %v1677_v23, %v1681_v39  ;;  %v3288_v28 = vld [vmem:[#allocation11 + $0x30] sm:$0xff]  }
 0x18f   : > { %2971 = vmatpush3.bf16.msra.mxu0 %v3244_v19  ;;  %2827 = vmatpush3.bf16.msra.mxu1 %v3243_v27  ;;  %v3283_v19 = vld [vmem:[#allocation8 + $0x1c0] sm:$0xff]   ;;  %v2643_v26 = vcombine.low %v4066_v4, %v1682_v25  ;;  %v3287_v27 = vld [vmem:[#allocation11 + $0x38] sm:$0xff]   ;;  %v3296_v4 = vld [vmem:[#allocation11 + $0x10] sm:$0xff]  }
 0x190   : > { %1603 = vmatprep.mubr.bf16.mxu1 %v2582_v31  ;;  %2828 = vmatprep.subr.bf16.mxu1 %v3245_v29  ;;  %v3289_v29 = vld [vmem:[#allocation9 + $0x38] sm:$0xff]  }
 0x191   : > { %2972 = vmatprep.subr.bf16.mxu0 %v3247_v30  ;;  %v2683_v31 = vld [vmem:[%s3846_s26 + $0x8] sm:$0xf] }
 0x193   : > { %2973 = vmatpush3.bf16.msra.mxu0 %v3247_v30  ;;  %2829 = vmatpush3.bf16.msra.mxu1 %v3246_v32  ;;  %v3290_v30 = vld [vmem:[#allocation11 + $0x28] sm:$0xff]   ;;  %v2685_v32 = vld [vmem:[%s3846_s26 + $0x10] sm:$0xf] }
 0x194   : > { %2974 = vmatprep.subr.bf16.mxu0 %v3250_v33  ;;  %2830 = vmatprep.subr.bf16.mxu1 %v3248_v34  ;;  %v2169_v34 = vshrl.u32 %v2683_v31, 16 }
 0x197   : > { %2975 = vmatpush3.bf16.msra.mxu0 %v3250_v33  ;;  %2831 = vmatpush3.bf16.msra.mxu1 %v3249_v35  ;;  %v3297_v33 = vld [vmem:[#allocation9 + $0x18] sm:$0xff]   ;;  %v2172_v35 = vshll.u32 %v2683_v31, 16 }
 0x198   : > { %2976 = vmatprep.subr.bf16.mxu0 %v3253_v36  ;;  %2832 = vmatprep.subr.bf16.mxu1 %v3251_v38  ;;  %v2186_v38 = vshll.u32 %v2685_v32, 16 }
 0x19b   : > { %2977 = vmatpush3.bf16.msra.mxu0 %v3253_v36  ;;  %2833 = vmatpush3.bf16.msra.mxu1 %v3252_v41  ;;  %v2183_v36 = vshrl.u32 %v2685_v32, 16  ;;  %v2687_v41 = vld [vmem:[%s3846_s26 + $0x18] sm:$0xf] }
 0x19c   : > { %2978 = vmatprep.subr.bf16.mxu0 %v3256_v42  ;;  %2834 = vmatprep.subr.bf16.mxu1 %v3254_v45  ;;  %v3298_v45 = vld [vmem:[#allocation11 + $0x8] sm:$0xff]  }
 0x19f   : > { %2979 = vmatpush3.bf16.msra.mxu0 %v3256_v42  ;;  %2835 = vmatpush3.bf16.msra.mxu1 %v3255_v47  ;;  %v2689_v42 = vld [vmem:[%s3846_s26 + $0x20] sm:$0xf]  ;;  %v2171_v47 = vrot.slane %v2169_v34, 4 }
 0x1a0   : > { %2980 = vmatprep.subr.bf16.mxu0 %v3259_v49  ;;  %2836 = vmatprep.subr.bf16.mxu1 %v3257_v50  ;;  %v2185_v50 = vrot.slane %v2183_v36, 4  ;;  %v2214_v10 = vshll.u32 %v2689_v42, 16 }
 0x1a3   : > { %2981 = vmatpush3.bf16.msra.mxu0 %v3259_v49  ;;  %2837 = vmatpush3.bf16.msra.mxu1 %v3258_v51  ;;  %v2174_v49 = vrot.slane %v2172_v35, 5  ;;  %v2188_v51 = vrot.slane %v2186_v38, 5 }
 0x1a4   : > { %2986 = vmatprep.subr.bf16.mxu0 %v3263_v54  ;;  %2860 = vmatprep.subr.bf16.mxu1 %v3261_v56  ;;  %v2686_v56 = vld [vmem:[%s3846_s26 + $0x14] sm:$0x1] }
 0x1a6   : > { %2983 = vmatmul.mubr.bf16.vlgmr.msra.gmra.mxu0 %v2585_v57  ;;  %1604 = vmatmul.mubr.bf16.vlgmr.msra.gmra.mxu1 %v2580_v60  ;;  %v3299_v60 = vld [vmem:[#allocation9 + $0x10] sm:$0xff]  }
 0x1a7   : > { %2987 = vmatpush3.bf16.msra.mxu0 %v3263_v54  ;;  %1611 = vmatprep.mubr.bf16.mxu1 %v2583_v62  ;;  %v2684_v54 = vld [vmem:[%s3846_s26 + $0xc] sm:$0x1] }
 0x1a8   : > { %2861 = vmatpush3.bf16.msra.mxu1 %v3262_v44  ;;  %3002 = vmatprep.mubr.bf16.mxu0 %v2585_v57  ;;  %v2197_v57 = vshrl.u32 %v2687_v41, 16  ;;  %v2200_v44 = vshll.u32 %v2687_v41, 16 }
 0x1a9   : > { %2862 = vmatprep.subr.bf16.mxu1 %v3264_v61  ;;  %2988 = vmatprep.subr.bf16.mxu0 %v3266_v63  ;;  %v2175_v61 = vor.u32 %v2174_v49, %v2171_v47 }
 0x1ab   : > { %2989 = vmatpush3.bf16.msra.mxu0 %v3266_v63  ;;  %v2189_v63 = vor.u32 %v2188_v51, %v2185_v50 }
 0x1ac   : > { %2863 = vmatpush3.bf16.msra.mxu1 %v3265_v0  ;;  %2990 = vmatprep.subr.bf16.mxu0 %v3270_v1  ;;  %v2192_v0 = vshll.u32 %v2686_v56, 16 }
 0x1ad   : > { %2864 = vmatprep.subr.bf16.mxu1 %v3268_v18  ;;  %v2690_v18 = vld [vmem:[%s3846_s26 + $0x24] sm:$0x1] }
 0x1ae   : > { %1612 = vmatmul.mubr.bf16.gmra.mxu1 %v2581_v55  ;;  %v2220_v14 = vshll.u32 %v2690_v18, 16 }
 0x1af   : > { %2991 = vmatpush3.bf16.msra.mxu0 %v3270_v1  ;;  %1923 = vmatprep.mubr.bf16.mxu1 %v2583_v62  ;;  %v2178_v62 = vshll.u32 %v2684_v54, 16  ;;  %v2688_v1 = vld [vmem:[%s3846_s26 + $0x1c] sm:$0x1] }
 0x1b0   : > { %2865 = vmatpush3.bf16.msra.mxu1 %v3269_v53  ;;  %2992 = vmatprep.subr.bf16.mxu0 %v3273_v59  ;;  %v2199_v53 = vrot.slane %v2197_v57, 4 }
 0x1b1   : > { %2866 = vmatprep.subr.bf16.mxu1 %v3271_v43  ;;  %v2206_v43 = vshll.u32 %v2688_v1, 16 }
 0x1b3   : > { %2993 = vmatpush3.bf16.msra.mxu0 %v3273_v59  ;;  %v2211_v59 = vshrl.u32 %v2689_v42, 16 }
 0x1b4   : > { %2867 = vmatpush3.bf16.msra.mxu1 %v3272_v46  ;;  %2994 = vmatprep.subr.bf16.mxu0 %v3276_v2  ;;  %v3300_v46 = vld [vmem:[#allocation11] sm:$0xff]  }
 0x1b5   : > { %2868 = vmatprep.subr.bf16.mxu1 %v3274_v48  ;;  %v2180_v48 = vrot.slane %v2178_v62, 5  ;;  %v2213_v8 = vrot.slane %v2211_v59, 4 }
 0x1b7   : > { %2995 = vmatpush3.bf16.msra.mxu0 %v3276_v2  ;;  %v2176_v2 = vrot.slane %v2175_v61, 4 }
 0x1b8   : > { %2869 = vmatpush3.bf16.msra.mxu1 %v3275_v3  ;;  %2996 = vmatprep.subr.bf16.mxu0 %v3279_v5  ;;  %v2190_v3 = vrot.slane %v2189_v63, 4 }
 0x1b9   : > { %2870 = vmatprep.subr.bf16.mxu1 %v3277_v6 }
 0x1bb   : > { %2997 = vmatpush3.bf16.msra.mxu0 %v3279_v5  ;;  %v2194_v5 = vrot.slane %v2192_v0, 5 }
 0x1bc   : > { %2871 = vmatpush3.bf16.msra.mxu1 %v3278_v9  ;;  %2998 = vmatprep.subr.bf16.mxu0 %v3282_v11  ;;  %v3301_v9 = vld [vmem:[#allocation9 + $0x8] sm:$0xff]  }
 0x1bd   : > { %2872 = vmatprep.subr.bf16.mxu1 %v3280_v12  ;;  %v2195_v12 = vsel %vm4017_vm7, %v2190_v3, %v2194_v5  ;;  %v2669_v3 = vld [vmem:[%s4203_s5] ss:$0 sm:$0xff] }
 0x1bf   : > { %2999 = vmatpush3.bf16.msra.mxu0 %v3282_v11  ;;  %v2181_v11 = vsel %vm4017_vm7, %v2176_v2, %v2180_v48 }
 0x1c0   : > { %2873 = vmatpush3.bf16.msra.mxu1 %v3281_v16  ;;  %3000 = vmatprep.subr.bf16.mxu0 %v3285_v17  ;;  %v2691_v15 = vcombine.low %v2181_v11, %v2195_v12 }
 0x1c1   : > { %2874 = vmatprep.subr.bf16.mxu1 %v3283_v19  ;;  %v2216_v19 = vrot.slane %v2214_v10, 5 }
 0x1c3   : > { %3001 = vmatpush3.bf16.msra.mxu0 %v3285_v17  ;;  %v2208_v17 = vrot.slane %v2206_v43, 5  ;;  %v2217_v13 = vor.u32 %v2216_v19, %v2213_v8 }
 0x1c4   : > { %2875 = vmatpush3.bf16.msra.mxu1 %v3284_v22  ;;  %3026 = vmatprep.subr.bf16.mxu0 %v3287_v27  ;;  %v2222_v22 = vrot.slane %v2220_v14, 5 }
 0x1c5   : > { %3006 = vmatprep.subr.bf16.mxu1 %v3289_v29  ;;  %v2218_v39 = vrot.slane %v2217_v13, 4  ;;  %v2670_v13 = vld [vmem:[%s4270_s10] ss:$0 sm:$0xff]  ;;  %s2705_s10 = sshll.u32 %s4276_s13, 3 }
 0x1c6   : > { %3003 = vmatmul.mubr.bf16.vlgmr.msra.gmra.mxu0 %v2644_v24  ;;  %v3295_v24 = vld [vmem:[#allocation9 + $0x20] sm:$0xff]   ;;  %s2396_s19 = sadd.s32 %s2705_s10, %s2545_s21  ;;  %s4138_s21 = scalar_lea.sflag [#allocation5], %s528_s8 }
 0x1c7   : > { %1924 = vmatmul.mubr.bf16.vlgmr.msra.gmra.mxu1 %v2581_v55  ;;  %3027 = vmatpush3.bf16.msra.mxu0 %v3287_v27  ;;  %v2202_v55 = vrot.slane %v2200_v44, 5  ;;  %v2223_v25 = vsel %vm4017_vm7, %v2218_v39, %v2222_v22 }
 0x1c8   : > { %1931 = vmatprep.mubr.bf16.mxu1 %v2643_v26  ;;  %3007 = vmatpush3.bf16.msra.mxu1 %v3289_v29 }
 0x1c9   : > { %3028 = vmatprep.subr.bf16.mxu0 %v3288_v28  ;;  %3008 = vmatprep.subr.bf16.mxu1 %v3291_v58  ;;  %v2203_v6 = vor.u32 %v2202_v55, %v2199_v53 }
 0x1ca   : > { %3042 = vmatprep.mubr.bf16.mxu0 %v2691_v15 }
 0x1cb   : > { %3029 = vmatpush3.bf16.msra.mxu0 %v3288_v28  ;;  %v2204_v16 = vrot.slane %v2203_v6, 4 }
 0x1cc   : > { %3030 = vmatprep.subr.bf16.mxu0 %v3290_v30  ;;  %3009 = vmatpush3.bf16.msra.mxu1 %v3291_v58 }
 0x1cd   : > { %3010 = vmatprep.subr.bf16.mxu1 %v3293_v37  ;;  %v2209_v23 = vsel %vm4017_vm7, %v2204_v16, %v2208_v17 }
 0x1ce   : > { %v2692_v26 = vcombine.low %v2209_v23, %v2223_v25 }
 0x1cf   : > { %1932 = vmatmul.mubr.bf16.gmra.mxu1 %v2642_v52  ;;  %3031 = vmatpush3.bf16.msra.mxu0 %v3290_v30 }
 0x1d0   : > { %3032 = vmatprep.subr.bf16.mxu0 %v3292_v20  ;;  %3011 = vmatpush3.bf16.msra.mxu1 %v3293_v37 }
 0x1d1   : > { %3012 = vmatprep.subr.bf16.mxu1 %v3295_v24 }
 0x1d3   : > { %3033 = vmatpush3.bf16.msra.mxu0 %v3292_v20 }
 0x1d4   : > { %3034 = vmatprep.subr.bf16.mxu0 %v3294_v7  ;;  %3013 = vmatpush3.bf16.msra.mxu1 %v3295_v24 }
 0x1d5   : > { %3014 = vmatprep.subr.bf16.mxu1 %v3297_v33 }
 0x1d7   : > { %3035 = vmatpush3.bf16.msra.mxu0 %v3294_v7 }
 0x1d8   : > { %3036 = vmatprep.subr.bf16.mxu0 %v3296_v4  ;;  %3015 = vmatpush3.bf16.msra.mxu1 %v3297_v33 }
 0x1d9   : > { %3016 = vmatprep.subr.bf16.mxu1 %v3299_v60 }
 0x1db   : > { %3037 = vmatpush3.bf16.msra.mxu0 %v3296_v4 }
 0x1dc   : > { %3038 = vmatprep.subr.bf16.mxu0 %v3298_v45  ;;  %3017 = vmatpush3.bf16.msra.mxu1 %v3299_v60 }
 0x1dd   : > { %3018 = vmatprep.subr.bf16.mxu1 %v3301_v9 }
 0x1df   : > { %3039 = vmatpush3.bf16.msra.mxu0 %v3298_v45 }
 0x1e0   : > { %3040 = vmatprep.subr.bf16.mxu0 %v3300_v46  ;;  %3019 = vmatpush3.bf16.msra.mxu1 %v3301_v9 }
 0x1e1   : > { %3020 = vmatprep.subr.bf16.mxu1 %v3302_v21 }
 0x1e3   : > { %3041 = vmatpush3.bf16.msra.mxu0 %v3300_v46 }
 0x1e4   : > { %3021 = vmatpush3.bf16.msra.mxu1 %v3302_v21 }
 0x1e6   : > { %3043 = vmatmul.mubr.bf16.vlgmr.msra.gmra.mxu0 %v2692_v26 }
 0x246   : > { %v2800_v52 = vpop.f32.mrf.mxu1  ;;  %v2964_v24 = vpop.f32.mrf.mxu0 }
 0x248   : > { %v2801_v27 = vpop.f32.mrf.mxu1  ;;  %v1412_v31 = vpop.f32.mrf.mxu0 }
 0x249   : > { %v2802_v47 = vadd.f32 %v2801_v27, %v2800_v52 }
 0x24a   : > { %v2803_v28 = vpop.f32.mrf.mxu1  ;;  %v2965_v33 = vpop.f32.mrf.mxu0 }
 0x24b   : > { %v1413_v54 = vadd.f32 %v2802_v47, %v1412_v31 }
 0x24c   : > { %v2804_v29 = vpop.f32.mrf.mxu1  ;;  %v1415_v40 = vpop.f32.mrf.mxu0 }
 0x24d   : > { %v2805_v56 = vadd.f32 %v2804_v29, %v2803_v28 }
 0x24e   : > { %v2806_v30 = vpop.f32.mrf.mxu1 }
 0x24f   : > { %v1416_v0 = vadd.f32 %v2805_v56, %v1415_v40 }
 0x250   : > { %v2807_v58 = vpop.f32.mrf.mxu1 }
 0x251   : > { %v2808_v1 = vadd.f32 %v2807_v58, %v2806_v30 }
 0x252   : > { %v2809_v20 = vpop.f32.mrf.mxu1 }
 0x253   : > { %v1421_v8 = vadd.f32 %v2964_v24, %v2808_v1 }
 0x254   : > { %v2810_v37 = vpop.f32.mrf.mxu1 }
 0x255   : > { %v2811_v48 = vadd.f32 %v2810_v37, %v2809_v20 }
 0x257   : > { %v1424_v19 = vadd.f32 %v2965_v33, %v2811_v48 }
 0x266   : > { %v2838_v7 = vpop.f32.mrf.mxu1  ;;  %v2984_v35 = vpop.f32.mrf.mxu0 }
 0x268   : > { %v2839_v4 = vpop.f32.mrf.mxu1  ;;  %v1654_v38 = vpop.f32.mrf.mxu0 }
 0x269   : > { %v2840_v49 = vadd.f32 %v2839_v4, %v2838_v7 }
 0x26a   : > { %v2841_v32 = vpop.f32.mrf.mxu1  ;;  %v2985_v42 = vpop.f32.mrf.mxu0 }
 0x26b   : > { %v1606_v60 = vadd.f32 %v2840_v49, %v1413_v54  ;;  %v2702_v54 = vld [vmem:[%s4274_s28] ss:$0 sm:$0xff]  ;;  %s3435_s28 = scalar_lea.vmem %s4134_s11, 256 }
 0x26c   : > { %v2842_v34 = vpop.f32.mrf.mxu1  ;;  %v1657_v50 = vpop.f32.mrf.mxu0  ;;  %p3436_p1 = scmp.ne.s32.totalorder %s4134_s11, %s3435_s28 }
 0x26d   : > { %v2843_v61 = vadd.f32 %v2842_v34, %v2841_v32  ;;  %v1655_v43 = vadd.f32 %v1654_v38, %v1606_v60 }
 0x26e   : > { %v2844_v36 = vpop.f32.mrf.mxu1  ;;  %p3437_p4 = pnand %p3436_p1, %p3715_p6 }
 0x26f   : > { %v1609_v59 = vadd.f32 %v2843_v61, %v1416_v0 }
 0x270   : > { %v2845_v41 = vpop.f32.mrf.mxu1  ;;  %p3438_p11 = pneg %p3437_p4 }
 0x271   : > { %v2846_v46 = vadd.f32 %v2845_v41, %v2844_v36  ;;  %v1658_v14 = vadd.f32 %v1657_v50, %v1609_v59  ;;  %v2679_v50 = vld [vmem:[%s4273_s6] ss:$0 sm:$0xff] }
 0x272   : > { %v2847_v45 = vpop.f32.mrf.mxu1 }
 0x273   : > { %v1614_v15 = vadd.f32 %v2846_v46, %v1421_v8 }
 0x274   : > { %v2848_v51 = vpop.f32.mrf.mxu1 }
 0x275   : > { %v2849_v11 = vadd.f32 %v2848_v51, %v2847_v45  ;;  %v1663_v26 = vadd.f32 %v2984_v35, %v1614_v15 }
 0x277   : > { %v1617_v39 = vadd.f32 %v2849_v11, %v1424_v19 }
 0x279   : > { %v1666_v37 = vadd.f32 %v2985_v42, %v1617_v39  ;;  %v2701_v42 = vld [vmem:[%s4272_s12] ss:$0 sm:$0xff]  ;;  %s2706_s12 = sshll.u32 %s2396_s19, 6 }
 0x27a   : > { %s4132_s14 = scalar_lea.hbm %s4278_s22, %s2706_s12 }
 0x286   : > { %v3004_v57 = vpop.f32.mrf.mxu0 }
 0x287   : > { %v2876_v44 = vpop.f32.mrf.mxu1 }
 0x288   : > { %v1974_v62 = vpop.f32.mrf.mxu0 }
 0x289   : > { %v2877_v63 = vpop.f32.mrf.mxu1 }
 0x28a   : > { %v2878_v18 = vadd.f32 %v2877_v63, %v2876_v44  ;;  %v3005_v53 = vpop.f32.mrf.mxu0 }
 0x28b   : > { %v2879_v55 = vpop.f32.mrf.mxu1 }
 0x28c   : > { %v1975_v2 = vadd.f32 %v2878_v18, %v1974_v62  ;;  %v1977_v6 = vpop.f32.mrf.mxu0 }
 0x28d   : > { %v2880_v5 = vpop.f32.mrf.mxu1 }
 0x28e   : > { %v1989_v10 = vadd.f32 %v1975_v2, %v1655_v43  ;;  %v2881_v9 = vadd.f32 %v2880_v5, %v2879_v55 }
 0x28f   : > { %v2882_v12 = vpop.f32.mrf.mxu1 }
 0x290   : > { %v2000_v16 = vmul.f32 %v2669_v3, %v1989_v10  ;;  %v1978_v17 = vadd.f32 %v2881_v9, %v1977_v6 }
 0x291   : > { %v2883_v21 = vpop.f32.mrf.mxu1 }
 0x292   : > { %v1990_v22 = vadd.f32 %v1978_v17, %v1658_v14  ;;  %v2884_v23 = vadd.f32 %v2883_v21, %v2882_v12  ;;  %v2011_v28 = vadd.f32 %v2670_v13, %v2000_v16 }
 0x293   : > { %v2885_v25 = vpop.f32.mrf.mxu1 }
 0x294   : > { %v2001_v52 = vmul.f32 %v2669_v3, %v1990_v22  ;;  %v1983_v27 = vadd.f32 %v3004_v57, %v2884_v23  ;;  %v2015_v4 = vmax.f32 %v2011_v28, 0.0  ;;  %v2680_v57 = vld [vmem:[%s4275_s20] ss:$0 sm:$0xff]  ;;  %s3441_s20 = scalar_lea.vmem %s3440_s24, 512 }
 0x295   : > { %v2886_v29 = vpop.f32.mrf.mxu1  ;;  %p3443_p8 = scmp.lt.s32.totalorder %s3441_s20, %s3435_s28 }
 0x296   : > { %v1991_v30 = vadd.f32 %v1983_v27, %v1663_v26  ;;  %v2887_v58 = vadd.f32 %v2886_v29, %v2885_v25  ;;  %v2012_v20 = vadd.f32 %v2670_v13, %v2001_v52 }
 0x297   : > { %p3444_p9 = por %p3443_p8, %p3442_p13 }
 0x298   : > { %v2002_v7 = vmul.f32 %v2669_v3, %v1991_v30  ;;  %v1986_v24 = vadd.f32 %v3005_v53, %v2887_v58  ;;  %v2016_v31 = vmax.f32 %v2012_v20, 0.0 }
 0x299   : > { %p3445_p10 = pnand %p3444_p9, %p3438_p11 }
 0x29a   : > { %v1992_v32 = vadd.f32 %v1986_v24, %v1666_v37  ;;  %v2019_v33 = vpack.c.bf16 %v2016_v31, %v2015_v4  ;;  %v2013_v34 = vadd.f32 %v2670_v13, %v2002_v7 }
 0x29c   : > { %v2003_v40 = vmul.f32 %v2669_v3, %v1992_v32  ;;  %3022 = vmatprep.mubr.bf16.mxu1 %v2019_v33  ;;  %v2017_v38 = vmax.f32 %v2013_v34, 0.0 }
 0x29e   : > { %v2014_v36 = vadd.f32 %v2670_v13, %v2003_v40 }
 0x2a0   : > { %v2018_v35 = vmax.f32 %v2014_v36, 0.0 }
 0x2a2   : > { %v2020_v41 = vpack.c.bf16 %v2018_v35, %v2017_v38 }
 0x2a4   : > { %3023 = vmatmul.mubr.bf16.vlgmr.msra.gmra.mxu1 %v2020_v41 }
 0x2a6   : > { %v3044_v45 = vpop.f32.mrf.mxu0 }
 0x2a7   : > { %v2354_v51 = vmul.f32 %v3044_v45, %v2701_v42 }
 0x2a8   : > { %v2330_v47 = vpop.f32.mrf.mxu0 }
 0x2a9   : > { %v2352_v60 = vmul.f32 %v2701_v42, %v2330_v47  ;;  %v2365_v63 = vadd.f32 %v2702_v54, %v2354_v51 }
 0x2aa   : > { %v3045_v49 = vpop.f32.mrf.mxu0 }
 0x2ab   : > { %v2355_v0 = vmul.f32 %v3045_v49, %v2701_v42  ;;  %v2363_v46 = vadd.f32 %v2702_v54, %v2352_v60 }
 0x2ac   : > { %v2333_v61 = vpop.f32.mrf.mxu0 }
 0x2ad   : > { %v2353_v55 = vmul.f32 %v2701_v42, %v2333_v61  ;;  %v2366_v48 = vadd.f32 %v2702_v54, %v2355_v0 }
 0x2af   : > { %v2364_v8 = vadd.f32 %v2702_v54, %v2353_v55 }
 0x364   : > { %v3024_v56 = vpop.f32.mrf.mxu1 }
 0x365   : > { %v2143_v44 = vmul.f32 %v3024_v56, %v2679_v50 }
 0x366   : > { %v2119_v62 = vpop.f32.mrf.mxu1 }
 0x367   : > { %v2154_v1 = vadd.f32 %v2680_v57, %v2143_v44  ;;  %v2141_v18 = vmul.f32 %v2679_v50, %v2119_v62 }
 0x368   : > { %v3025_v53 = vpop.f32.mrf.mxu1 }
 0x369   : > { %v2152_v43 = vadd.f32 %v2680_v57, %v2141_v18  ;;  %v2144_v59 = vmul.f32 %v3025_v53, %v2679_v50  ;;  %v2369_v3 = vadd.f32 %v2365_v63, %v2154_v1 }
 0x36a   : > { %v2122_v2 = vpop.f32.mrf.mxu1 }
 0x36b   : > { %v2155_v5 = vadd.f32 %v2680_v57, %v2144_v59  ;;  %v2142_v6 = vmul.f32 %v2679_v50, %v2122_v2  ;;  %v2367_v10 = vadd.f32 %v2363_v46, %v2152_v43  ;;  %v2373_v12 = vmax.f32 %v2369_v3, 0.0 }
 0x36d   : > { %v2370_v9 = vadd.f32 %v2366_v48, %v2155_v5  ;;  %v2153_v11 = vadd.f32 %v2680_v57, %v2142_v6  ;;  %v2371_v16 = vmax.f32 %v2367_v10, 0.0 }
 0x36f   : > { %v2374_v14 = vmax.f32 %v2370_v9, 0.0  ;;  %v2368_v15 = vadd.f32 %v2364_v8, %v2153_v11 }
 0x371   : > { %v2762_v17 = vpack.c.bf16 %v2374_v14, %v2373_v12  ;;  %v2372_v19 = vmax.f32 %v2368_v15, 0.0 }
 0x373   : > { %2769 = vst [vmem:[%s530_s23 + $0x8] sm:$0xff] %v2762_v17   ;;  %v2757_v21 = vpack.c.bf16 %v2372_v19, %v2371_v16 }
 0x375   : > { %2758 = vst [vmem:[%s530_s23] sm:$0xff] %v2757_v21  }
 0x376   : > { %3448 = shalt.err (!%p3445_p10)
}
 0x377   : > { %s3449_s16 = scalar_lea.hbm %s4132_s14, 256  ;;  %s3453_s7 = scalar_lea.hbm %s4278_s22, 1024 }
 0x378   : > { %p3450_p0 = scmp.ne.s32.totalorder %s4132_s14, %s3449_s16  ;;  %p3454_p5 = scmp.lt.s32.totalorder %s4132_s14, %s4278_s22 }
 0x379   : > { %p3455_p7 = scmp.lt.s32.totalorder %s3453_s7, %s3449_s16 }
 0x37a   : > { %p3451_p12 = pnand %p3450_p0, %p3715_p6 }
 0x37b   : > { %p3456_p3 = por %p3455_p7, %p3454_p5 }
 0x37c   : > { %p3452_p2 = pneg %p3451_p12 }
 0x37e   : > { %p3457_p1 = pnand %p3456_p3, %p3452_p2 }
 0x380   : > { %3460 = shalt.err (!%p3457_p1)
}
 0x381   : > { %s3573_s12 = smov 64   ;;  %s3574_s23 = smov 4  }
 0x382   : > { %3067 = dma.vmem_to_hbm [thread:$0]  (%p3715_p6), %s4134_s11, 256, %s4132_s14, %s4138_s21, %s3573_s12, %s3573_s12, %s3574_s23  }
 0x383 PF: > { %s4279_s6 = sld [smem:[#allocation17_spill]]  ;;  %p3099_p4 = scmp.ge.s32.totalorder %s3563_s18, 2 }
 0x384   : > { %s4280_s26 = sld [smem:[#allocation22_spill]] }
 0x389   : > { %s2414_s28 = sand.u32 1, %s4279_s6  }
 0x38a   : > { %p4281_p11 = scmp.ne.s32.totalorder %s4280_s26, 0  ;;  %s2415_s25 = scalar_lea.sflag [#allocation5], %s2414_s28 }
 0x38c   : > { %p3087_p13 = pnand %p3099_p4, %p4281_p11 }
 0x38e   : > { %p3088_p8 = pneg %p3087_p13 }
 0x390   : > { %3518 = dma.done.wait (%p3088_p8), %s2415_s25, 256  }
 0x391   : > { %3520 = vsyncadd (%p3088_p8), %s2415_s25, 4294967040  ;;  %s31_s18 = sadd.s32 1, %s3563_s18   ;;  %s4282_s25 = sld [smem:[#allocation18_spill]] }
 0x392   : > { %p28_p9 = scmp.ge.s32.totalorder %s31_s18, 6   ;;  %s4283_s14 = sld [smem:[#allocation20_spill]] }
 0x393   : > { %s4284_s16 = sld [smem:[#allocation23_spill]]  ;;  %s4285_s26 = smov %s3531_s27 }
 0x394   : > { %s4286_s27 = smov %s3810_s4  ;;  %s4287_s28 = smov %s3539_s29 }
 0x395   : > { %s4288_s29 = smov %s3543_s30  ;;  %s4289_s30 = smov %s3807_s15 }
 0x396   : > { %s4290_s15 = smov %s3559_s17  ;;  %s4291_s17 = smov %s4297_s9 }
 0x397   :  { %30 = sbr.rel (!%p28_p9) target bundleno = 22 (0x16), region = 137 }
 0x39c   :  { %2420 = vsyncpa [#allocation4], 1 }
 0x39d   :  { %2422 = vsyncpa [#allocation4 + $0x1], 1 }
 0x39e   :  { %2423 = vsyncpa [#allocation7], 1 }
 0x39f   :  { %2424 = vsyncpa [#allocation10], 1 }
 0x3a0   :  { %2425 = vsyncpa [#allocation5], 1 }
 0x3a1   :  { %2427 = vsyncpa [#allocation5 + $0x1], 1 }

// kernel: tpu_custom_call.1
= control target key start
LH: loop header
LB: loop body
LE: loop exit
PB: predicated region body
PF: predicated region fallthrough
CT: control target
= control target key end

     0   :  { %s4198_s0 = inlined_call_operand.hbm [shape: bf16[2,10,16,128], index: 0, kind: input, shape index: {}]   ;;  %s4199_s1 = inlined_call_operand.hbm [shape: bf16[128,128], index: 1, kind: input, shape index: {}]   ;;  %s4200_s2 = inlined_call_operand.vmem [shape: f32[1,128], index: 2, kind: input, shape index: {}]   ;;  %s4201_s3 = inlined_call_operand.vmem [shape: f32[1,128], index: 3, kind: input, shape index: {}]   ;;  %s4202_s4 = inlined_call_operand.hbm [shape: bf16[3,384,128], index: 4, kind: input, shape index: {}]   ;;  %s4203_s5 = inlined_call_operand.vmem [shape: f32[1,128], index: 5, kind: input, shape index: {}]   ;;  %s4204_s6 = inlined_call_operand.vmem [shape: f32[1,128], index: 6, kind: input, shape index: {}]   ;;  %s4205_s7 = inlined_call_operand.hbm [shape: bf16[128,128], index: 7, kind: input, shape index: {}]   ;;  %s4206_s8 = inlined_call_operand.vmem [shape: f32[1,128], index: 8, kind: input, shape index: {}]   ;;  %s4207_s9 = inlined_call_operand.vmem [shape: f32[1,128], index: 9, kind: input, shape index: {}]   ;;  %s4208_s10 = inlined_call_operand.hbm [shape: bf16[128,128], index: 10, kind: input, shape index: {}]   ;;  %s4209_s11 = inlined_call_operand.vmem [shape: f32[1,128], index: 11, kind: input, shape index: {}]   ;;  %s4210_s12 = inlined_call_operand.vmem [shape: f32[1,128], index: 12, kind: input, shape index: {}]   ;;  %s4211_s13 = inlined_call_operand.hbm [shape: bf16[2,8,8,128], index: 13, kind: output, shape index: {}]  }
   0x1   :  { %4223 = sst [smem:[#allocation24_spill]] %s4199_s1 }
   0x2   :  { %4224 = sst [smem:[#allocation25_spill]] %s4202_s4 }
   0x3   :  { %4225 = sst [smem:[#allocation26_spill]] %s4204_s6 }
   0x4   :  { %4226 = sst [smem:[#allocation27_spill]] %s4205_s7 }
   0x5   :  { %4227 = sst [smem:[#allocation28_spill]] %s4206_s8 }
   0x6   :  { %4228 = sst [smem:[#allocation29_spill]] %s4207_s9 }
   0x7   :  { %4229 = sst [smem:[#allocation30_spill]] %s4208_s10 }
   0x8   :  { %4230 = sst [smem:[#allocation31_spill]] %s4209_s11 }
   0x9   :  { %4231 = sst [smem:[#allocation32_spill]] %s4210_s12 }
   0xa   :  { %4232 = sst [smem:[#allocation33_spill]] %s4211_s13 }
   0xb   :  { %18 = vsyncpa [#allocation4], 0 }
   0xc   :  { %20 = vsyncpa [#allocation4 + $0x1], 0 }
   0xd   :  { %21 = vsyncpa [#allocation7], 0 }
   0xe   :  { %22 = vsyncpa [#allocation10], 0 }
   0xf   :  { %23 = vsyncpa [#allocation5], 0 }
  0x10   :  { %25 = vsyncpa [#allocation5 + $0x1], 0  ;;  %s3645_s25 = smov 0   ;;  %s3647_s26 = smov 0  }
  0x11   :  { %s3649_s27 = smov 0   ;;  %s3651_s28 = smov 0  }
  0x12   :  { %s3653_s29 = smov 0   ;;  %s3655_s30 = smov 0  }
  0x13   :  { %s3657_s14 = smov 0   ;;  %s3659_s15 = smov 0  }
  0x14   :  { %s3661_s16 = smov 0   ;;  %s3663_s17 = smov 0  }
  0x15   :  { %s3665_s18 = smov 0  }
  0x16 LB: > { %4233 = sst [smem:[#allocation17_spill]] %s3523_s25  ;;  %s2530_s19 = sadd.s32 4294967295, %s3563_s18   ;;  %s3563_s18 = sphi %s3665_s18, %s31_s18   ;;  %s3559_s17 = sphi %s3663_s17, %s4291_s17   ;;  %s3555_s16 = sphi %s3661_s16, %s4284_s16   ;;  %s3551_s15 = sphi %s3659_s15, %s4290_s15   ;;  %s3547_s14 = sphi %s3657_s14, %s4283_s14   ;;  %s3543_s30 = sphi %s3655_s30, %s4289_s30   ;;  %s3539_s29 = sphi %s3653_s29, %s4288_s29   ;;  %s3535_s28 = sphi %s3651_s28, %s4287_s28   ;;  %s3531_s27 = sphi %s3649_s27, %s4286_s27   ;;  %s3527_s26 = sphi %s3647_s26, %s4285_s26   ;;  %s3523_s25 = sphi %s3645_s25, %s4282_s25  }
  0x17   : > { %4234 = sst [smem:[#allocation18_spill]] %s3527_s26  ;;  %s2531_s20 = sadd.s32 4294967294, %s3563_s18  }
  0x18   : > { %4235 = sst [smem:[#allocation19_spill]] %s3551_s15  ;;  %p63_p0 = scmp.ne.s32.totalorder %s3539_s29, %s3535_s28 }
  0x19   : > { %4236 = sst [smem:[#allocation20_spill]] %s3555_s16  ;;  %p3701_p1 = scmp.eq.s32.totalorder %s2530_s19, 0 }
  0x1a   : > { %p340_p2 = scmp.ne.s32.totalorder %s3531_s27, %s3527_s26  ;;  %p341_p3 = scmp.eq.s32.totalorder %s2530_s19, 3 }
  0x1b   : > { %p3709_p4 = por %p3701_p1, %p63_p0  ;;  %p346_p5 = scmp.ne.s32.totalorder %s3527_s26, %s3523_s25 }
  0x1c   : > { %p3715_p6 = por %p341_p3, %p340_p2  ;;  %p347_p7 = scmp.eq.s32.totalorder %s2531_s20, 3 }
  0x1d   : > { %p2532_p8 = scmp.ge.s32.totalorder %s3563_s18, 1  ;;  %p354_p9 = scmp.lt.s32.totalorder %s3563_s18, 5 }
  0x1e   : > { %s4239_s23 = scalar_select %p3715_p6, 1, 0 }
  0x1f   : > { %p3721_p10 = por %p347_p7, %p346_p5  ;;  %p3725_p11 = pnand %p2532_p8, %p354_p9 }
  0x20   : > { %4240 = sst [smem:[#allocation21_spill]] %s4239_s23  ;;  %s3565_s19 = smov [#allocation6]  }
  0x21   : > { %s4241_s24 = scalar_select %p3721_p10, 1, 0 }
  0x22   : > { %s366_s13 = sshll.u32 %s3565_s19, 4  ;;  %p3069_p12 = pneg %p3725_p11  ;;  %s367_s13 = int_to_ptr.vmem [resolvable:$true] %s366_s13 }
  0x23   : > { %4242 = sst [smem:[#allocation22_spill]] %s4241_s24  ;;  %s3566_s20 = smov [#allocation9]  }
  0x24   : > { %p3733_p13 = pnand %p3069_p12, %p3701_p1  ;;  %s404_s23 = sshll.u32 %s3566_s20, 4  ;;  %s405_s23 = int_to_ptr.vmem [resolvable:$true] %s404_s23 }
  0x25   : > { %s3314_s24 = scalar_lea.vmem %s367_s13, 1024  ;;  %p3322_p7 = scmp.lt.s32.totalorder %s367_s13, %s367_s13 }
  0x26   : > { %p3305_p0 = pneg %p3733_p13  ;;  %p3315_p2 = scmp.ne.s32.totalorder %s367_s13, %s3314_s24 }
  0x27   : > { %p3323_p8 = scmp.lt.s32.totalorder %s3314_s24, %s3314_s24 }
  0x28   : > { %p3317_p3 = pnand %p3315_p2, %p3305_p0 }
  0x29   : > { %p3324_p9 = por %p3323_p8, %p3322_p7 }
  0x2a   : > { %p3318_p5 = pneg %p3317_p3 }
  0x2c   : > { %p3325_p12 = pnand %p3324_p9, %p3318_p5 }
  0x2e   : > { %3328 = shalt.err (!%p3325_p12)
}
  0x2f   : > { %s4217_s19 = smov 64   ;;  %s4218_s15 = smov 4  }
  0x30   : > { %s4245_s1 = sld [smem:[#allocation24_spill]]  ;;  %s3340_s12 = scalar_lea.vmem %s405_s23, 1024 }
  0x31   : > { %p3341_p2 = scmp.ne.s32.totalorder %s405_s23, %s3340_s12  ;;  %p3348_p5 = scmp.lt.s32.totalorder %s405_s23, %s405_s23 }
  0x32   : > { %p3349_p8 = scmp.lt.s32.totalorder %s3340_s12, %s3340_s12 }
  0x33   : > { %p3343_p3 = pnand %p3341_p2, %p3305_p0 }
  0x34   : > { %p3350_p9 = por %p3349_p8, %p3348_p5 }
  0x35   : > { %p3344_p7 = pneg %p3343_p3 }
  0x36   : > { %3072 = dma.hbm_to_vmem [thread:$0]  (!%p3733_p13), %s4245_s1, 1024, %s367_s13, [#allocation7], %s4217_s19, %s4217_s19, %s4218_s15  }
  0x37   : > { %p3351_p12 = pnand %p3350_p9, %p3344_p7 }
  0x39   : > { %3354 = shalt.err (!%p3351_p12)
}
  0x3a   : > { %s4246_s7 = sld [smem:[#allocation27_spill]]  ;;  %s3569_s9 = smov [#allocation8]  }
  0x3b   : > { %s385_s13 = sshll.u32 %s3569_s9, 4  ;;  %s3570_s20 = smov [#allocation11]   ;;  %s386_s13 = int_to_ptr.vmem [resolvable:$true] %s385_s13 }
  0x3c   : > { %s423_s1 = sshll.u32 %s3570_s20, 4  ;;  %s3366_s11 = scalar_lea.vmem %s386_s13, 9216  ;;  %s424_s1 = int_to_ptr.vmem [resolvable:$true] %s423_s1 }
  0x3d   : > { %p3367_p2 = scmp.ne.s32.totalorder %s386_s13, %s3366_s11  ;;  %p3374_p5 = scmp.lt.s32.totalorder %s386_s13, %s386_s13 }
  0x3e   : > { %p3375_p8 = scmp.lt.s32.totalorder %s3366_s11, %s3366_s11 }
  0x3f   : > { %p3369_p3 = pnand %p3367_p2, %p3305_p0 }
  0x40   : > { %3078 = dma.hbm_to_vmem [thread:$0]  (!%p3733_p13), %s4246_s7, 1024, %s405_s23, [#allocation10], %s4217_s19, %s4217_s19, %s4218_s15  }
  0x41   : > { %p3370_p7 = pneg %p3369_p3  ;;  %p3376_p9 = por %p3375_p8, %p3374_p5 }
  0x43   : > { %p3377_p12 = pnand %p3376_p9, %p3370_p7 }
  0x45   : > { %3380 = shalt.err (!%p3377_p12)
}
  0x46   : > { %s4247_s4 = sld [smem:[#allocation25_spill]]  ;;  %s3392_s23 = scalar_lea.vmem %s424_s1, 1024 }
  0x47   : > { %p3393_p10 = scmp.ne.s32.totalorder %s424_s1, %s3392_s23  ;;  %p3400_p5 = scmp.lt.s32.totalorder %s424_s1, %s424_s1 }
  0x48   : > { %p3401_p7 = scmp.lt.s32.totalorder %s3392_s23, %s3392_s23 }
  0x49   : > { %p3395_p2 = pnand %p3393_p10, %p3305_p0 }
  0x4a   : > { %p3402_p8 = por %p3401_p7, %p3400_p5 }
  0x4b   : > { %p3396_p3 = pneg %p3395_p2 }
  0x4c   : > { %3075 = dma.hbm_to_vmem [thread:$0]  (!%p3733_p13), %s4247_s4, 9216, %s386_s13, [#allocation7], %s4217_s19, %s4217_s19, %s4218_s15  }
  0x4d   : > { %p3403_p9 = pnand %p3402_p8, %p3396_p3 }
  0x4f   : > { %3406 = shalt.err (!%p3403_p9)
}
  0x50   : > { %s4248_s10 = sld [smem:[#allocation30_spill]]  ;;  %s40_s25 = sadd.s32 1, %s3555_s16 }
  0x51   : > { %p41_p10 = scmp.ge.s32.totalorder %s40_s25, 2  ;;  %s43_s9 = sadd.s32 1, %s3559_s17 }
  0x52   : > { %s50_s13 = sadd.s32 1, %s3543_s30  ;;  %p57_p0 = scmp.ne.s32.totalorder %s3543_s30, %s3539_s29 }
  0x53   : > { %s4293_s25 = smov (%p41_p10, %s40_s25), 0  ;;  %s4295_s9 = smov (!%p41_p10, %s43_s9), %s3559_s17 }
  0x54   : > { %4249 = sst [smem:[#allocation23_spill]] %s4293_s25  ;;  %p58_p12 = scmp.eq.s32.totalorder %s3563_s18, 0 }
  0x55   : > { %s326_s20 = ssub.s32 %s3555_s16, %s4293_s25  ;;  %p45_p2 = scmp.ge.s32.totalorder %s4295_s9, 2 }
  0x56   : > { %3081 = dma.hbm_to_vmem [thread:$0]  (!%p3733_p13), %s4248_s10, 1024, %s424_s1, [#allocation10], %s4217_s19, %s4217_s19, %s4218_s15  }
  0x57   : > { %s330_s8 = sadd.s32 1, %s3531_s27  ;;  %p3795_p3 = por %p58_p12, %p57_p0 }
  0x58   : > { %p3094_p13 = scmp.lt.s32.totalorder %s3563_s18, 4  ;;  %s4297_s9 = smov (%p45_p2, %s4295_s9), 0 }
  0x59   : > { %s443_s12 = sand.u32 1, %s3543_s30   ;;  %s3047_s23 = smul.u32 1280, %s3559_s17 }
  0x5a   : > { %s47_s11 = ssub.s32 %s3559_s17, %s4297_s9  ;;  %s3046_s19 = smul.u32 80, %s443_s12 }
  0x5b   : > { %p48_p5 = scmp.eq.s32.totalorder %s47_s11, 0  ;;  %s327_s24 = sor.u32 %s326_s20, %s47_s11 }
  0x5c   : > { %p328_p7 = scmp.eq.s32.totalorder %s327_s24, 0  ;;  %s453_s25 = scalar_lea.hbm %s4198_s0, %s3047_s23 }
  0x5d   : > { %s3807_s15 = scalar_select %p48_p5, %s3543_s30, %s50_s13  }
  0x5e   : > { %s3810_s4 = scalar_select %p328_p7, %s3531_s27, %s330_s8  }
  0x5f   : > { %s447_s16 = scalar_lea.vmem [#allocation3], %s3046_s19  ;;  %p3819_p8 = pnand %p3094_p13, %p3795_p3 }
  0x60   : > { %s454_s26 = sshll.u32 %s447_s16, 4  ;;  %s444_s20 = scalar_lea.sflag [#allocation4], %s443_s12  ;;  %s455_s26 = int_to_ptr.vmem [resolvable:$true] %s454_s26 }
  0x61   : > { %p3409_p9 = pneg %p3819_p8  ;;  %s3420_s13 = scalar_lea.vmem %s455_s26, 1280 }
  0x62   : > { %p3421_p10 = scmp.ne.s32.totalorder %s455_s26, %s3420_s13  ;;  %s3571_s8 = smov [#allocation3]  }
  0x63   : > { %s3425_s7 = sshll.u32 %s3571_s8, 4  ;;  %s3426_s7 = int_to_ptr.vmem [resolvable:$false] %s3425_s7 }
  0x64   : > { %p3423_p0 = pnand %p3421_p10, %p3409_p9  ;;  %s3427_s10 = scalar_lea.vmem %s3426_s7, 2560 }
  0x65   : > { %p3428_p2 = scmp.lt.s32.totalorder %s455_s26, %s3426_s7  ;;  %p3429_p5 = scmp.lt.s32.totalorder %s3427_s10, %s3420_s13 }
  0x66   : > { %p3424_p12 = pneg %p3423_p0 }
  0x67   : > { %p3430_p7 = por %p3429_p5, %p3428_p2 }
  0x69   : > { %p3431_p3 = pnand %p3430_p7, %p3424_p12 }
  0x6b   : > { %3434 = shalt.err (!%p3431_p3)
}
  0x6c   : > { %s4252_s16 = smov 4   ;;  %s4253_s19 = smov 64  }
  0x6d   : > { %3085 = dma.hbm_to_vmem [thread:$0]  (!%p3819_p8), %s453_s25, 1280, %s455_s26, %s444_s20, %s4253_s19, %s4253_s19, %s4252_s16  }
  0x6e   : > { %466 = sbr.rel (%p3725_p11) target bundleno = 899 (0x383), region = 72  ;;  %s468_s1 = sand.u32 (!%p3725_p11), 1, %s3539_s29  }
  0x6f   : > { %s3048_s12 = smul.u32 (!%p3725_p11), 80, %s468_s1  ;;  %s469_s23 = scalar_lea.sflag (!%p3725_p11), [#allocation4], %s468_s1 }
  0x71   : > { %s472_s11 = scalar_lea.vmem (!%p3725_p11), [#allocation3], %s3048_s12 }
  0x73   : > { %3506 = dma.done.wait (%p3709_p4), %s469_s23, 1280  }
  0x74   : > { %3508 = vsyncadd (%p3709_p4), %s469_s23, 4294966016 }
  0x75   : > { %3510 = dma.done.wait (%p3701_p1), [#allocation7], 10240  }
  0x76   : > { %3512 = vsyncadd (%p3701_p1), [#allocation7], 4294957056 }
  0x77   : > { %3514 = dma.done.wait (%p3701_p1), [#allocation10], 2048  }
  0x78   : > { %3516 = vsyncadd (%p3701_p1), [#allocation10], 4294965248  ;;  %v3196_v0 = vld [vmem:[#allocation6 + $0x38] sm:$0xff]   ;;  %v3197_v1 = vld [vmem:[#allocation6 + $0x30] sm:$0xff]   ;;  %s2710_s6 = sshll.u32 %s3547_s14, 5  ;;  %s2545_s21 = sshll.u32 %s3547_s14, 2  ;;  %v786_v41 = vlaneseq }
  0x79   : > { %2918 = vmatprep.subr.bf16.mxu0 %v3196_v0  ;;  %v3198_v2 = vld [vmem:[#allocation6 + $0x28] sm:$0xff]   ;;  %s3846_s26 = scalar_lea.vmem %s472_s11, %s2710_s6 [#allocation3]  ;;  %v3199_v3 = vld [vmem:[#allocation6 + $0x20] sm:$0xff]   ;;  %v3200_v5 = vld [vmem:[#allocation6 + $0x18] sm:$0xff]   ;;  %v780_v40 = vstv %s2545_s21  ;;  %s4270_s10 = sld [smem:[#allocation26_spill]] }
  0x7a   : > { %2919 = vmatpush3.bf16.msra.mxu0 %v3196_v0  ;;  %v3204_v4 = vld [vmem:[%s3846_s26] sm:$0xff]   ;;  %v3202_v7 = vld [vmem:[#allocation6 + $0x8] sm:$0xff]   ;;  %v3203_v8 = vld [vmem:[#allocation6] sm:$0xff]   ;;  %v781_v42 = vadd.s32 1, %v780_v40  ;;  %v3865_v44 = vshrl.u32 %v786_v41, 7  ;;  %vm789_vm2 = vcmp.ge.s32.totalorder %v780_v40, 1 }
  0x7b   : > { %2920 = vmatprep.subr.bf16.mxu0 %v3197_v1  ;;  %2934 = vmatprep.mubr.bf16.mxu0 %v3204_v4  ;;  %v3201_v6 = vld [vmem:[#allocation6 + $0x10] sm:$0xff]   ;;  %v3205_v9 = vld [vmem:[%s3846_s26 + $0x8] sm:$0xff]   ;;  %v3206_v10 = vld [vmem:[%s3846_s26 + $0x10] sm:$0xff]   ;;  %vm795_vm3 = vcmp.le.s32.totalorder %v780_v40, 8  ;;  %v783_v53 = vadd.s32 3, %v780_v40  ;;  %v782_v59 = vadd.s32 2, %v780_v40 }
  0x7c   : > { %v3207_v11 = vld [vmem:[%s3846_s26 + $0x18] sm:$0xff]   ;;  %v3208_v12 = vld [vmem:[%s3846_s26 + $0x20] sm:$0xff]   ;;  %v3209_v13 = vld [vmem:[%s3846_s26 + $0x28] sm:$0xff]   ;;  %vm790_vm0 = vcmp.ge.s32.totalorder %v781_v42, 1  ;;  %vm796_vm1 = vcmp.le.s32.totalorder %v781_v42, 8  ;;  %v3874_v48 = vadd.s32 8, %v3865_v44 }
  0x7d   : > { %v3210_v14 = vld [vmem:[#allocation8 + $0x138] sm:$0xff]   ;;  %v3213_v17 = vld [vmem:[#allocation8 + $0x130] sm:$0xff]   ;;  %v3216_v20 = vld [vmem:[#allocation8 + $0x128] sm:$0xff]   ;;  %vm807_vm5 = vcmp.ge.s32.totalorder %v3865_v44, 1  ;;  %vm792_vm10 = vcmp.ge.s32.totalorder %v783_v53, 1  ;;  %vm798_vm11 = vcmp.le.s32.totalorder %v783_v53, 8 }
  0x7e   : > { %2921 = vmatpush3.bf16.msra.mxu0 %v3197_v1  ;;  %v3211_v15 = vld [vmem:[#allocation8 + $0xf8] sm:$0xff]   ;;  %2784 = vmatprep.subr.bf16.mxu1 %v3210_v14  ;;  %v3214_v18 = vld [vmem:[#allocation8 + $0xf0] sm:$0xff]   ;;  %v3217_v21 = vld [vmem:[#allocation8 + $0xe8] sm:$0xff]   ;;  %vm822_vm6 = vcmp.le.s32.totalorder %v3874_v48, 8  ;;  %vm791_vm14 = vcmp.ge.s32.totalorder %v782_v59, 1  ;;  %vm797_vm15 = vcmp.le.s32.totalorder %v782_v59, 8 }
  0x7f   : > { %2922 = vmatprep.subr.bf16.mxu0 %v3198_v2  ;;  %v3212_v16 = vld [vmem:[#allocation8 + $0x178] sm:$0xff]   ;;  %2785 = vmatpush3.bf16.msra.mxu1 %v3211_v15  ;;  %v3215_v19 = vld [vmem:[#allocation8 + $0x170] sm:$0xff]   ;;  %v3218_v22 = vld [vmem:[#allocation8 + $0x168] sm:$0xff]   ;;  %v784_v14 = vadd.s32 4, %v780_v40  ;;  %s4271_s16 = sld [smem:[#allocation18_spill]]  ;;  %s3572_s25 = smov [#allocation12]  }
  0x80   : > { %2786 = vmatprep.subr.bf16.mxu1 %v3213_v17  ;;  %v3219_v23 = vld [vmem:[#allocation8 + $0x120] sm:$0xff]   ;;  %v3222_v26 = vld [vmem:[#allocation8 + $0x118] sm:$0xff]   ;;  %v3225_v29 = vld [vmem:[#allocation8 + $0x110] sm:$0xff]   ;;  %s4272_s12 = sld [smem:[#allocation31_spill]]  ;;  %s3439_s24 = sshll.u32 %s3572_s25, 4  ;;  %s3440_s24 = int_to_ptr.vmem [resolvable:$false] %s3439_s24 }
  0x81   : > { %v3220_v24 = vld [vmem:[#allocation8 + $0xe0] sm:$0xff]   ;;  %v3223_v27 = vld [vmem:[#allocation8 + $0xd8] sm:$0xff]   ;;  %v3226_v30 = vld [vmem:[#allocation8 + $0xd0] sm:$0xff]   ;;  %s4273_s6 = sld [smem:[#allocation28_spill]] }
  0x82   : > { %2923 = vmatpush3.bf16.msra.mxu0 %v3198_v2  ;;  %v3221_v25 = vld [vmem:[#allocation8 + $0x160] sm:$0xff]   ;;  %v3224_v28 = vld [vmem:[#allocation8 + $0x158] sm:$0xff]   ;;  %v3227_v31 = vld [vmem:[#allocation8 + $0x150] sm:$0xff]   ;;  %s4274_s28 = sld [smem:[#allocation32_spill]] }
  0x83   : > { %2924 = vmatprep.subr.bf16.mxu0 %v3199_v3  ;;  %2787 = vmatpush3.bf16.msra.mxu1 %v3214_v18  ;;  %v3228_v32 = vld [vmem:[#allocation8 + $0x108] sm:$0xff]   ;;  %v3231_v35 = vld [vmem:[#allocation8 + $0x100] sm:$0xff]   ;;  %v3234_v38 = vld [vmem:[#allocation8 + $0x78] sm:$0xff]   ;;  %s4275_s20 = sld [smem:[#allocation29_spill]] }
  0x84   : > { %2788 = vmatprep.subr.bf16.mxu1 %v3216_v20  ;;  %v3229_v33 = vld [vmem:[#allocation8 + $0xc8] sm:$0xff]   ;;  %v3232_v36 = vld [vmem:[#allocation8 + $0xc0] sm:$0xff]   ;;  %v3854_v39 = vld [vmem:[#allocation8 + $0xb8] sm:$0xff]   ;;  %s4276_s13 = sld [smem:[#allocation19_spill]] }
  0x85   : > { %v3230_v34 = vld [vmem:[#allocation8 + $0x148] sm:$0xff]   ;;  %v3233_v37 = vld [vmem:[#allocation8 + $0x140] sm:$0xff]   ;;  %v3863_v43 = vld [vmem:[%s4200_s2] ss:$0 sm:$0xff]  ;;  %s528_s8 = sand.u32 1, %s4271_s16   ;;  %s4278_s22 = sld [smem:[#allocation33_spill]] }
  0x86   : > { %2925 = vmatpush3.bf16.msra.mxu0 %v3199_v3  ;;  %v3870_v46 = vld [vmem:[%s4201_s3] ss:$0 sm:$0xff]  ;;  %vm802_vm4 = vmand %vm790_vm0, %vm796_vm1  ;;  %s2544_s7 = sshll.u32 %s528_s8, 4 }
  0x87   : > { %2926 = vmatprep.subr.bf16.mxu0 %v3200_v5  ;;  %2789 = vmatpush3.bf16.msra.mxu1 %v3217_v21  ;;  %vm3882_vm7 = vmand %vm789_vm2, %vm795_vm3  ;;  %s530_s23 = scalar_lea.vmem [#allocation12], %s2544_s7 }
  0x88   : > { %2790 = vmatprep.subr.bf16.mxu1 %v3219_v23  ;;  %vm811_vm8 = vmand %vm802_vm4, %vm807_vm5  ;;  %s2399_s11 = sshll.u32 %s530_s23, 4  ;;  %s4134_s11 = int_to_ptr.vmem [resolvable:$true] %s2399_s11 }
  0x89   : > { %vm826_vm9 = vmand %vm802_vm4, %vm822_vm6  ;;  %p3442_p13 = scmp.lt.s32.totalorder %s4134_s11, %s3440_s24 }
  0x8a   : > { %2927 = vmatpush3.bf16.msra.mxu0 %v3200_v5  ;;  %vm3896_vm12 = vmand %vm3882_vm7, %vm807_vm5 }
  0x8b   : > { %2928 = vmatprep.subr.bf16.mxu0 %v3201_v6  ;;  %2791 = vmatpush3.bf16.msra.mxu1 %v3220_v24  ;;  %vm824_vm13 = vmand %vm3882_vm7, %vm822_vm6 }
  0x8c   : > { %2792 = vmatprep.subr.bf16.mxu1 %v3222_v26  ;;  %vm3910_vm0 = vmand %vm792_vm10, %vm798_vm11  ;;  %vm799_vm10 = vcmp.le.s32.totalorder %v784_v14, 8 }
  0x8d   : > { %vm3920_vm1 = vmand %vm791_vm14, %vm797_vm15 }
  0x8e   : > { %2929 = vmatpush3.bf16.msra.mxu0 %v3201_v6  ;;  %vm815_vm2 = vmand %vm3910_vm0, %vm807_vm5 }
  0x8f   : > { %2930 = vmatprep.subr.bf16.mxu0 %v3202_v7  ;;  %2793 = vmatpush3.bf16.msra.mxu1 %v3223_v27  ;;  %vm830_vm3 = vmand %vm3910_vm0, %vm822_vm6 }
  0x90   : > { %2794 = vmatprep.subr.bf16.mxu1 %v3225_v29  ;;  %vm828_vm11 = vmand %vm3920_vm1, %vm822_vm6 }
  0x92   : > { %2931 = vmatpush3.bf16.msra.mxu0 %v3202_v7 }
  0x93   : > { %2932 = vmatprep.subr.bf16.mxu0 %v3203_v8  ;;  %2795 = vmatpush3.bf16.msra.mxu1 %v3226_v30 }
  0x94   : > { %2796 = vmatprep.subr.bf16.mxu1 %v3228_v32 }
  0x96   : > { %2933 = vmatpush3.bf16.msra.mxu0 %v3203_v8 }
  0x97   : > { %2946 = vmatprep.subr.bf16.mxu0 %v3212_v16  ;;  %2797 = vmatpush3.bf16.msra.mxu1 %v3229_v33 }
  0x98   : > { %2798 = vmatprep.subr.bf16.mxu1 %v3231_v35 }
  0x99   : > { %2935 = vmatmul.mubr.bf16.vlgmr.msra.gmra.mxu0 %v3205_v9 }
  0x9a   : > { %2938 = vmatprep.mubr.bf16.mxu0 %v3206_v10  ;;  %2947 = vmatpush3.bf16.msra.mxu0 %v3212_v16 }
  0x9b   : > { %2948 = vmatprep.subr.bf16.mxu0 %v3215_v19  ;;  %2799 = vmatpush3.bf16.msra.mxu1 %v3232_v36 }
  0x9c   : > { %2822 = vmatprep.subr.bf16.mxu1 %v3234_v38 }
  0x9e   : > { %2949 = vmatpush3.bf16.msra.mxu0 %v3215_v19 }
  0x9f   : > { %2950 = vmatprep.subr.bf16.mxu0 %v3218_v22 }
  0xa1   : > { %2939 = vmatmul.mubr.bf16.gmra.mxu0 %v3207_v11 }
  0xa2   : > { %2942 = vmatprep.mubr.bf16.mxu0 %v3208_v12  ;;  %2951 = vmatpush3.bf16.msra.mxu0 %v3218_v22 }
  0xa3   : > { %2952 = vmatprep.subr.bf16.mxu0 %v3221_v25 }
  0xa6   : > { %2953 = vmatpush3.bf16.msra.mxu0 %v3221_v25 }
  0xa7   : > { %2954 = vmatprep.subr.bf16.mxu0 %v3224_v28 }
  0xa9   : > { %2943 = vmatmul.mubr.bf16.gmra.mxu0 %v3209_v13  ;;  %v785_v13 = vadd.s32 5, %v780_v40 }
  0xaa   : > { %2955 = vmatpush3.bf16.msra.mxu0 %v3224_v28 }
  0xab   : > { %2956 = vmatprep.subr.bf16.mxu0 %v3227_v31  ;;  %vm794_vm4 = vcmp.ge.s32.totalorder %v785_v13, 1  ;;  %vm800_vm7 = vcmp.le.s32.totalorder %v785_v13, 8 }
  0xae   : > { %2957 = vmatpush3.bf16.msra.mxu0 %v3227_v31 }
  0xaf   : > { %2958 = vmatprep.subr.bf16.mxu0 %v3230_v34 }
  0xb2   : > { %2959 = vmatpush3.bf16.msra.mxu0 %v3230_v34 }
  0xb3   : > { %2960 = vmatprep.subr.bf16.mxu0 %v3233_v37 }
  0xb6   : > { %2961 = vmatpush3.bf16.msra.mxu0 %v3233_v37 }
  0xb7   : > { %2966 = vmatprep.subr.bf16.mxu0 %v3854_v39 }
 0x159   : > { %v2936_v45 = vpop.f32.mrf.mxu0 }
 0x15a   : > { %v739_v47 = vmul.f32 %v2936_v45, %v3863_v43 }
 0x15b   : > { %v683_v49 = vpop.f32.mrf.mxu0 }
 0x15c   : > { %v758_v50 = vadd.f32 %v3870_v46, %v739_v47  ;;  %v737_v51 = vmul.f32 %v3863_v43, %v683_v49 }
 0x15d   : > { %v2937_v52 = vpop.f32.mrf.mxu0 }
 0x15e   : > { %v756_v54 = vadd.f32 %v3870_v46, %v737_v51  ;;  %v740_v55 = vmul.f32 %v2937_v52, %v3863_v43  ;;  %v770_v56 = vmax.f32 %v758_v50, 0.0 }
 0x15f   : > { %v686_v58 = vpop.f32.mrf.mxu0 }
 0x160   : > { %v759_v60 = vadd.f32 %v3870_v46, %v740_v55  ;;  %v738_v61 = vmul.f32 %v3863_v43, %v686_v58  ;;  %v768_v63 = vmax.f32 %v756_v54, 0.0  ;;  %v861_v4 = vsel %vm811_vm8, %v770_v56, 0.0 }
 0x161   : > { %v2940_v62 = vpop.f32.mrf.mxu0  ;;  %vm793_vm8 = vcmp.ge.s32.totalorder %v784_v14, 1 }
 0x162   : > { %v771_v1 = vmax.f32 %v759_v60, 0.0  ;;  %v757_v2 = vadd.f32 %v3870_v46, %v738_v61  ;;  %v743_v3 = vmul.f32 %v2940_v62, %v3863_v43  ;;  %v859_v15 = vsel %vm3896_vm12, %v768_v63, 0.0  ;;  %vm3945_vm12 = vmand %vm794_vm4, %vm800_vm7 }
 0x163   : > { %v699_v5 = vpop.f32.mrf.mxu0  ;;  %vm819_vm14 = vmand %vm3945_vm12, %vm807_vm5  ;;  %vm944_vm4 = vsmask.f32 7440 }
 0x164   : > { %v862_v6 = vsel %vm826_vm9, %v771_v1, 0.0  ;;  %v769_v7 = vmax.f32 %v757_v2, 0.0  ;;  %v762_v8 = vadd.f32 %v3870_v46, %v743_v3  ;;  %v741_v9 = vmul.f32 %v3863_v43, %v699_v5  ;;  %vm813_vm9 = vmand %vm3920_vm1, %vm807_vm5 }
 0x165   : > { %v2732_v10 = vpack.c.bf16 %v862_v6, %v861_v4  ;;  %v2941_v12 = vpop.f32.mrf.mxu0  ;;  %vm834_vm0 = vmand %vm3945_vm12, %vm822_vm6  ;;  %vm1010_vm1 = vcmask 1042432  }
 0x166   : > { %v860_v16 = vsel %vm824_vm13, %v769_v7, 0.0  ;;  %v760_v17 = vadd.f32 %v3870_v46, %v741_v9  ;;  %v744_v18 = vmul.f32 %v2941_v12, %v3863_v43  ;;  %v774_v20 = vmax.f32 %v762_v8, 0.0  ;;  %vm3951_vm13 = vmand %vm793_vm8, %vm799_vm10 }
 0x167   : > { %2764 = vst [vmem:[#allocation2 + $0x8] sm:$0xff] %v2732_v10   ;;  %v2727_v19 = vpack.c.bf16 %v860_v16, %v859_v15  ;;  %v702_v22 = vpop.f32.mrf.mxu0  ;;  %vm817_vm15 = vmand %vm3951_vm13, %vm807_vm5 }
 0x168   : > { %v763_v23 = vadd.f32 %v3870_v46, %v744_v18  ;;  %v742_v24 = vmul.f32 %v3863_v43, %v702_v22  ;;  %v772_v25 = vmax.f32 %v760_v17, 0.0  ;;  %v865_v30 = vsel %vm815_vm2, %v774_v20, 0.0  ;;  %vm832_vm5 = vmand %vm3951_vm13, %vm822_vm6 }
 0x169   : > { %2728 = vst [vmem:[#allocation2] sm:$0xff] %v2727_v19   ;;  %v2944_v26 = vpop.f32.mrf.mxu0  ;;  %vm1011_vm2 = vcmask 1046532  }
 0x16a   : > { %v775_v27 = vmax.f32 %v763_v23, 0.0  ;;  %v761_v28 = vadd.f32 %v3870_v46, %v742_v24  ;;  %v747_v29 = vmul.f32 %v2944_v26, %v3863_v43  ;;  %v863_v37 = vsel %vm813_vm9, %v772_v25, 0.0  ;;  %vm3985_vm6 = vmor %vm1010_vm1, %vm1011_vm2 }
 0x16b   : > { %v715_v31 = vpop.f32.mrf.mxu0 }
 0x16c   : > { %v866_v32 = vsel %vm830_vm3, %v775_v27, 0.0  ;;  %v773_v33 = vmax.f32 %v761_v28, 0.0  ;;  %v766_v34 = vadd.f32 %v3870_v46, %v747_v29  ;;  %v745_v36 = vmul.f32 %v3863_v43, %v715_v31 }
 0x16d   : > { %v2742_v38 = vpack.c.bf16 %v866_v32, %v865_v30  ;;  %v2945_v41 = vpop.f32.mrf.mxu0  ;;  %vm943_vm3 = vsmask.f32 3328 }
 0x16e   : > { %v864_v42 = vsel %vm828_vm11, %v773_v33, 0.0  ;;  %v778_v45 = vmax.f32 %v766_v34, 0.0  ;;  %v764_v47 = vadd.f32 %v3870_v46, %v745_v36  ;;  %v748_v49 = vmul.f32 %v2945_v41, %v3863_v43  ;;  %v3967_v55 = vld [vmem:[#allocation2 + $0x8] sm:$0xf]  ;;  %v934_v44 = vld [vmem:[#allocation2 + $0xc] sm:$0xf]  ;;  %vm4017_vm7 = vmor %vm943_vm3, %vm944_vm4 }
 0x16f   : > { %2766 = vst [vmem:[#allocation2 + $0x18] sm:$0xff] %v2742_v38   ;;  %v2737_v50 = vpack.c.bf16 %v864_v42, %v863_v37  ;;  %v718_v51 = vpop.f32.mrf.mxu0  ;;  %v961_v59 = vshrl.u32 %v3967_v55, 16  ;;  %v964_v60 = vshll.u32 %v3967_v55, 16  ;;  %v1019_v2 = vrot.slane %v934_v44, 5 }
 0x170   : > { %v776_v52 = vmax.f32 %v764_v47, 0.0  ;;  %v767_v53 = vadd.f32 %v3870_v46, %v748_v49  ;;  %v746_v54 = vmul.f32 %v3863_v43, %v718_v51  ;;  %v869_v56 = vsel %vm819_vm14, %v778_v45, 0.0  ;;  %v3978_v43 = vld [vmem:[#allocation2] sm:$0xf]  ;;  %v932_v19 = vld [vmem:[#allocation2 + $0x4] sm:$0xf] }
 0x171   : > { %2765 = vst [vmem:[#allocation2 + $0x10] sm:$0xff] %v2737_v50   ;;  %v947_v48 = vshrl.u32 %v3978_v43, 16  ;;  %v950_v5 = vshll.u32 %v3978_v43, 16  ;;  %v963_v6 = vrot.slane %v961_v59, 4  ;;  %v966_v7 = vrot.slane %v964_v60, 5 }
 0x172   : > { %v779_v57 = vmax.f32 %v767_v53, 0.0  ;;  %v765_v58 = vadd.f32 %v3870_v46, %v746_v54  ;;  %v867_v61 = vsel %vm817_vm15, %v776_v52, 0.0  ;;  %v2577_v46 = vrot.slane %v3967_v55, 9 }
 0x173   : > { %v949_v14 = vrot.slane %v947_v48, 4  ;;  %v967_v20 = vor.u32 %v966_v7, %v963_v6  ;;  %v952_v24 = vrot.slane %v950_v5, 5  ;;  %v970_v25 = vshll.u32 %v934_v44, 16 }
 0x174   : > { %v870_v62 = vsel %vm834_vm0, %v779_v57, 0.0  ;;  %v777_v63 = vmax.f32 %v765_v58, 0.0  ;;  %v3997_v13 = vsel %vm3985_vm6, %v2577_v46, %v1019_v2  ;;  %v2576_v31 = vrot.slane %v3978_v43, 9 }
 0x175   : > { %v2752_v0 = vpack.c.bf16 %v870_v62, %v869_v56  ;;  %v1015_v32 = vrot.slane %v932_v19, 5  ;;  %v968_v33 = vrot.slane %v967_v20, 4  ;;  %v953_v41 = vor.u32 %v952_v24, %v949_v14 }
 0x176   : > { %v868_v1 = vsel %vm832_vm5, %v777_v63, 0.0  ;;  %v3992_v10 = vld [vmem:[#allocation2 + $0x18] sm:$0xf]  ;;  %v4001_v17 = vld [vmem:[#allocation2 + $0x1c] sm:$0xf]  ;;  %v956_v42 = vshll.u32 %v932_v19, 16 }
 0x177   : > { %2768 = vst [vmem:[#allocation2 + $0x28] sm:$0xff] %v2752_v0   ;;  %v2747_v3 = vpack.c.bf16 %v868_v1, %v867_v61  ;;  %v989_v21 = vshrl.u32 %v3992_v10, 16  ;;  %v992_v22 = vshll.u32 %v3992_v10, 16  ;;  %v2579_v29 = vrot.slane %v3992_v10, 9  ;;  %v3236_v63 = vld [vmem:[#allocation8 + $0x38] sm:$0xff]   ;;  %v3238_v0 = vld [vmem:[#allocation8 + $0x70] sm:$0xff]  }
 0x178   : > { %v3990_v8 = vld [vmem:[#allocation2 + $0x10] sm:$0xf]  ;;  %v936_v9 = vld [vmem:[#allocation2 + $0x14] sm:$0xf]  ;;  %v1027_v30 = vrot.slane %v4001_v17, 5  ;;  %v972_v45 = vrot.slane %v970_v25, 5  ;;  %v1016_v54 = vsel %vm3985_vm6, %v2576_v31, %v1015_v32 }
 0x179   : > { %2767 = vst [vmem:[#allocation2 + $0x20] sm:$0xff] %v2747_v3   ;;  %v2578_v11 = vrot.slane %v3990_v8, 9  ;;  %v1023_v12 = vrot.slane %v936_v9, 5  ;;  %v975_v15 = vshrl.u32 %v3990_v8, 16  ;;  %v978_v16 = vshll.u32 %v3990_v8, 16  ;;  %v3240_v3 = vld [vmem:[#allocation8 + $0xb0] sm:$0xff]  }
 0x17a   : > { %v984_v28 = vshll.u32 %v936_v9, 16  ;;  %v991_v35 = vrot.slane %v989_v21, 4  ;;  %v994_v36 = vrot.slane %v992_v22, 5  ;;  %v4026_v53 = vsel %vm3985_vm6, %v2579_v29, %v1027_v30  ;;  %v3244_v19 = vld [vmem:[#allocation8 + $0xa8] sm:$0xff]   ;;  %v3245_v29 = vld [vmem:[#allocation8 + $0x60] sm:$0xff]  }
 0x17b   : > { %v4005_v18 = vsel %vm3985_vm6, %v2578_v11, %v1023_v12  ;;  %v977_v26 = vrot.slane %v975_v15, 4  ;;  %v980_v27 = vrot.slane %v978_v16, 5  ;;  %v973_v44 = vsel %vm4017_vm7, %v968_v33, %v972_v45  ;;  %v3247_v30 = vld [vmem:[#allocation8 + $0xa0] sm:$0xff]   ;;  %v3250_v33 = vld [vmem:[#allocation8 + $0x98] sm:$0xff]   ;;  %v3254_v45 = vld [vmem:[#allocation8 + $0x48] sm:$0xff]  }
 0x17c   : > { %v2591_v23 = vcombine.low %v3997_v13, %v4005_v18  ;;  %v986_v51 = vrot.slane %v984_v28, 5  ;;  %v995_v60 = vor.u32 %v994_v36, %v991_v35  ;;  %v998_v2 = vshll.u32 %v4001_v17, 16  ;;  %v3239_v17 = vld [vmem:[#allocation8 + $0x30] sm:$0xff]   ;;  %v3246_v32 = vld [vmem:[#allocation8 + $0x20] sm:$0xff]   ;;  %v3249_v35 = vld [vmem:[#allocation8 + $0x18] sm:$0xff]  }
 0x17d   : > { %v981_v34 = vor.u32 %v980_v27, %v977_v26  ;;  %v2587_v48 = vcombine.low %v3967_v55, %v3990_v8  ;;  %v2584_v9 = vcombine.low %v1016_v54, %v3997_v13  ;;  %v954_v12 = vrot.slane %v953_v41, 4  ;;  %v3243_v27 = vld [vmem:[#allocation8 + $0x28] sm:$0xff]   ;;  %v3253_v36 = vld [vmem:[#allocation8 + $0x90] sm:$0xff]   ;;  %v3263_v54 = vld [vmem:[#allocation8 + $0x238] sm:$0xff]  }
 0x17e   : > { %2962 = vmatprep.mubr.bf16.mxu0 %v2591_v23  ;;  %v4022_v52 = vld [vmem:[#allocation2 + $0x2c] sm:$0xf]  ;;  %v4049_v7 = vld [vmem:[#allocation2 + $0x28] sm:$0xf]  ;;  %v996_v14 = vrot.slane %v995_v60, 4  ;;  %v958_v16 = vrot.slane %v956_v42, 5  ;;  %v2580_v60 = vcombine.low %v3978_v43, %v3967_v55  ;;  %v2581_v55 = vcombine.low %v3990_v8, %v3992_v10 }
 0x17f   : > { %v982_v50 = vrot.slane %v981_v34, 4  ;;  %v1687_v46 = vrot.slane %v4022_v52, 5  ;;  %v2641_v11 = vrot.slane %v4049_v7, 9  ;;  %v1000_v21 = vrot.slane %v998_v2, 5  ;;  %v3241_v23 = vld [vmem:[#allocation8 + $0x68] sm:$0xff]   ;;  %v3248_v34 = vld [vmem:[#allocation8 + $0x58] sm:$0xff]  }
 0x180   : > { %v4014_v37 = vld [vmem:[#allocation2 + $0x20] sm:$0xf]  ;;  %v940_v38 = vld [vmem:[#allocation2 + $0x24] sm:$0xf]  ;;  %v3256_v42 = vld [vmem:[#allocation8 + $0x88] sm:$0xff]   ;;  %v1670_v8 = vshrl.u32 %v4049_v7, 16 }
 0x181   : > { %v2586_v47 = vrot.slane %v4014_v37, 9  ;;  %v1119_v49 = vrot.slane %v940_v38, 5  ;;  %v1102_v56 = vshrl.u32 %v4014_v37, 16  ;;  %v1105_v57 = vshll.u32 %v4014_v37, 16  ;;  %v3252_v41 = vld [vmem:[#allocation8 + $0x10] sm:$0xff]   ;;  %v3271_v43 = vld [vmem:[#allocation8 + $0x1e0] sm:$0xff]  }
 0x182   : > { %v4040_v59 = vsel %vm4017_vm7, %v982_v50, %v986_v51  ;;  %v1111_v6 = vshll.u32 %v940_v38, 16  ;;  %v4056_v20 = vsel %vm3985_vm6, %v2641_v11, %v1687_v46  ;;  %v1001_v25 = vsel %vm4017_vm7, %v996_v14, %v1000_v21  ;;  %v3251_v38 = vld [vmem:[#allocation8 + $0x50] sm:$0xff]   ;;  %v3257_v50 = vld [vmem:[#allocation8 + $0x40] sm:$0xff]   ;;  %v3276_v2 = vld [vmem:[#allocation8 + $0x218] sm:$0xff]  }
 0x183   : > { %v4034_v58 = vsel %vm3985_vm6, %v2586_v47, %v1119_v49  ;;  %v2589_v62 = vcombine.low %v973_v44, %v4040_v59  ;;  %v1104_v1 = vrot.slane %v1102_v56, 4  ;;  %v1107_v5 = vrot.slane %v1105_v57, 5  ;;  %v3255_v47 = vld [vmem:[#allocation8 + $0x8] sm:$0xff]   ;;  %v3259_v49 = vld [vmem:[#allocation8 + $0x80] sm:$0xff]   ;;  %v3261_v56 = vld [vmem:[#allocation8 + $0x1f8] sm:$0xff]  }
 0x184   : > { %v2592_v61 = vcombine.low %v4026_v53, %v4034_v58  ;;  %v1113_v22 = vrot.slane %v1111_v6, 5  ;;  %v2644_v24 = vcombine.low %v4034_v58, %v4056_v20  ;;  %v2588_v28 = vcombine.low %v3992_v10, %v4014_v37  ;;  %v3258_v51 = vld [vmem:[#allocation8] sm:$0xff]   ;;  %v3277_v6 = vld [vmem:[#allocation8 + $0x1d0] sm:$0xff]   ;;  %v3282_v11 = vld [vmem:[#allocation8 + $0x208] sm:$0xff]  }
 0x185   : > { %1361 = vmatprep.mubr.bf16.mxu1 %v2589_v62  ;;  %v1108_v15 = vor.u32 %v1107_v5, %v1104_v1  ;;  %v2585_v57 = vcombine.low %v4005_v18, %v4026_v53  ;;  %v2583_v62 = vcombine.low %v4040_v59, %v1001_v25  ;;  %v3270_v1 = vld [vmem:[#allocation8 + $0x228] sm:$0xff]   ;;  %v3273_v59 = vld [vmem:[#allocation8 + $0x220] sm:$0xff]   ;;  %v3279_v5 = vld [vmem:[#allocation8 + $0x210] sm:$0xff]   ;;  %v1673_v10 = vshll.u32 %v4049_v7, 16 }
 0x186   : > { %2963 = vmatmul.mubr.bf16.vlgmr.msra.gmra.mxu0 %v2592_v61  ;;  %1362 = vmatmul.mubr.bf16.vlgmr.msra.gmra.mxu1 %v2587_v48  ;;  %v3264_v61 = vld [vmem:[#allocation8 + $0x1f0] sm:$0xff]   ;;  %v3268_v18 = vld [vmem:[#allocation8 + $0x1e8] sm:$0xff]   ;;  %v3272_v46 = vld [vmem:[#allocation8 + $0x1a0] sm:$0xff]   ;;  %v1672_v14 = vrot.slane %v1670_v8, 4 }
 0x187   : > { %2967 = vmatpush3.bf16.msra.mxu0 %v3854_v39  ;;  %2823 = vmatpush3.bf16.msra.mxu1 %v3236_v63  ;;  %v1109_v13 = vrot.slane %v1108_v15, 4  ;;  %v959_v39 = vsel %vm4017_vm7, %v954_v12, %v958_v16  ;;  %v3266_v63 = vld [vmem:[#allocation8 + $0x230] sm:$0xff]   ;;  %v3269_v53 = vld [vmem:[#allocation8 + $0x1a8] sm:$0xff]   ;;  %v3274_v48 = vld [vmem:[#allocation8 + $0x1d8] sm:$0xff]   ;;  %v1675_v15 = vrot.slane %v1673_v10, 5 }
 0x188   : > { %2982 = vmatprep.mubr.bf16.mxu0 %v2584_v9  ;;  %2824 = vmatprep.subr.bf16.mxu1 %v3238_v0  ;;  %v2582_v31 = vcombine.low %v959_v39, %v973_v44  ;;  %v3262_v44 = vld [vmem:[#allocation8 + $0x1b8] sm:$0xff]   ;;  %v3265_v0 = vld [vmem:[#allocation8 + $0x1b0] sm:$0xff]   ;;  %v3280_v12 = vld [vmem:[#allocation8 + $0x1c8] sm:$0xff]  }
 0x189   : > { %2968 = vmatprep.subr.bf16.mxu0 %v3240_v3  ;;  %v4066_v4 = vsel %vm4017_vm7, %v1109_v13, %v1113_v22  ;;  %v3278_v9 = vld [vmem:[#allocation8 + $0x190] sm:$0xff]   ;;  %v3281_v16 = vld [vmem:[#allocation8 + $0x188] sm:$0xff]   ;;  %v1676_v21 = vor.u32 %v1675_v15, %v1672_v14  ;;  %v1679_v13 = vshll.u32 %v4022_v52, 16  ;;  %v3284_v22 = vld [vmem:[#allocation8 + $0x180] sm:$0xff]   ;;  %v2642_v52 = vcombine.low %v4014_v37, %v4049_v7 }
 0x18a   : > { %v2590_v26 = vcombine.low %v1001_v25, %v4066_v4  ;;  %v3291_v58 = vld [vmem:[#allocation9 + $0x30] sm:$0xff]   ;;  %v3292_v20 = vld [vmem:[#allocation11 + $0x20] sm:$0xff]   ;;  %v3293_v37 = vld [vmem:[#allocation9 + $0x28] sm:$0xff]  }
 0x18b   : > { %2969 = vmatpush3.bf16.msra.mxu0 %v3240_v3  ;;  %2825 = vmatpush3.bf16.msra.mxu1 %v3239_v17  ;;  %v3275_v3 = vld [vmem:[#allocation8 + $0x198] sm:$0xff]   ;;  %v3285_v17 = vld [vmem:[#allocation8 + $0x200] sm:$0xff]   ;;  %v1681_v39 = vrot.slane %v1679_v13, 5 }
 0x18c   : > { %2970 = vmatprep.subr.bf16.mxu0 %v3244_v19  ;;  %2826 = vmatprep.subr.bf16.mxu1 %v3241_v23  ;;  %v1677_v23 = vrot.slane %v1676_v21, 4  ;;  %v3294_v7 = vld [vmem:[#allocation11 + $0x18] sm:$0xff]   ;;  %v3302_v21 = vld [vmem:[#allocation9] sm:$0xff]  }
 0x18d   : > { %1369 = vmatprep.mubr.bf16.mxu1 %v2590_v26 }
 0x18e   : > { %1370 = vmatmul.mubr.bf16.gmra.mxu1 %v2588_v28  ;;  %v1682_v25 = vsel %vm4017_vm7, %v1677_v23, %v1681_v39  ;;  %v3288_v28 = vld [vmem:[#allocation11 + $0x30] sm:$0xff]  }
 0x18f   : > { %2971 = vmatpush3.bf16.msra.mxu0 %v3244_v19  ;;  %2827 = vmatpush3.bf16.msra.mxu1 %v3243_v27  ;;  %v3283_v19 = vld [vmem:[#allocation8 + $0x1c0] sm:$0xff]   ;;  %v2643_v26 = vcombine.low %v4066_v4, %v1682_v25  ;;  %v3287_v27 = vld [vmem:[#allocation11 + $0x38] sm:$0xff]   ;;  %v3296_v4 = vld [vmem:[#allocation11 + $0x10] sm:$0xff]  }
 0x190   : > { %1603 = vmatprep.mubr.bf16.mxu1 %v2582_v31  ;;  %2828 = vmatprep.subr.bf16.mxu1 %v3245_v29  ;;  %v3289_v29 = vld [vmem:[#allocation9 + $0x38] sm:$0xff]  }
 0x191   : > { %2972 = vmatprep.subr.bf16.mxu0 %v3247_v30  ;;  %v2683_v31 = vld [vmem:[%s3846_s26 + $0x8] sm:$0xf] }
 0x193   : > { %2973 = vmatpush3.bf16.msra.mxu0 %v3247_v30  ;;  %2829 = vmatpush3.bf16.msra.mxu1 %v3246_v32  ;;  %v3290_v30 = vld [vmem:[#allocation11 + $0x28] sm:$0xff]   ;;  %v2685_v32 = vld [vmem:[%s3846_s26 + $0x10] sm:$0xf] }
 0x194   : > { %2974 = vmatprep.subr.bf16.mxu0 %v3250_v33  ;;  %2830 = vmatprep.subr.bf16.mxu1 %v3248_v34  ;;  %v2169_v34 = vshrl.u32 %v2683_v31, 16 }
 0x197   : > { %2975 = vmatpush3.bf16.msra.mxu0 %v3250_v33  ;;  %2831 = vmatpush3.bf16.msra.mxu1 %v3249_v35  ;;  %v3297_v33 = vld [vmem:[#allocation9 + $0x18] sm:$0xff]   ;;  %v2172_v35 = vshll.u32 %v2683_v31, 16 }
 0x198   : > { %2976 = vmatprep.subr.bf16.mxu0 %v3253_v36  ;;  %2832 = vmatprep.subr.bf16.mxu1 %v3251_v38  ;;  %v2186_v38 = vshll.u32 %v2685_v32, 16 }
 0x19b   : > { %2977 = vmatpush3.bf16.msra.mxu0 %v3253_v36  ;;  %2833 = vmatpush3.bf16.msra.mxu1 %v3252_v41  ;;  %v2183_v36 = vshrl.u32 %v2685_v32, 16  ;;  %v2687_v41 = vld [vmem:[%s3846_s26 + $0x18] sm:$0xf] }
 0x19c   : > { %2978 = vmatprep.subr.bf16.mxu0 %v3256_v42  ;;  %2834 = vmatprep.subr.bf16.mxu1 %v3254_v45  ;;  %v3298_v45 = vld [vmem:[#allocation11 + $0x8] sm:$0xff]  }
 0x19f   : > { %2979 = vmatpush3.bf16.msra.mxu0 %v3256_v42  ;;  %2835 = vmatpush3.bf16.msra.mxu1 %v3255_v47  ;;  %v2689_v42 = vld [vmem:[%s3846_s26 + $0x20] sm:$0xf]  ;;  %v2171_v47 = vrot.slane %v2169_v34, 4 }
 0x1a0   : > { %2980 = vmatprep.subr.bf16.mxu0 %v3259_v49  ;;  %2836 = vmatprep.subr.bf16.mxu1 %v3257_v50  ;;  %v2185_v50 = vrot.slane %v2183_v36, 4  ;;  %v2214_v10 = vshll.u32 %v2689_v42, 16 }
 0x1a3   : > { %2981 = vmatpush3.bf16.msra.mxu0 %v3259_v49  ;;  %2837 = vmatpush3.bf16.msra.mxu1 %v3258_v51  ;;  %v2174_v49 = vrot.slane %v2172_v35, 5  ;;  %v2188_v51 = vrot.slane %v2186_v38, 5 }
 0x1a4   : > { %2986 = vmatprep.subr.bf16.mxu0 %v3263_v54  ;;  %2860 = vmatprep.subr.bf16.mxu1 %v3261_v56  ;;  %v2686_v56 = vld [vmem:[%s3846_s26 + $0x14] sm:$0x1] }
 0x1a6   : > { %2983 = vmatmul.mubr.bf16.vlgmr.msra.gmra.mxu0 %v2585_v57  ;;  %1604 = vmatmul.mubr.bf16.vlgmr.msra.gmra.mxu1 %v2580_v60  ;;  %v3299_v60 = vld [vmem:[#allocation9 + $0x10] sm:$0xff]  }
 0x1a7   : > { %2987 = vmatpush3.bf16.msra.mxu0 %v3263_v54  ;;  %1611 = vmatprep.mubr.bf16.mxu1 %v2583_v62  ;;  %v2684_v54 = vld [vmem:[%s3846_s26 + $0xc] sm:$0x1] }
 0x1a8   : > { %2861 = vmatpush3.bf16.msra.mxu1 %v3262_v44  ;;  %3002 = vmatprep.mubr.bf16.mxu0 %v2585_v57  ;;  %v2197_v57 = vshrl.u32 %v2687_v41, 16  ;;  %v2200_v44 = vshll.u32 %v2687_v41, 16 }
 0x1a9   : > { %2862 = vmatprep.subr.bf16.mxu1 %v3264_v61  ;;  %2988 = vmatprep.subr.bf16.mxu0 %v3266_v63  ;;  %v2175_v61 = vor.u32 %v2174_v49, %v2171_v47 }
 0x1ab   : > { %2989 = vmatpush3.bf16.msra.mxu0 %v3266_v63  ;;  %v2189_v63 = vor.u32 %v2188_v51, %v2185_v50 }
 0x1ac   : > { %2863 = vmatpush3.bf16.msra.mxu1 %v3265_v0  ;;  %2990 = vmatprep.subr.bf16.mxu0 %v3270_v1  ;;  %v2192_v0 = vshll.u32 %v2686_v56, 16 }
 0x1ad   : > { %2864 = vmatprep.subr.bf16.mxu1 %v3268_v18  ;;  %v2690_v18 = vld [vmem:[%s3846_s26 + $0x24] sm:$0x1] }
 0x1ae   : > { %1612 = vmatmul.mubr.bf16.gmra.mxu1 %v2581_v55  ;;  %v2220_v14 = vshll.u32 %v2690_v18, 16 }
 0x1af   : > { %2991 = vmatpush3.bf16.msra.mxu0 %v3270_v1  ;;  %1923 = vmatprep.mubr.bf16.mxu1 %v2583_v62  ;;  %v2178_v62 = vshll.u32 %v2684_v54, 16  ;;  %v2688_v1 = vld [vmem:[%s3846_s26 + $0x1c] sm:$0x1] }
 0x1b0   : > { %2865 = vmatpush3.bf16.msra.mxu1 %v3269_v53  ;;  %2992 = vmatprep.subr.bf16.mxu0 %v3273_v59  ;;  %v2199_v53 = vrot.slane %v2197_v57, 4 }
 0x1b1   : > { %2866 = vmatprep.subr.bf16.mxu1 %v3271_v43  ;;  %v2206_v43 = vshll.u32 %v2688_v1, 16 }
 0x1b3   : > { %2993 = vmatpush3.bf16.msra.mxu0 %v3273_v59  ;;  %v2211_v59 = vshrl.u32 %v2689_v42, 16 }
 0x1b4   : > { %2867 = vmatpush3.bf16.msra.mxu1 %v3272_v46  ;;  %2994 = vmatprep.subr.bf16.mxu0 %v3276_v2  ;;  %v3300_v46 = vld [vmem:[#allocation11] sm:$0xff]  }
 0x1b5   : > { %2868 = vmatprep.subr.bf16.mxu1 %v3274_v48  ;;  %v2180_v48 = vrot.slane %v2178_v62, 5  ;;  %v2213_v8 = vrot.slane %v2211_v59, 4 }
 0x1b7   : > { %2995 = vmatpush3.bf16.msra.mxu0 %v3276_v2  ;;  %v2176_v2 = vrot.slane %v2175_v61, 4 }
 0x1b8   : > { %2869 = vmatpush3.bf16.msra.mxu1 %v3275_v3  ;;  %2996 = vmatprep.subr.bf16.mxu0 %v3279_v5  ;;  %v2190_v3 = vrot.slane %v2189_v63, 4 }
 0x1b9   : > { %2870 = vmatprep.subr.bf16.mxu1 %v3277_v6 }
 0x1bb   : > { %2997 = vmatpush3.bf16.msra.mxu0 %v3279_v5  ;;  %v2194_v5 = vrot.slane %v2192_v0, 5 }
 0x1bc   : > { %2871 = vmatpush3.bf16.msra.mxu1 %v3278_v9  ;;  %2998 = vmatprep.subr.bf16.mxu0 %v3282_v11  ;;  %v3301_v9 = vld [vmem:[#allocation9 + $0x8] sm:$0xff]  }
 0x1bd   : > { %2872 = vmatprep.subr.bf16.mxu1 %v3280_v12  ;;  %v2195_v12 = vsel %vm4017_vm7, %v2190_v3, %v2194_v5  ;;  %v2669_v3 = vld [vmem:[%s4203_s5] ss:$0 sm:$0xff] }
 0x1bf   : > { %2999 = vmatpush3.bf16.msra.mxu0 %v3282_v11  ;;  %v2181_v11 = vsel %vm4017_vm7, %v2176_v2, %v2180_v48 }
 0x1c0   : > { %2873 = vmatpush3.bf16.msra.mxu1 %v3281_v16  ;;  %3000 = vmatprep.subr.bf16.mxu0 %v3285_v17  ;;  %v2691_v15 = vcombine.low %v2181_v11, %v2195_v12 }
 0x1c1   : > { %2874 = vmatprep.subr.bf16.mxu1 %v3283_v19  ;;  %v2216_v19 = vrot.slane %v2214_v10, 5 }
 0x1c3   : > { %3001 = vmatpush3.bf16.msra.mxu0 %v3285_v17  ;;  %v2208_v17 = vrot.slane %v2206_v43, 5  ;;  %v2217_v13 = vor.u32 %v2216_v19, %v2213_v8 }
 0x1c4   : > { %2875 = vmatpush3.bf16.msra.mxu1 %v3284_v22  ;;  %3026 = vmatprep.subr.bf16.mxu0 %v3287_v27  ;;  %v2222_v22 = vrot.slane %v2220_v14, 5 }
 0x1c5   : > { %3006 = vmatprep.subr.bf16.mxu1 %v3289_v29  ;;  %v2218_v39 = vrot.slane %v2217_v13, 4  ;;  %v2670_v13 = vld [vmem:[%s4270_s10] ss:$0 sm:$0xff]  ;;  %s2705_s10 = sshll.u32 %s4276_s13, 3 }
 0x1c6   : > { %3003 = vmatmul.mubr.bf16.vlgmr.msra.gmra.mxu0 %v2644_v24  ;;  %v3295_v24 = vld [vmem:[#allocation9 + $0x20] sm:$0xff]   ;;  %s2396_s19 = sadd.s32 %s2705_s10, %s2545_s21  ;;  %s4138_s21 = scalar_lea.sflag [#allocation5], %s528_s8 }
 0x1c7   : > { %1924 = vmatmul.mubr.bf16.vlgmr.msra.gmra.mxu1 %v2581_v55  ;;  %3027 = vmatpush3.bf16.msra.mxu0 %v3287_v27  ;;  %v2202_v55 = vrot.slane %v2200_v44, 5  ;;  %v2223_v25 = vsel %vm4017_vm7, %v2218_v39, %v2222_v22 }
 0x1c8   : > { %1931 = vmatprep.mubr.bf16.mxu1 %v2643_v26  ;;  %3007 = vmatpush3.bf16.msra.mxu1 %v3289_v29 }
 0x1c9   : > { %3028 = vmatprep.subr.bf16.mxu0 %v3288_v28  ;;  %3008 = vmatprep.subr.bf16.mxu1 %v3291_v58  ;;  %v2203_v6 = vor.u32 %v2202_v55, %v2199_v53 }
 0x1ca   : > { %3042 = vmatprep.mubr.bf16.mxu0 %v2691_v15 }
 0x1cb   : > { %3029 = vmatpush3.bf16.msra.mxu0 %v3288_v28  ;;  %v2204_v16 = vrot.slane %v2203_v6, 4 }
 0x1cc   : > { %3030 = vmatprep.subr.bf16.mxu0 %v3290_v30  ;;  %3009 = vmatpush3.bf16.msra.mxu1 %v3291_v58 }
 0x1cd   : > { %3010 = vmatprep.subr.bf16.mxu1 %v3293_v37  ;;  %v2209_v23 = vsel %vm4017_vm7, %v2204_v16, %v2208_v17 }
 0x1ce   : > { %v2692_v26 = vcombine.low %v2209_v23, %v2223_v25 }
 0x1cf   : > { %1932 = vmatmul.mubr.bf16.gmra.mxu1 %v2642_v52  ;;  %3031 = vmatpush3.bf16.msra.mxu0 %v3290_v30 }
 0x1d0   : > { %3032 = vmatprep.subr.bf16.mxu0 %v3292_v20  ;;  %3011 = vmatpush3.bf16.msra.mxu1 %v3293_v37 }
 0x1d1   : > { %3012 = vmatprep.subr.bf16.mxu1 %v3295_v24 }
 0x1d3   : > { %3033 = vmatpush3.bf16.msra.mxu0 %v3292_v20 }
 0x1d4   : > { %3034 = vmatprep.subr.bf16.mxu0 %v3294_v7  ;;  %3013 = vmatpush3.bf16.msra.mxu1 %v3295_v24 }
 0x1d5   : > { %3014 = vmatprep.subr.bf16.mxu1 %v3297_v33 }
 0x1d7   : > { %3035 = vmatpush3.bf16.msra.mxu0 %v3294_v7 }
 0x1d8   : > { %3036 = vmatprep.subr.bf16.mxu0 %v3296_v4  ;;  %3015 = vmatpush3.bf16.msra.mxu1 %v3297_v33 }
 0x1d9   : > { %3016 = vmatprep.subr.bf16.mxu1 %v3299_v60 }
 0x1db   : > { %3037 = vmatpush3.bf16.msra.mxu0 %v3296_v4 }
 0x1dc   : > { %3038 = vmatprep.subr.bf16.mxu0 %v3298_v45  ;;  %3017 = vmatpush3.bf16.msra.mxu1 %v3299_v60 }
 0x1dd   : > { %3018 = vmatprep.subr.bf16.mxu1 %v3301_v9 }
 0x1df   : > { %3039 = vmatpush3.bf16.msra.mxu0 %v3298_v45 }
 0x1e0   : > { %3040 = vmatprep.subr.bf16.mxu0 %v3300_v46  ;;  %3019 = vmatpush3.bf16.msra.mxu1 %v3301_v9 }
 0x1e1   : > { %3020 = vmatprep.subr.bf16.mxu1 %v3302_v21 }
 0x1e3   : > { %3041 = vmatpush3.bf16.msra.mxu0 %v3300_v46 }
 0x1e4   : > { %3021 = vmatpush3.bf16.msra.mxu1 %v3302_v21 }
 0x1e6   : > { %3043 = vmatmul.mubr.bf16.vlgmr.msra.gmra.mxu0 %v2692_v26 }
 0x246   : > { %v2800_v52 = vpop.f32.mrf.mxu1  ;;  %v2964_v24 = vpop.f32.mrf.mxu0 }
 0x248   : > { %v2801_v27 = vpop.f32.mrf.mxu1  ;;  %v1412_v31 = vpop.f32.mrf.mxu0 }
 0x249   : > { %v2802_v47 = vadd.f32 %v2801_v27, %v2800_v52 }
 0x24a   : > { %v2803_v28 = vpop.f32.mrf.mxu1  ;;  %v2965_v33 = vpop.f32.mrf.mxu0 }
 0x24b   : > { %v1413_v54 = vadd.f32 %v2802_v47, %v1412_v31 }
 0x24c   : > { %v2804_v29 = vpop.f32.mrf.mxu1  ;;  %v1415_v40 = vpop.f32.mrf.mxu0 }
 0x24d   : > { %v2805_v56 = vadd.f32 %v2804_v29, %v2803_v28 }
 0x24e   : > { %v2806_v30 = vpop.f32.mrf.mxu1 }
 0x24f   : > { %v1416_v0 = vadd.f32 %v2805_v56, %v1415_v40 }
 0x250   : > { %v2807_v58 = vpop.f32.mrf.mxu1 }
 0x251   : > { %v2808_v1 = vadd.f32 %v2807_v58, %v2806_v30 }
 0x252   : > { %v2809_v20 = vpop.f32.mrf.mxu1 }
 0x253   : > { %v1421_v8 = vadd.f32 %v2964_v24, %v2808_v1 }
 0x254   : > { %v2810_v37 = vpop.f32.mrf.mxu1 }
 0x255   : > { %v2811_v48 = vadd.f32 %v2810_v37, %v2809_v20 }
 0x257   : > { %v1424_v19 = vadd.f32 %v2965_v33, %v2811_v48 }
 0x266   : > { %v2838_v7 = vpop.f32.mrf.mxu1  ;;  %v2984_v35 = vpop.f32.mrf.mxu0 }
 0x268   : > { %v2839_v4 = vpop.f32.mrf.mxu1  ;;  %v1654_v38 = vpop.f32.mrf.mxu0 }
 0x269   : > { %v2840_v49 = vadd.f32 %v2839_v4, %v2838_v7 }
 0x26a   : > { %v2841_v32 = vpop.f32.mrf.mxu1  ;;  %v2985_v42 = vpop.f32.mrf.mxu0 }
 0x26b   : > { %v1606_v60 = vadd.f32 %v2840_v49, %v1413_v54  ;;  %v2702_v54 = vld [vmem:[%s4274_s28] ss:$0 sm:$0xff]  ;;  %s3435_s28 = scalar_lea.vmem %s4134_s11, 256 }
 0x26c   : > { %v2842_v34 = vpop.f32.mrf.mxu1  ;;  %v1657_v50 = vpop.f32.mrf.mxu0  ;;  %p3436_p1 = scmp.ne.s32.totalorder %s4134_s11, %s3435_s28 }
 0x26d   : > { %v2843_v61 = vadd.f32 %v2842_v34, %v2841_v32  ;;  %v1655_v43 = vadd.f32 %v1654_v38, %v1606_v60 }
 0x26e   : > { %v2844_v36 = vpop.f32.mrf.mxu1  ;;  %p3437_p4 = pnand %p3436_p1, %p3715_p6 }
 0x26f   : > { %v1609_v59 = vadd.f32 %v2843_v61, %v1416_v0 }
 0x270   : > { %v2845_v41 = vpop.f32.mrf.mxu1  ;;  %p3438_p11 = pneg %p3437_p4 }
 0x271   : > { %v2846_v46 = vadd.f32 %v2845_v41, %v2844_v36  ;;  %v1658_v14 = vadd.f32 %v1657_v50, %v1609_v59  ;;  %v2679_v50 = vld [vmem:[%s4273_s6] ss:$0 sm:$0xff] }
 0x272   : > { %v2847_v45 = vpop.f32.mrf.mxu1 }
 0x273   : > { %v1614_v15 = vadd.f32 %v2846_v46, %v1421_v8 }
 0x274   : > { %v2848_v51 = vpop.f32.mrf.mxu1 }
 0x275   : > { %v2849_v11 = vadd.f32 %v2848_v51, %v2847_v45  ;;  %v1663_v26 = vadd.f32 %v2984_v35, %v1614_v15 }
 0x277   : > { %v1617_v39 = vadd.f32 %v2849_v11, %v1424_v19 }
 0x279   : > { %v1666_v37 = vadd.f32 %v2985_v42, %v1617_v39  ;;  %v2701_v42 = vld [vmem:[%s4272_s12] ss:$0 sm:$0xff]  ;;  %s2706_s12 = sshll.u32 %s2396_s19, 6 }
 0x27a   : > { %s4132_s14 = scalar_lea.hbm %s4278_s22, %s2706_s12 }
 0x286   : > { %v3004_v57 = vpop.f32.mrf.mxu0 }
 0x287   : > { %v2876_v44 = vpop.f32.mrf.mxu1 }
 0x288   : > { %v1974_v62 = vpop.f32.mrf.mxu0 }
 0x289   : > { %v2877_v63 = vpop.f32.mrf.mxu1 }
 0x28a   : > { %v2878_v18 = vadd.f32 %v2877_v63, %v2876_v44  ;;  %v3005_v53 = vpop.f32.mrf.mxu0 }
 0x28b   : > { %v2879_v55 = vpop.f32.mrf.mxu1 }
 0x28c   : > { %v1975_v2 = vadd.f32 %v2878_v18, %v1974_v62  ;;  %v1977_v6 = vpop.f32.mrf.mxu0 }
 0x28d   : > { %v2880_v5 = vpop.f32.mrf.mxu1 }
 0x28e   : > { %v1989_v10 = vadd.f32 %v1975_v2, %v1655_v43  ;;  %v2881_v9 = vadd.f32 %v2880_v5, %v2879_v55 }
 0x28f   : > { %v2882_v12 = vpop.f32.mrf.mxu1 }
 0x290   : > { %v2000_v16 = vmul.f32 %v2669_v3, %v1989_v10  ;;  %v1978_v17 = vadd.f32 %v2881_v9, %v1977_v6 }
 0x291   : > { %v2883_v21 = vpop.f32.mrf.mxu1 }
 0x292   : > { %v1990_v22 = vadd.f32 %v1978_v17, %v1658_v14  ;;  %v2884_v23 = vadd.f32 %v2883_v21, %v2882_v12  ;;  %v2011_v28 = vadd.f32 %v2670_v13, %v2000_v16 }
 0x293   : > { %v2885_v25 = vpop.f32.mrf.mxu1 }
 0x294   : > { %v2001_v52 = vmul.f32 %v2669_v3, %v1990_v22  ;;  %v1983_v27 = vadd.f32 %v3004_v57, %v2884_v23  ;;  %v2015_v4 = vmax.f32 %v2011_v28, 0.0  ;;  %v2680_v57 = vld [vmem:[%s4275_s20] ss:$0 sm:$0xff]  ;;  %s3441_s20 = scalar_lea.vmem %s3440_s24, 512 }
 0x295   : > { %v2886_v29 = vpop.f32.mrf.mxu1  ;;  %p3443_p8 = scmp.lt.s32.totalorder %s3441_s20, %s3435_s28 }
 0x296   : > { %v1991_v30 = vadd.f32 %v1983_v27, %v1663_v26  ;;  %v2887_v58 = vadd.f32 %v2886_v29, %v2885_v25  ;;  %v2012_v20 = vadd.f32 %v2670_v13, %v2001_v52 }
 0x297   : > { %p3444_p9 = por %p3443_p8, %p3442_p13 }
 0x298   : > { %v2002_v7 = vmul.f32 %v2669_v3, %v1991_v30  ;;  %v1986_v24 = vadd.f32 %v3005_v53, %v2887_v58  ;;  %v2016_v31 = vmax.f32 %v2012_v20, 0.0 }
 0x299   : > { %p3445_p10 = pnand %p3444_p9, %p3438_p11 }
 0x29a   : > { %v1992_v32 = vadd.f32 %v1986_v24, %v1666_v37  ;;  %v2019_v33 = vpack.c.bf16 %v2016_v31, %v2015_v4  ;;  %v2013_v34 = vadd.f32 %v2670_v13, %v2002_v7 }
 0x29c   : > { %v2003_v40 = vmul.f32 %v2669_v3, %v1992_v32  ;;  %3022 = vmatprep.mubr.bf16.mxu1 %v2019_v33  ;;  %v2017_v38 = vmax.f32 %v2013_v34, 0.0 }
 0x29e   : > { %v2014_v36 = vadd.f32 %v2670_v13, %v2003_v40 }
 0x2a0   : > { %v2018_v35 = vmax.f32 %v2014_v36, 0.0 }
 0x2a2   : > { %v2020_v41 = vpack.c.bf16 %v2018_v35, %v2017_v38 }
 0x2a4   : > { %3023 = vmatmul.mubr.bf16.vlgmr.msra.gmra.mxu1 %v2020_v41 }
 0x2a6   : > { %v3044_v45 = vpop.f32.mrf.mxu0 }
 0x2a7   : > { %v2354_v51 = vmul.f32 %v3044_v45, %v2701_v42 }
 0x2a8   : > { %v2330_v47 = vpop.f32.mrf.mxu0 }
 0x2a9   : > { %v2352_v60 = vmul.f32 %v2701_v42, %v2330_v47  ;;  %v2365_v63 = vadd.f32 %v2702_v54, %v2354_v51 }
 0x2aa   : > { %v3045_v49 = vpop.f32.mrf.mxu0 }
 0x2ab   : > { %v2355_v0 = vmul.f32 %v3045_v49, %v2701_v42  ;;  %v2363_v46 = vadd.f32 %v2702_v54, %v2352_v60 }
 0x2ac   : > { %v2333_v61 = vpop.f32.mrf.mxu0 }
 0x2ad   : > { %v2353_v55 = vmul.f32 %v2701_v42, %v2333_v61  ;;  %v2366_v48 = vadd.f32 %v2702_v54, %v2355_v0 }
 0x2af   : > { %v2364_v8 = vadd.f32 %v2702_v54, %v2353_v55 }
 0x364   : > { %v3024_v56 = vpop.f32.mrf.mxu1 }
 0x365   : > { %v2143_v44 = vmul.f32 %v3024_v56, %v2679_v50 }
 0x366   : > { %v2119_v62 = vpop.f32.mrf.mxu1 }
 0x367   : > { %v2154_v1 = vadd.f32 %v2680_v57, %v2143_v44  ;;  %v2141_v18 = vmul.f32 %v2679_v50, %v2119_v62 }
 0x368   : > { %v3025_v53 = vpop.f32.mrf.mxu1 }
 0x369   : > { %v2152_v43 = vadd.f32 %v2680_v57, %v2141_v18  ;;  %v2144_v59 = vmul.f32 %v3025_v53, %v2679_v50  ;;  %v2369_v3 = vadd.f32 %v2365_v63, %v2154_v1 }
 0x36a   : > { %v2122_v2 = vpop.f32.mrf.mxu1 }
 0x36b   : > { %v2155_v5 = vadd.f32 %v2680_v57, %v2144_v59  ;;  %v2142_v6 = vmul.f32 %v2679_v50, %v2122_v2  ;;  %v2367_v10 = vadd.f32 %v2363_v46, %v2152_v43  ;;  %v2373_v12 = vmax.f32 %v2369_v3, 0.0 }
 0x36d   : > { %v2370_v9 = vadd.f32 %v2366_v48, %v2155_v5  ;;  %v2153_v11 = vadd.f32 %v2680_v57, %v2142_v6  ;;  %v2371_v16 = vmax.f32 %v2367_v10, 0.0 }
 0x36f   : > { %v2374_v14 = vmax.f32 %v2370_v9, 0.0  ;;  %v2368_v15 = vadd.f32 %v2364_v8, %v2153_v11 }
 0x371   : > { %v2762_v17 = vpack.c.bf16 %v2374_v14, %v2373_v12  ;;  %v2372_v19 = vmax.f32 %v2368_v15, 0.0 }
 0x373   : > { %2769 = vst [vmem:[%s530_s23 + $0x8] sm:$0xff] %v2762_v17   ;;  %v2757_v21 = vpack.c.bf16 %v2372_v19, %v2371_v16 }
 0x375   : > { %2758 = vst [vmem:[%s530_s23] sm:$0xff] %v2757_v21  }
 0x376   : > { %3448 = shalt.err (!%p3445_p10)
}
 0x377   : > { %s3449_s16 = scalar_lea.hbm %s4132_s14, 256  ;;  %s3453_s7 = scalar_lea.hbm %s4278_s22, 1024 }
 0x378   : > { %p3450_p0 = scmp.ne.s32.totalorder %s4132_s14, %s3449_s16  ;;  %p3454_p5 = scmp.lt.s32.totalorder %s4132_s14, %s4278_s22 }
 0x379   : > { %p3455_p7 = scmp.lt.s32.totalorder %s3453_s7, %s3449_s16 }
 0x37a   : > { %p3451_p12 = pnand %p3450_p0, %p3715_p6 }
 0x37b   : > { %p3456_p3 = por %p3455_p7, %p3454_p5 }
 0x37c   : > { %p3452_p2 = pneg %p3451_p12 }
 0x37e   : > { %p3457_p1 = pnand %p3456_p3, %p3452_p2 }
 0x380   : > { %3460 = shalt.err (!%p3457_p1)
}
 0x381   : > { %s3573_s12 = smov 64   ;;  %s3574_s23 = smov 4  }
 0x382   : > { %3067 = dma.vmem_to_hbm [thread:$0]  (%p3715_p6), %s4134_s11, 256, %s4132_s14, %s4138_s21, %s3573_s12, %s3573_s12, %s3574_s23  }
 0x383 PF: > { %s4279_s6 = sld [smem:[#allocation17_spill]]  ;;  %p3099_p4 = scmp.ge.s32.totalorder %s3563_s18, 2 }
 0x384   : > { %s4280_s26 = sld [smem:[#allocation22_spill]] }
 0x389   : > { %s2414_s28 = sand.u32 1, %s4279_s6  }
 0x38a   : > { %p4281_p11 = scmp.ne.s32.totalorder %s4280_s26, 0  ;;  %s2415_s25 = scalar_lea.sflag [#allocation5], %s2414_s28 }
 0x38c   : > { %p3087_p13 = pnand %p3099_p4, %p4281_p11 }
 0x38e   : > { %p3088_p8 = pneg %p3087_p13 }
 0x390   : > { %3518 = dma.done.wait (%p3088_p8), %s2415_s25, 256  }
 0x391   : > { %3520 = vsyncadd (%p3088_p8), %s2415_s25, 4294967040  ;;  %s31_s18 = sadd.s32 1, %s3563_s18   ;;  %s4282_s25 = sld [smem:[#allocation18_spill]] }
 0x392   : > { %p28_p9 = scmp.ge.s32.totalorder %s31_s18, 6   ;;  %s4283_s14 = sld [smem:[#allocation20_spill]] }
 0x393   : > { %s4284_s16 = sld [smem:[#allocation23_spill]]  ;;  %s4285_s26 = smov %s3531_s27 }
 0x394   : > { %s4286_s27 = smov %s3810_s4  ;;  %s4287_s28 = smov %s3539_s29 }
 0x395   : > { %s4288_s29 = smov %s3543_s30  ;;  %s4289_s30 = smov %s3807_s15 }
 0x396   : > { %s4290_s15 = smov %s3559_s17  ;;  %s4291_s17 = smov %s4297_s9 }
 0x397   :  { %30 = sbr.rel (!%p28_p9) target bundleno = 22 (0x16), region = 137 }
 0x39c   :  { %2420 = vsyncpa [#allocation4], 1 }
 0x39d   :  { %2422 = vsyncpa [#allocation4 + $0x1], 1 }
 0x39e   :  { %2423 = vsyncpa [#allocation7], 1 }
 0x39f   :  { %2424 = vsyncpa [#allocation10], 1 }
 0x3a0   :  { %2425 = vsyncpa [#allocation5], 1 }
 0x3a1   :  { %2427 = vsyncpa [#allocation5 + $0x1], 1 }

</bundles_post_ra>
